<compile_context>
chip_gen: v6e
topology: v6e:2x2x1
jax: 0.10.0
libtpu: 0.0.40
codegen_flags: <defaults>
</compile_context>

<pallas_src>
import functools

import jax
import jax.numpy as jnp
from jax.experimental import pallas as pl
from jax.experimental.pallas import tpu as pltpu


# ----------------------------------------------------------------------------
# Pallas kernel: one M-tile of (patches @ W + b) followed by ReLU.
#   p_ref: [TILE_M, K]   w_ref: [K, N]   b_ref: [1, N]   o_ref: [TILE_M, N]
# ----------------------------------------------------------------------------
def _conv_mm_bias_relu_kernel(p_ref, w_ref, b_ref, o_ref):
    acc = jnp.dot(p_ref[...], w_ref[...], preferred_element_type=jnp.float32)
    o_ref[...] = jnp.maximum(acc + b_ref[...], 0.0).astype(o_ref.dtype)


def _round_up(x, m):
    return (x + m - 1) // m * m


def conv_mm_bias_relu(patches, w2d, b2d, *, tile_m=512, use_bf16=False):
    """Tiled, pipelined matmul+bias+ReLU over M = B*H_out*W_out rows."""
    m, k = patches.shape
    _, n = w2d.shape

    align = 16 if use_bf16 else 8          # sublane packing for the lhs tile
    tm = min(tile_m, _round_up(m, align))
    m_pad = _round_up(m, tm)
    if m_pad != m:
        patches = jnp.pad(patches, ((0, m_pad - m), (0, 0)))

    lhs = patches.astype(jnp.bfloat16) if use_bf16 else patches
    rhs = w2d.astype(jnp.bfloat16) if use_bf16 else w2d

    grid_m = m_pad // tm
    bytes_accessed = (lhs.dtype.itemsize * m_pad * k        # patches stream
                      + rhs.dtype.itemsize * k * n          # resident weight
                      + 4 * n                               # bias
                      + 4 * m_pad * n)                      # output stream

    out = pl.pallas_call(
        _conv_mm_bias_relu_kernel,
        out_shape=jax.ShapeDtypeStruct((m_pad, n), jnp.float32),
        grid=(grid_m,),
        in_specs=[
            pl.BlockSpec((tm, k), lambda i: (i, 0)),   # streamed row tiles
            pl.BlockSpec((k, n), lambda i: (0, 0)),    # weight stays resident
            pl.BlockSpec((1, n), lambda i: (0, 0)),    # bias stays resident
        ],
        out_specs=pl.BlockSpec((tm, n), lambda i: (i, 0)),
        compiler_params=pltpu.CompilerParams(
            dimension_semantics=("parallel",)),        # megacore on v7x
        cost_estimate=pl.CostEstimate(
            flops=2 * m_pad * k * n,
            transcendentals=0,
            bytes_accessed=bytes_accessed),
    )(lhs, rhs, b2d)

    return out[:m] if m_pad != m else out


# ----------------------------------------------------------------------------
# JAX glue: im2col for 4x4 kernels (arbitrary stride / zero padding), NHWC.
# Patch channel ordering is (ki, kj, c)  ==  flattened HWIO weight rows.
# ----------------------------------------------------------------------------
def im2col_4x4(x_nhwc, stride, pad):
    b, h, w, c = x_nhwc.shape
    xp = jnp.pad(x_nhwc, ((0, 0), (pad, pad), (pad, pad), (0, 0)))
    h_out = (h + 2 * pad - 4) // stride + 1
    w_out = (w + 2 * pad - 4) // stride + 1
    cols = [
        xp[:, ki:ki + stride * h_out:stride, kj:kj + stride * w_out:stride, :]
        for ki in range(4) for kj in range(4)
    ]
    patches = jnp.concatenate(cols, axis=-1)          # [B, Ho, Wo, 16*C]
    return patches.reshape(b * h_out * w_out, 16 * c), h_out, w_out


def _layer_cfg(size):
    init_stride = 2 if size == 64 else 1
    init_padding = 1 if size == 64 else 2
    return [(init_stride, init_padding), (2, 1), (2, 1), (2, 1)]


# ----------------------------------------------------------------------------
# Full forward: 4 x (im2col -> Pallas conv kernel), then NCHW-order flatten.
# ----------------------------------------------------------------------------
@functools.partial(jax.jit, static_argnames=("size", "use_bf16"))
def cnn_encoder_forward(x_nchw, params, size=64, use_bf16=False):
    x = jnp.transpose(x_nchw, (0, 2, 3, 1))           # NCHW -> NHWC
    b = x.shape[0]
    for li, (s, p) in enumerate(_layer_cfg(size)):
        w = params[f"w{li}"]                          # [4, 4, Cin, Cout] HWIO
        patches, ho, wo = im2col_4x4(x, s, p)
        y = conv_mm_bias_relu(
            patches,
            w.reshape(-1, w.shape[-1]),
            params[f"b{li}"].reshape(1, -1),
            use_bf16=use_bf16,
        )
        x = y.reshape(b, ho, wo, -1)
    # torch.flatten(NCHW, 1) ordering: back to NCHW before flattening.
    return jnp.transpose(x, (0, 3, 1, 2)).reshape(b, -1)


def init_params(key, in_channel=3):
    chans = [(in_channel, 32), (32, 32), (32, 64), (64, 64)]
    ks = jax.random.split(key, 2 * len(chans))
    params = {}
    for li, (ci, co) in enumerate(chans):
        params[f"w{li}"] = 0.05 * jax.random.normal(
            ks[2 * li], (4, 4, ci, co), jnp.float32)
        params[f"b{li}"] = 0.01 * jax.random.normal(
            ks[2 * li + 1], (co,), jnp.float32)
    return params


def reference_forward(x_nchw, params, size=64):
    """Plain-JAX reference (real conv op, highest precision)."""
    x = jnp.transpose(x_nchw, (0, 2, 3, 1))
    for li, (s, p) in enumerate(_layer_cfg(size)):
        x = jax.lax.conv_general_dilated(
            x, params[f"w{li}"], window_strides=(s, s),
            padding=[(p, p), (p, p)],
            dimension_numbers=("NHWC", "HWIO", "NHWC"),
            precision=jax.lax.Precision.HIGHEST)
        x = jnp.maximum(x + params[f"b{li}"], 0.0)
    b = x.shape[0]
    return jnp.transpose(x, (0, 3, 1, 2)).reshape(b, -1)


if __name__ == "__main__":
    B, C_IN, SIZE = 2, 3, 64          # module defaults: in_channel=3, size=64

    key = jax.random.PRNGKey(0)
    kx, kp = jax.random.split(key)
    x = jax.random.normal(kx, (B, C_IN, SIZE, SIZE), jnp.float32)
    params = init_params(kp, C_IN)

    # f32 path (tight validation against a real conv reference).
    out = jax.block_until_ready(cnn_encoder_forward(x, params, size=SIZE))
    ref = reference_forward(x, params, size=SIZE)
    expected_features = 64 * (SIZE // 16) * (SIZE // 16)
    assert out.shape == (B, expected_features), out.shape
    assert jnp.allclose(out, ref, atol=2e-3, rtol=2e-3), "f32 mismatch vs reference"

    # bf16-operand path (v6e/v7x bandwidth/MXU win); loose sanity check only.
    out_bf16 = jax.block_until_ready(
        cnn_encoder_forward(x, params, size=SIZE, use_bf16=True))
    assert out_bf16.shape == (B, expected_features)
    assert float(jnp.max(jnp.abs(out_bf16 - ref))) < 0.25, "bf16 path diverged"

    print("KERNEL_OK")
</pallas_src>

<mosaic_0001>
module attributes {stable_mosaic.version = 11 : i64} {
  func.func @_conv_mm_bias_relu_kernel(%arg0: i32, %arg1: memref<512x48xf32, #tpu.memory_space<vmem>>, %arg2: memref<48x32xf32, #tpu.memory_space<vmem>>, %arg3: memref<1x32xf32, #tpu.memory_space<vmem>>, %arg4: memref<512x32xf32, #tpu.memory_space<vmem>>) attributes {dimension_semantics = [#tpu.dimension_semantics<parallel>], iteration_bounds = array<i64: 4>, scalar_prefetch = 0 : i64, scratch_operands = 0 : i64, tpu.core_type = #tpu.core_type<tc>, window_params = [{transform_indices = @transform_0, window_bounds = array<i64: 512, 48>}, {pipeline_mode = #tpu.pipeline_mode<synchronous>, transform_indices = @transform_1, window_bounds = array<i64: 48, 32>}, {pipeline_mode = #tpu.pipeline_mode<synchronous>, transform_indices = @transform_2, window_bounds = array<i64: 1, 32>}, {transform_indices = @transform_3, window_bounds = array<i64: 512, 32>}]} {
    %c0 = arith.constant 0 : index
    %c0_0 = arith.constant 0 : index
    %0 = vector.load %arg1[%c0, %c0_0] : memref<512x48xf32, #tpu.memory_space<vmem>>, vector<512x48xf32>
    %c0_1 = arith.constant 0 : index
    %c0_2 = arith.constant 0 : index
    %1 = vector.load %arg2[%c0_1, %c0_2] : memref<48x32xf32, #tpu.memory_space<vmem>>, vector<48x32xf32>
    %cst = arith.constant dense<0.000000e+00> : vector<512x32xf32>
    %2 = tpu.matmul %0, %1, %cst {dimension_numbers = #tpu.dot_dimension_numbers<[1], [0], [0], [1], [0, 0, 1, 1], [], []>} : vector<512x48xf32>, vector<48x32xf32>, vector<512x32xf32> -> vector<512x32xf32>
    %c0_3 = arith.constant 0 : index
    %c0_4 = arith.constant 0 : index
    %3 = vector.load %arg3[%c0_3, %c0_4] : memref<1x32xf32, #tpu.memory_space<vmem>>, vector<1x32xf32>
    %4 = vector.broadcast %3 : vector<1x32xf32> to vector<512x32xf32>
    %5 = arith.addf %2, %4 : vector<512x32xf32>
    %cst_5 = arith.constant 0.000000e+00 : f32
    %6 = vector.broadcast %cst_5 : f32 to vector<512x32xf32>
    %7 = arith.maximumf %5, %6 : vector<512x32xf32>
    %c0_6 = arith.constant 0 : index
    %c0_7 = arith.constant 0 : index
    %8 = vector.load %arg4[%c0_6, %c0_7] : memref<512x32xf32, #tpu.memory_space<vmem>>, vector<512x32xf32>
    tpu.vector_store %arg4[%c0_6, %c0_7], %7 {strides = array<i32>} : memref<512x32xf32, #tpu.memory_space<vmem>>, vector<512x32xf32>,
    return
  }
  func.func @transform_0(%arg0: i32) -> (i32, i32) {
    %c0_i32 = arith.constant 0 : i32
    %c0_i32_0 = arith.constant 0 : i32
    return %arg0, %c0_i32 : i32, i32
  }
  func.func @transform_1(%arg0: i32) -> (i32, i32) {
    %c0_i32 = arith.constant 0 : i32
    %c0_i32_0 = arith.constant 0 : i32
    %c0_i32_1 = arith.constant 0 : i32
    return %c0_i32, %c0_i32_0 : i32, i32
  }
  func.func @transform_2(%arg0: i32) -> (i32, i32) {
    %c0_i32 = arith.constant 0 : i32
    %c0_i32_0 = arith.constant 0 : i32
    %c0_i32_1 = arith.constant 0 : i32
    return %c0_i32, %c0_i32_0 : i32, i32
  }
  func.func @transform_3(%arg0: i32) -> (i32, i32) {
    %c0_i32 = arith.constant 0 : i32
    %c0_i32_0 = arith.constant 0 : i32
    return %arg0, %c0_i32 : i32, i32
  }
}

module attributes {stable_mosaic.version = 11 : i64} {
  func.func @_conv_mm_bias_relu_kernel(%arg0: i32, %arg1: memref<512x512xf32, #tpu.memory_space<vmem>>, %arg2: memref<512x32xf32, #tpu.memory_space<vmem>>, %arg3: memref<1x32xf32, #tpu.memory_space<vmem>>, %arg4: memref<512x32xf32, #tpu.memory_space<vmem>>) attributes {dimension_semantics = [#tpu.dimension_semantics<parallel>], iteration_bounds = array<i64: 1>, scalar_prefetch = 0 : i64, scratch_operands = 0 : i64, tpu.core_type = #tpu.core_type<tc>, window_params = [{transform_indices = @transform_0, window_bounds = array<i64: 512, 512>}, {pipeline_mode = #tpu.pipeline_mode<synchronous>, transform_indices = @transform_1, window_bounds = array<i64: 512, 32>}, {pipeline_mode = #tpu.pipeline_mode<synchronous>, transform_indices = @transform_2, window_bounds = array<i64: 1, 32>}, {transform_indices = @transform_3, window_bounds = array<i64: 512, 32>}]} {
    %c0 = arith.constant 0 : index
    %c0_0 = arith.constant 0 : index
    %0 = vector.load %arg1[%c0, %c0_0] : memref<512x512xf32, #tpu.memory_space<vmem>>, vector<512x512xf32>
    %c0_1 = arith.constant 0 : index
    %c0_2 = arith.constant 0 : index
    %1 = vector.load %arg2[%c0_1, %c0_2] : memref<512x32xf32, #tpu.memory_space<vmem>>, vector<512x32xf32>
    %cst = arith.constant dense<0.000000e+00> : vector<512x32xf32>
    %2 = tpu.matmul %0, %1, %cst {dimension_numbers = #tpu.dot_dimension_numbers<[1], [0], [0], [1], [0, 0, 1, 1], [], []>} : vector<512x512xf32>, vector<512x32xf32>, vector<512x32xf32> -> vector<512x32xf32>
    %c0_3 = arith.constant 0 : index
    %c0_4 = arith.constant 0 : index
    %3 = vector.load %arg3[%c0_3, %c0_4] : memref<1x32xf32, #tpu.memory_space<vmem>>, vector<1x32xf32>
    %4 = vector.broadcast %3 : vector<1x32xf32> to vector<512x32xf32>
    %5 = arith.addf %2, %4 : vector<512x32xf32>
    %cst_5 = arith.constant 0.000000e+00 : f32
    %6 = vector.broadcast %cst_5 : f32 to vector<512x32xf32>
    %7 = arith.maximumf %5, %6 : vector<512x32xf32>
    %c0_6 = arith.constant 0 : index
    %c0_7 = arith.constant 0 : index
    %8 = vector.load %arg4[%c0_6, %c0_7] : memref<512x32xf32, #tpu.memory_space<vmem>>, vector<512x32xf32>
    tpu.vector_store %arg4[%c0_6, %c0_7], %7 {strides = array<i32>} : memref<512x32xf32, #tpu.memory_space<vmem>>, vector<512x32xf32>,
    return
  }
  func.func @transform_0(%arg0: i32) -> (i32, i32) {
    %c0_i32 = arith.constant 0 : i32
    %c0_i32_0 = arith.constant 0 : i32
    return %arg0, %c0_i32 : i32, i32
  }
  func.func @transform_1(%arg0: i32) -> (i32, i32) {
    %c0_i32 = arith.constant 0 : i32
    %c0_i32_0 = arith.constant 0 : i32
    %c0_i32_1 = arith.constant 0 : i32
    return %c0_i32, %c0_i32_0 : i32, i32
  }
  func.func @transform_2(%arg0: i32) -> (i32, i32) {
    %c0_i32 = arith.constant 0 : i32
    %c0_i32_0 = arith.constant 0 : i32
    %c0_i32_1 = arith.constant 0 : i32
    return %c0_i32, %c0_i32_0 : i32, i32
  }
  func.func @transform_3(%arg0: i32) -> (i32, i32) {
    %c0_i32 = arith.constant 0 : i32
    %c0_i32_0 = arith.constant 0 : i32
    return %arg0, %c0_i32 : i32, i32
  }
}

module attributes {stable_mosaic.version = 11 : i64} {
  func.func @_conv_mm_bias_relu_kernel(%arg0: i32, %arg1: memref<128x512xf32, #tpu.memory_space<vmem>>, %arg2: memref<512x64xf32, #tpu.memory_space<vmem>>, %arg3: memref<1x64xf32, #tpu.memory_space<vmem>>, %arg4: memref<128x64xf32, #tpu.memory_space<vmem>>) attributes {dimension_semantics = [#tpu.dimension_semantics<parallel>], iteration_bounds = array<i64: 1>, scalar_prefetch = 0 : i64, scratch_operands = 0 : i64, tpu.core_type = #tpu.core_type<tc>, window_params = [{transform_indices = @transform_0, window_bounds = array<i64: 128, 512>}, {pipeline_mode = #tpu.pipeline_mode<synchronous>, transform_indices = @transform_1, window_bounds = array<i64: 512, 64>}, {pipeline_mode = #tpu.pipeline_mode<synchronous>, transform_indices = @transform_2, window_bounds = array<i64: 1, 64>}, {transform_indices = @transform_3, window_bounds = array<i64: 128, 64>}]} {
    %c0 = arith.constant 0 : index
    %c0_0 = arith.constant 0 : index
    %0 = vector.load %arg1[%c0, %c0_0] : memref<128x512xf32, #tpu.memory_space<vmem>>, vector<128x512xf32>
    %c0_1 = arith.constant 0 : index
    %c0_2 = arith.constant 0 : index
    %1 = vector.load %arg2[%c0_1, %c0_2] : memref<512x64xf32, #tpu.memory_space<vmem>>, vector<512x64xf32>
    %cst = arith.constant dense<0.000000e+00> : vector<128x64xf32>
    %2 = tpu.matmul %0, %1, %cst {dimension_numbers = #tpu.dot_dimension_numbers<[1], [0], [0], [1], [0, 0, 1, 1], [], []>} : vector<128x512xf32>, vector<512x64xf32>, vector<128x64xf32> -> vector<128x64xf32>
    %c0_3 = arith.constant 0 : index
    %c0_4 = arith.constant 0 : index
    %3 = vector.load %arg3[%c0_3, %c0_4] : memref<1x64xf32, #tpu.memory_space<vmem>>, vector<1x64xf32>
    %4 = vector.broadcast %3 : vector<1x64xf32> to vector<128x64xf32>
    %5 = arith.addf %2, %4 : vector<128x64xf32>
    %cst_5 = arith.constant 0.000000e+00 : f32
    %6 = vector.broadcast %cst_5 : f32 to vector<128x64xf32>
    %7 = arith.maximumf %5, %6 : vector<128x64xf32>
    %c0_6 = arith.constant 0 : index
    %c0_7 = arith.constant 0 : index
    %8 = vector.load %arg4[%c0_6, %c0_7] : memref<128x64xf32, #tpu.memory_space<vmem>>, vector<128x64xf32>
    tpu.vector_store %arg4[%c0_6, %c0_7], %7 {strides = array<i32>} : memref<128x64xf32, #tpu.memory_space<vmem>>, vector<128x64xf32>,
    return
  }
  func.func @transform_0(%arg0: i32) -> (i32, i32) {
    %c0_i32 = arith.constant 0 : i32
    %c0_i32_0 = arith.constant 0 : i32
    return %arg0, %c0_i32 : i32, i32
  }
  func.func @transform_1(%arg0: i32) -> (i32, i32) {
    %c0_i32 = arith.constant 0 : i32
    %c0_i32_0 = arith.constant 0 : i32
    %c0_i32_1 = arith.constant 0 : i32
    return %c0_i32, %c0_i32_0 : i32, i32
  }
  func.func @transform_2(%arg0: i32) -> (i32, i32) {
    %c0_i32 = arith.constant 0 : i32
    %c0_i32_0 = arith.constant 0 : i32
    %c0_i32_1 = arith.constant 0 : i32
    return %c0_i32, %c0_i32_0 : i32, i32
  }
  func.func @transform_3(%arg0: i32) -> (i32, i32) {
    %c0_i32 = arith.constant 0 : i32
    %c0_i32_0 = arith.constant 0 : i32
    return %arg0, %c0_i32 : i32, i32
  }
}

module attributes {stable_mosaic.version = 11 : i64} {
  func.func @_conv_mm_bias_relu_kernel(%arg0: i32, %arg1: memref<32x1024xf32, #tpu.memory_space<vmem>>, %arg2: memref<1024x64xf32, #tpu.memory_space<vmem>>, %arg3: memref<1x64xf32, #tpu.memory_space<vmem>>, %arg4: memref<32x64xf32, #tpu.memory_space<vmem>>) attributes {dimension_semantics = [#tpu.dimension_semantics<parallel>], iteration_bounds = array<i64: 1>, scalar_prefetch = 0 : i64, scratch_operands = 0 : i64, tpu.core_type = #tpu.core_type<tc>, window_params = [{transform_indices = @transform_0, window_bounds = array<i64: 32, 1024>}, {pipeline_mode = #tpu.pipeline_mode<synchronous>, transform_indices = @transform_1, window_bounds = array<i64: 1024, 64>}, {pipeline_mode = #tpu.pipeline_mode<synchronous>, transform_indices = @transform_2, window_bounds = array<i64: 1, 64>}, {transform_indices = @transform_3, window_bounds = array<i64: 32, 64>}]} {
    %c0 = arith.constant 0 : index
    %c0_0 = arith.constant 0 : index
    %0 = vector.load %arg1[%c0, %c0_0] : memref<32x1024xf32, #tpu.memory_space<vmem>>, vector<32x1024xf32>
    %c0_1 = arith.constant 0 : index
    %c0_2 = arith.constant 0 : index
    %1 = vector.load %arg2[%c0_1, %c0_2] : memref<1024x64xf32, #tpu.memory_space<vmem>>, vector<1024x64xf32>
    %cst = arith.constant dense<0.000000e+00> : vector<32x64xf32>
    %2 = tpu.matmul %0, %1, %cst {dimension_numbers = #tpu.dot_dimension_numbers<[1], [0], [0], [1], [0, 0, 1, 1], [], []>} : vector<32x1024xf32>, vector<1024x64xf32>, vector<32x64xf32> -> vector<32x64xf32>
    %c0_3 = arith.constant 0 : index
    %c0_4 = arith.constant 0 : index
    %3 = vector.load %arg3[%c0_3, %c0_4] : memref<1x64xf32, #tpu.memory_space<vmem>>, vector<1x64xf32>
    %4 = vector.broadcast %3 : vector<1x64xf32> to vector<32x64xf32>
    %5 = arith.addf %2, %4 : vector<32x64xf32>
    %cst_5 = arith.constant 0.000000e+00 : f32
    %6 = vector.broadcast %cst_5 : f32 to vector<32x64xf32>
    %7 = arith.maximumf %5, %6 : vector<32x64xf32>
    %c0_6 = arith.constant 0 : index
    %c0_7 = arith.constant 0 : index
    %8 = vector.load %arg4[%c0_6, %c0_7] : memref<32x64xf32, #tpu.memory_space<vmem>>, vector<32x64xf32>
    tpu.vector_store %arg4[%c0_6, %c0_7], %7 {strides = array<i32>} : memref<32x64xf32, #tpu.memory_space<vmem>>, vector<32x64xf32>,
    return
  }
  func.func @transform_0(%arg0: i32) -> (i32, i32) {
    %c0_i32 = arith.constant 0 : i32
    %c0_i32_0 = arith.constant 0 : i32
    return %arg0, %c0_i32 : i32, i32
  }
  func.func @transform_1(%arg0: i32) -> (i32, i32) {
    %c0_i32 = arith.constant 0 : i32
    %c0_i32_0 = arith.constant 0 : i32
    %c0_i32_1 = arith.constant 0 : i32
    return %c0_i32, %c0_i32_0 : i32, i32
  }
  func.func @transform_2(%arg0: i32) -> (i32, i32) {
    %c0_i32 = arith.constant 0 : i32
    %c0_i32_0 = arith.constant 0 : i32
    %c0_i32_1 = arith.constant 0 : i32
    return %c0_i32, %c0_i32_0 : i32, i32
  }
  func.func @transform_3(%arg0: i32) -> (i32, i32) {
    %c0_i32 = arith.constant 0 : i32
    %c0_i32_0 = arith.constant 0 : i32
    return %arg0, %c0_i32 : i32, i32
  }
}

</mosaic_0001>

<bundles_post_ra>
// kernel: cnn_encoder_forward.4
= control target key start
LH: loop header
LB: loop body
LE: loop exit
PB: predicated region body
PF: predicated region fallthrough
CT: control target
= control target key end

     0   :  { %s1316_s12 = smov 0   ;;  %s1687_s0 = inlined_call_operand.vmem [shape: f32[2048,48], index: 0, kind: input, shape index: {}]   ;;  %s1688_s1 = inlined_call_operand.vmem [shape: f32[48,32], index: 1, kind: input, shape index: {}]   ;;  %s1689_s2 = inlined_call_operand.vmem [shape: f32[1,32], index: 2, kind: input, shape index: {}]   ;;  %s1690_s3 = inlined_call_operand.vmem [shape: f32[2048,32], index: 3, kind: output, shape index: {}]  }
   0x1 LB: > { %s1014_s13 = sadd.s32 4294967295, %s1294_s12   ;;  %p1018_p0 = scmp.ge.s32.totalorder %s1294_s12, 1  ;;  %s1294_s12 = sphi %s1316_s12, %s13_s12  }
   0x2   : > { %p138_p1 = scmp.lt.s32.totalorder %s1294_s12, 5 }
   0x4   : > { %p139_p2 = pnand %p1018_p0, %p138_p1 }
   0x5   : > { %s1019_s18 = sshll.u32 (!%p139_p2), %s1014_s13, 6 }
   0x6   : > { %142 = sbr.rel (%p139_p2) target bundleno = 285 (0x11d), region = 32  ;;  %p163_p3 = scmp.lt.s32.totalorder (!%p139_p2), %s1019_s18, 255 }
   0xb   : > { %v243_v0 = vld [vmem:[%s1688_s1 + $0x28] sm:$0xff]  ;;  %v242_v1 = vld [vmem:[%s1688_s1 + $0x20] sm:$0xff]  ;;  %v241_v2 = vld [vmem:[%s1688_s1 + $0x18] sm:$0xff]  ;;  %s1692_s18 = smov (!%p163_p3, %s1019_s18), 255  ;;  %vm251_vm0 = vcmask 392192   ;;  %vm893_vm1 = vcmask 261120  }
   0xc   : > { %1160 = vmatprep.subr.mxu0 %v243_v0  ;;  %1268 = vmatprep.subr.mxu1 %v243_v0  ;;  %v240_v3 = vld [vmem:[%s1688_s1 + $0x10] sm:$0xff]  ;;  %s1020_s23 = sshll.u32 %s1692_s18, 3  ;;  %v239_v4 = vld [vmem:[%s1688_s1 + $0x8] sm:$0xff]  ;;  %v238_v5 = vld [vmem:[%s1688_s1] sm:$0xff] }
   0xd   : > { %1161 = vmatpush3.msra.mxu0 %v243_v0  ;;  %1274 = vmatpush3.msra.mxu1 %v243_v0  ;;  %s1347_s28 = scalar_lea.vmem %s1687_s0, %s1020_s23  ;;  %s1492_s8 = scalar_lea.vmem %s1690_s3, %s1020_s23 }
   0xe   : > { %1162 = vmatprep.subr.mxu0 %v242_v1  ;;  %1269 = vmatprep.subr.mxu1 %v242_v1  ;;  %v174_v6 = vld [vmem:[%s1347_s28] sm:$0xff]  ;;  %v175_v8 = vld [vmem:[%s1347_s28 + $0x8] sm:$0xff]  ;;  %v176_v10 = vld [vmem:[%s1347_s28 + $0x10] sm:$0xff] }
   0xf   : > { %1163 = vmatpush3.msra.mxu0 %v242_v1  ;;  %1275 = vmatpush3.msra.mxu1 %v242_v1  ;;  %v206_v7 = vld [vmem:[%s1347_s28 + $0x100] sm:$0xff]  ;;  %v207_v9 = vld [vmem:[%s1347_s28 + $0x108] sm:$0xff]  ;;  %v208_v11 = vld [vmem:[%s1347_s28 + $0x110] sm:$0xff] }
  0x10   : > { %1164 = vmatprep.subr.mxu0 %v241_v2  ;;  %1270 = vmatprep.subr.mxu1 %v241_v2  ;;  %v177_v12 = vld [vmem:[%s1347_s28 + $0x18] sm:$0xff]  ;;  %v178_v14 = vld [vmem:[%s1347_s28 + $0x20] sm:$0xff]  ;;  %v179_v16 = vld [vmem:[%s1347_s28 + $0x28] sm:$0xff] }
  0x11   : > { %1165 = vmatpush3.msra.mxu0 %v241_v2  ;;  %1276 = vmatpush3.msra.mxu1 %v241_v2  ;;  %v209_v13 = vld [vmem:[%s1347_s28 + $0x118] sm:$0xff]  ;;  %v210_v15 = vld [vmem:[%s1347_s28 + $0x120] sm:$0xff]  ;;  %v211_v17 = vld [vmem:[%s1347_s28 + $0x128] sm:$0xff] }
  0x12   : > { %1166 = vmatprep.subr.mxu0 %v240_v3  ;;  %1271 = vmatprep.subr.mxu1 %v240_v3  ;;  %v180_v18 = vld [vmem:[%s1347_s28 + $0x30] sm:$0xff]  ;;  %v181_v20 = vld [vmem:[%s1347_s28 + $0x38] sm:$0xff]  ;;  %v182_v22 = vld [vmem:[%s1347_s28 + $0x40] sm:$0xff] }
  0x13   : > { %1167 = vmatpush3.msra.mxu0 %v240_v3  ;;  %1277 = vmatpush3.msra.mxu1 %v240_v3  ;;  %v212_v19 = vld [vmem:[%s1347_s28 + $0x130] sm:$0xff]  ;;  %v213_v21 = vld [vmem:[%s1347_s28 + $0x138] sm:$0xff]  ;;  %v214_v23 = vld [vmem:[%s1347_s28 + $0x140] sm:$0xff] }
  0x14   : > { %1168 = vmatprep.subr.mxu0 %v239_v4  ;;  %1272 = vmatprep.subr.mxu1 %v239_v4  ;;  %v183_v24 = vld [vmem:[%s1347_s28 + $0x48] sm:$0xff]  ;;  %v184_v26 = vld [vmem:[%s1347_s28 + $0x50] sm:$0xff]  ;;  %v185_v28 = vld [vmem:[%s1347_s28 + $0x58] sm:$0xff] }
  0x15   : > { %1169 = vmatpush3.msra.mxu0 %v239_v4  ;;  %1278 = vmatpush3.msra.mxu1 %v239_v4  ;;  %v215_v25 = vld [vmem:[%s1347_s28 + $0x148] sm:$0xff]  ;;  %v216_v27 = vld [vmem:[%s1347_s28 + $0x150] sm:$0xff]  ;;  %v217_v29 = vld [vmem:[%s1347_s28 + $0x158] sm:$0xff] }
  0x16   : > { %1170 = vmatprep.subr.mxu0 %v238_v5  ;;  %1273 = vmatprep.subr.mxu1 %v238_v5  ;;  %v186_v30 = vld [vmem:[%s1347_s28 + $0x60] sm:$0xff]  ;;  %v187_v32 = vld [vmem:[%s1347_s28 + $0x68] sm:$0xff]  ;;  %v188_v34 = vld [vmem:[%s1347_s28 + $0x70] sm:$0xff] }
  0x17   : > { %1171 = vmatpush3.msra.mxu0 %v238_v5  ;;  %1279 = vmatpush3.msra.mxu1 %v238_v5  ;;  %v218_v31 = vld [vmem:[%s1347_s28 + $0x160] sm:$0xff]  ;;  %v219_v33 = vld [vmem:[%s1347_s28 + $0x168] sm:$0xff]  ;;  %v220_v35 = vld [vmem:[%s1347_s28 + $0x170] sm:$0xff] }
  0x18   : > { %1172 = vmatprep.mubr.msk.f32.mxu0 %vm251_vm0, %v174_v6  ;;  %1220 = vmatprep.mubr.msk.f32.mxu1 %vm251_vm0, %v206_v7  ;;  %v189_v36 = vld [vmem:[%s1347_s28 + $0x78] sm:$0xff]  ;;  %v190_v38 = vld [vmem:[%s1347_s28 + $0x80] sm:$0xff]  ;;  %v191_v40 = vld [vmem:[%s1347_s28 + $0x88] sm:$0xff] }
  0x19   : > { %1173 = vmatmul.mubr.msk.f32.vlgmr.msra.gmra.mxu0 %vm251_vm0, %v175_v8  ;;  %1221 = vmatmul.mubr.msk.f32.vlgmr.msra.gmra.mxu1 %vm251_vm0, %v207_v9  ;;  %v221_v37 = vld [vmem:[%s1347_s28 + $0x178] sm:$0xff]  ;;  %v222_v39 = vld [vmem:[%s1347_s28 + $0x180] sm:$0xff]  ;;  %v223_v41 = vld [vmem:[%s1347_s28 + $0x188] sm:$0xff] }
  0x1a   : > { %1175 = vmatprep.mubr.msk.f32.mxu0 %vm251_vm0, %v176_v10  ;;  %1223 = vmatprep.mubr.msk.f32.mxu1 %vm251_vm0, %v208_v11  ;;  %v192_v42 = vld [vmem:[%s1347_s28 + $0x90] sm:$0xff]  ;;  %v193_v44 = vld [vmem:[%s1347_s28 + $0x98] sm:$0xff]  ;;  %v194_v46 = vld [vmem:[%s1347_s28 + $0xa0] sm:$0xff] }
  0x1b   : > { %v224_v43 = vld [vmem:[%s1347_s28 + $0x190] sm:$0xff]  ;;  %v225_v45 = vld [vmem:[%s1347_s28 + $0x198] sm:$0xff]  ;;  %v226_v47 = vld [vmem:[%s1347_s28 + $0x1a0] sm:$0xff] }
  0x1c   : > { %v195_v48 = vld [vmem:[%s1347_s28 + $0xa8] sm:$0xff]  ;;  %v196_v50 = vld [vmem:[%s1347_s28 + $0xb0] sm:$0xff]  ;;  %v197_v52 = vld [vmem:[%s1347_s28 + $0xb8] sm:$0xff] }
  0x1d   : > { %1176 = vmatmul.mubr.msk.f32.gmra.mxu0 %vm251_vm0, %v177_v12  ;;  %1224 = vmatmul.mubr.msk.f32.gmra.mxu1 %vm251_vm0, %v209_v13  ;;  %v227_v49 = vld [vmem:[%s1347_s28 + $0x1a8] sm:$0xff]  ;;  %v228_v51 = vld [vmem:[%s1347_s28 + $0x1b0] sm:$0xff]  ;;  %v229_v53 = vld [vmem:[%s1347_s28 + $0x1b8] sm:$0xff] }
  0x1e   : > { %1178 = vmatprep.mubr.msk.f32.mxu0 %vm251_vm0, %v178_v14  ;;  %1226 = vmatprep.mubr.msk.f32.mxu1 %vm251_vm0, %v210_v15  ;;  %v198_v54 = vld [vmem:[%s1347_s28 + $0xc0] sm:$0xff]  ;;  %v199_v56 = vld [vmem:[%s1347_s28 + $0xc8] sm:$0xff]  ;;  %v200_v58 = vld [vmem:[%s1347_s28 + $0xd0] sm:$0xff] }
  0x1f   : > { %v230_v55 = vld [vmem:[%s1347_s28 + $0x1c0] sm:$0xff]  ;;  %v231_v57 = vld [vmem:[%s1347_s28 + $0x1c8] sm:$0xff]  ;;  %v232_v59 = vld [vmem:[%s1347_s28 + $0x1d0] sm:$0xff] }
  0x20   : > { %v201_v60 = vld [vmem:[%s1347_s28 + $0xd8] sm:$0xff]  ;;  %v202_v62 = vld [vmem:[%s1347_s28 + $0xe0] sm:$0xff]  ;;  %v203_v0 = vld [vmem:[%s1347_s28 + $0xe8] sm:$0xff] }
  0x21   : > { %1179 = vmatmul.mubr.msk.f32.gmra.mxu0 %vm251_vm0, %v179_v16  ;;  %1227 = vmatmul.mubr.msk.f32.gmra.mxu1 %vm251_vm0, %v211_v17  ;;  %v233_v61 = vld [vmem:[%s1347_s28 + $0x1d8] sm:$0xff]  ;;  %v234_v63 = vld [vmem:[%s1347_s28 + $0x1e0] sm:$0xff]  ;;  %v235_v1 = vld [vmem:[%s1347_s28 + $0x1e8] sm:$0xff] }
  0x22   : > { %1181 = vmatprep.mubr.msk.f32.mxu0 %vm251_vm0, %v180_v18  ;;  %1229 = vmatprep.mubr.msk.f32.mxu1 %vm251_vm0, %v212_v19  ;;  %v204_v2 = vld [vmem:[%s1347_s28 + $0xf0] sm:$0xff]  ;;  %v205_v4 = vld [vmem:[%s1347_s28 + $0xf8] sm:$0xff]  ;;  %v1483_v6 = vld [vmem:[%s1689_s2] ss:$0 sm:$0xff] }
  0x23   : > { %v236_v3 = vld [vmem:[%s1347_s28 + $0x1f0] sm:$0xff]  ;;  %v237_v5 = vld [vmem:[%s1347_s28 + $0x1f8] sm:$0xff] }
  0x25   : > { %1182 = vmatmul.mubr.msk.f32.gmra.mxu0 %vm251_vm0, %v181_v20  ;;  %1230 = vmatmul.mubr.msk.f32.gmra.mxu1 %vm251_vm0, %v213_v21 }
  0x26   : > { %1184 = vmatprep.mubr.msk.f32.mxu0 %vm251_vm0, %v182_v22  ;;  %1232 = vmatprep.mubr.msk.f32.mxu1 %vm251_vm0, %v214_v23 }
  0x29   : > { %1185 = vmatmul.mubr.msk.f32.gmra.mxu0 %vm251_vm0, %v183_v24  ;;  %1233 = vmatmul.mubr.msk.f32.gmra.mxu1 %vm251_vm0, %v215_v25 }
  0x2a   : > { %1187 = vmatprep.mubr.msk.f32.mxu0 %vm251_vm0, %v184_v26  ;;  %1235 = vmatprep.mubr.msk.f32.mxu1 %vm251_vm0, %v216_v27 }
  0x2d   : > { %1188 = vmatmul.mubr.msk.f32.gmra.mxu0 %vm251_vm0, %v185_v28  ;;  %1236 = vmatmul.mubr.msk.f32.gmra.mxu1 %vm251_vm0, %v217_v29 }
  0x2e   : > { %1190 = vmatprep.mubr.msk.f32.mxu0 %vm251_vm0, %v186_v30  ;;  %1238 = vmatprep.mubr.msk.f32.mxu1 %vm251_vm0, %v218_v31 }
  0x31   : > { %1191 = vmatmul.mubr.msk.f32.gmra.mxu0 %vm251_vm0, %v187_v32  ;;  %1239 = vmatmul.mubr.msk.f32.gmra.mxu1 %vm251_vm0, %v219_v33 }
  0x32   : > { %1193 = vmatprep.mubr.msk.f32.mxu0 %vm251_vm0, %v188_v34  ;;  %1241 = vmatprep.mubr.msk.f32.mxu1 %vm251_vm0, %v220_v35 }
  0x35   : > { %1194 = vmatmul.mubr.msk.f32.gmra.mxu0 %vm251_vm0, %v189_v36  ;;  %1242 = vmatmul.mubr.msk.f32.gmra.mxu1 %vm251_vm0, %v221_v37 }
  0x36   : > { %1196 = vmatprep.mubr.msk.f32.mxu0 %vm251_vm0, %v190_v38  ;;  %1244 = vmatprep.mubr.msk.f32.mxu1 %vm251_vm0, %v222_v39 }
  0x39   : > { %1197 = vmatmul.mubr.msk.f32.gmra.mxu0 %vm251_vm0, %v191_v40  ;;  %1245 = vmatmul.mubr.msk.f32.gmra.mxu1 %vm251_vm0, %v223_v41 }
  0x3a   : > { %1199 = vmatprep.mubr.msk.f32.mxu0 %vm251_vm0, %v192_v42  ;;  %1247 = vmatprep.mubr.msk.f32.mxu1 %vm251_vm0, %v224_v43 }
  0x3d   : > { %1200 = vmatmul.mubr.msk.f32.gmra.mxu0 %vm251_vm0, %v193_v44  ;;  %1248 = vmatmul.mubr.msk.f32.gmra.mxu1 %vm251_vm0, %v225_v45 }
  0x3e   : > { %1202 = vmatprep.mubr.msk.f32.mxu0 %vm251_vm0, %v194_v46  ;;  %1250 = vmatprep.mubr.msk.f32.mxu1 %vm251_vm0, %v226_v47 }
  0x41   : > { %1203 = vmatmul.mubr.msk.f32.gmra.mxu0 %vm251_vm0, %v195_v48  ;;  %1251 = vmatmul.mubr.msk.f32.gmra.mxu1 %vm251_vm0, %v227_v49 }
  0x42   : > { %1205 = vmatprep.mubr.msk.f32.mxu0 %vm251_vm0, %v196_v50  ;;  %1253 = vmatprep.mubr.msk.f32.mxu1 %vm251_vm0, %v228_v51 }
  0x45   : > { %1206 = vmatmul.mubr.msk.f32.gmra.mxu0 %vm251_vm0, %v197_v52  ;;  %1254 = vmatmul.mubr.msk.f32.gmra.mxu1 %vm251_vm0, %v229_v53 }
  0x46   : > { %1208 = vmatprep.mubr.msk.f32.mxu0 %vm251_vm0, %v198_v54  ;;  %1256 = vmatprep.mubr.msk.f32.mxu1 %vm251_vm0, %v230_v55 }
  0x49   : > { %1209 = vmatmul.mubr.msk.f32.gmra.mxu0 %vm251_vm0, %v199_v56  ;;  %1257 = vmatmul.mubr.msk.f32.gmra.mxu1 %vm251_vm0, %v231_v57 }
  0x4a   : > { %1211 = vmatprep.mubr.msk.f32.mxu0 %vm251_vm0, %v200_v58  ;;  %1259 = vmatprep.mubr.msk.f32.mxu1 %vm251_vm0, %v232_v59 }
  0x4d   : > { %1212 = vmatmul.mubr.msk.f32.gmra.mxu0 %vm251_vm0, %v201_v60  ;;  %1260 = vmatmul.mubr.msk.f32.gmra.mxu1 %vm251_vm0, %v233_v61 }
  0x4e   : > { %1214 = vmatprep.mubr.msk.f32.mxu0 %vm251_vm0, %v202_v62  ;;  %1262 = vmatprep.mubr.msk.f32.mxu1 %vm251_vm0, %v234_v63 }
  0x51   : > { %1215 = vmatmul.mubr.msk.f32.gmra.mxu0 %vm251_vm0, %v203_v0  ;;  %1263 = vmatmul.mubr.msk.f32.gmra.mxu1 %vm251_vm0, %v235_v1 }
  0x52   : > { %1217 = vmatprep.mubr.msk.f32.mxu0 %vm251_vm0, %v204_v2  ;;  %1265 = vmatprep.mubr.msk.f32.mxu1 %vm251_vm0, %v236_v3 }
  0x55   : > { %1218 = vmatmul.mubr.msk.f32.gmra.mxu0 %vm251_vm0, %v205_v4  ;;  %1266 = vmatmul.mubr.msk.f32.gmra.mxu1 %vm251_vm0, %v237_v5 }
  0xd9   : > { %v1174_v7 = vpop.f32.mrf.mxu0  ;;  %v1222_v8 = vpop.f32.mrf.mxu1 }
  0xda   : > { %v516_v9 = vadd.f32 %v1174_v7, %v1483_v6  ;;  %v676_v10 = vadd.f32 %v1222_v8, %v1483_v6 }
  0xdb   : > { %v510_v11 = vpop.f32.mrf.mxu0  ;;  %v670_v12 = vpop.f32.mrf.mxu1 }
  0xdc   : > { %v830_v13 = vmax.f32 %v516_v9, 0.0  ;;  %v862_v14 = vmax.f32 %v676_v10, 0.0  ;;  %v511_v15 = vadd.f32 %v1483_v6, %v510_v11  ;;  %v671_v16 = vadd.f32 %v1483_v6, %v670_v12 }
  0xdd   : > { %v1177_v17 = vpop.f32.mrf.mxu0  ;;  %v1225_v18 = vpop.f32.mrf.mxu1 }
  0xde   : > { %895 = vst.msk [vmem:[%s1492_s8 + $0x8] sm:$0xff] %vm893_vm1, %v830_v13  ;;  %927 = vst.msk [vmem:[%s1492_s8 + $0x108] sm:$0xff] %vm893_vm1, %v862_v14  ;;  %v829_v19 = vmax.f32 %v511_v15, 0.0  ;;  %v861_v20 = vmax.f32 %v671_v16, 0.0  ;;  %v526_v21 = vadd.f32 %v1177_v17, %v1483_v6  ;;  %v686_v22 = vadd.f32 %v1225_v18, %v1483_v6 }
  0xdf   : > { %v520_v23 = vpop.f32.mrf.mxu0  ;;  %v680_v24 = vpop.f32.mrf.mxu1 }
  0xe0   : > { %894 = vst.msk [vmem:[%s1492_s8] sm:$0xff] %vm893_vm1, %v829_v19  ;;  %926 = vst.msk [vmem:[%s1492_s8 + $0x100] sm:$0xff] %vm893_vm1, %v861_v20  ;;  %v832_v25 = vmax.f32 %v526_v21, 0.0  ;;  %v864_v26 = vmax.f32 %v686_v22, 0.0  ;;  %v521_v27 = vadd.f32 %v1483_v6, %v520_v23  ;;  %v681_v28 = vadd.f32 %v1483_v6, %v680_v24 }
  0xe1   : > { %v1180_v29 = vpop.f32.mrf.mxu0  ;;  %v1228_v30 = vpop.f32.mrf.mxu1 }
  0xe2   : > { %897 = vst.msk [vmem:[%s1492_s8 + $0x18] sm:$0xff] %vm893_vm1, %v832_v25  ;;  %929 = vst.msk [vmem:[%s1492_s8 + $0x118] sm:$0xff] %vm893_vm1, %v864_v26  ;;  %v831_v31 = vmax.f32 %v521_v27, 0.0  ;;  %v863_v32 = vmax.f32 %v681_v28, 0.0  ;;  %v536_v33 = vadd.f32 %v1180_v29, %v1483_v6  ;;  %v696_v34 = vadd.f32 %v1228_v30, %v1483_v6 }
  0xe3   : > { %v530_v35 = vpop.f32.mrf.mxu0  ;;  %v690_v36 = vpop.f32.mrf.mxu1 }
  0xe4   : > { %896 = vst.msk [vmem:[%s1492_s8 + $0x10] sm:$0xff] %vm893_vm1, %v831_v31  ;;  %928 = vst.msk [vmem:[%s1492_s8 + $0x110] sm:$0xff] %vm893_vm1, %v863_v32  ;;  %v834_v37 = vmax.f32 %v536_v33, 0.0  ;;  %v866_v38 = vmax.f32 %v696_v34, 0.0  ;;  %v531_v39 = vadd.f32 %v1483_v6, %v530_v35  ;;  %v691_v40 = vadd.f32 %v1483_v6, %v690_v36 }
  0xe5   : > { %v1183_v41 = vpop.f32.mrf.mxu0  ;;  %v1231_v42 = vpop.f32.mrf.mxu1 }
  0xe6   : > { %899 = vst.msk [vmem:[%s1492_s8 + $0x28] sm:$0xff] %vm893_vm1, %v834_v37  ;;  %931 = vst.msk [vmem:[%s1492_s8 + $0x128] sm:$0xff] %vm893_vm1, %v866_v38  ;;  %v833_v43 = vmax.f32 %v531_v39, 0.0  ;;  %v865_v44 = vmax.f32 %v691_v40, 0.0  ;;  %v546_v45 = vadd.f32 %v1183_v41, %v1483_v6  ;;  %v706_v46 = vadd.f32 %v1231_v42, %v1483_v6 }
  0xe7   : > { %v540_v47 = vpop.f32.mrf.mxu0  ;;  %v700_v48 = vpop.f32.mrf.mxu1 }
  0xe8   : > { %898 = vst.msk [vmem:[%s1492_s8 + $0x20] sm:$0xff] %vm893_vm1, %v833_v43  ;;  %930 = vst.msk [vmem:[%s1492_s8 + $0x120] sm:$0xff] %vm893_vm1, %v865_v44  ;;  %v836_v49 = vmax.f32 %v546_v45, 0.0  ;;  %v868_v50 = vmax.f32 %v706_v46, 0.0  ;;  %v541_v51 = vadd.f32 %v1483_v6, %v540_v47  ;;  %v701_v52 = vadd.f32 %v1483_v6, %v700_v48 }
  0xe9   : > { %v1186_v53 = vpop.f32.mrf.mxu0  ;;  %v1234_v54 = vpop.f32.mrf.mxu1 }
  0xea   : > { %901 = vst.msk [vmem:[%s1492_s8 + $0x38] sm:$0xff] %vm893_vm1, %v836_v49  ;;  %933 = vst.msk [vmem:[%s1492_s8 + $0x138] sm:$0xff] %vm893_vm1, %v868_v50  ;;  %v835_v55 = vmax.f32 %v541_v51, 0.0  ;;  %v867_v56 = vmax.f32 %v701_v52, 0.0  ;;  %v556_v57 = vadd.f32 %v1186_v53, %v1483_v6  ;;  %v716_v58 = vadd.f32 %v1234_v54, %v1483_v6 }
  0xeb   : > { %v550_v59 = vpop.f32.mrf.mxu0  ;;  %v710_v60 = vpop.f32.mrf.mxu1 }
  0xec   : > { %900 = vst.msk [vmem:[%s1492_s8 + $0x30] sm:$0xff] %vm893_vm1, %v835_v55  ;;  %932 = vst.msk [vmem:[%s1492_s8 + $0x130] sm:$0xff] %vm893_vm1, %v867_v56  ;;  %v838_v61 = vmax.f32 %v556_v57, 0.0  ;;  %v870_v62 = vmax.f32 %v716_v58, 0.0  ;;  %v551_v63 = vadd.f32 %v1483_v6, %v550_v59  ;;  %v711_v0 = vadd.f32 %v1483_v6, %v710_v60 }
  0xed   : > { %v1189_v1 = vpop.f32.mrf.mxu0  ;;  %v1237_v2 = vpop.f32.mrf.mxu1 }
  0xee   : > { %903 = vst.msk [vmem:[%s1492_s8 + $0x48] sm:$0xff] %vm893_vm1, %v838_v61  ;;  %935 = vst.msk [vmem:[%s1492_s8 + $0x148] sm:$0xff] %vm893_vm1, %v870_v62  ;;  %v837_v3 = vmax.f32 %v551_v63, 0.0  ;;  %v869_v4 = vmax.f32 %v711_v0, 0.0  ;;  %v566_v5 = vadd.f32 %v1189_v1, %v1483_v6  ;;  %v726_v7 = vadd.f32 %v1237_v2, %v1483_v6 }
  0xef   : > { %v560_v8 = vpop.f32.mrf.mxu0  ;;  %v720_v9 = vpop.f32.mrf.mxu1 }
  0xf0   : > { %902 = vst.msk [vmem:[%s1492_s8 + $0x40] sm:$0xff] %vm893_vm1, %v837_v3  ;;  %934 = vst.msk [vmem:[%s1492_s8 + $0x140] sm:$0xff] %vm893_vm1, %v869_v4  ;;  %v840_v10 = vmax.f32 %v566_v5, 0.0  ;;  %v872_v11 = vmax.f32 %v726_v7, 0.0  ;;  %v561_v12 = vadd.f32 %v1483_v6, %v560_v8  ;;  %v721_v13 = vadd.f32 %v1483_v6, %v720_v9 }
  0xf1   : > { %v1192_v14 = vpop.f32.mrf.mxu0  ;;  %v1240_v15 = vpop.f32.mrf.mxu1 }
  0xf2   : > { %905 = vst.msk [vmem:[%s1492_s8 + $0x58] sm:$0xff] %vm893_vm1, %v840_v10  ;;  %937 = vst.msk [vmem:[%s1492_s8 + $0x158] sm:$0xff] %vm893_vm1, %v872_v11  ;;  %v839_v16 = vmax.f32 %v561_v12, 0.0  ;;  %v871_v17 = vmax.f32 %v721_v13, 0.0  ;;  %v576_v18 = vadd.f32 %v1192_v14, %v1483_v6  ;;  %v736_v19 = vadd.f32 %v1240_v15, %v1483_v6 }
  0xf3   : > { %v570_v20 = vpop.f32.mrf.mxu0  ;;  %v730_v21 = vpop.f32.mrf.mxu1 }
  0xf4   : > { %904 = vst.msk [vmem:[%s1492_s8 + $0x50] sm:$0xff] %vm893_vm1, %v839_v16  ;;  %936 = vst.msk [vmem:[%s1492_s8 + $0x150] sm:$0xff] %vm893_vm1, %v871_v17  ;;  %v842_v22 = vmax.f32 %v576_v18, 0.0  ;;  %v874_v23 = vmax.f32 %v736_v19, 0.0  ;;  %v571_v24 = vadd.f32 %v1483_v6, %v570_v20  ;;  %v731_v25 = vadd.f32 %v1483_v6, %v730_v21 }
  0xf5   : > { %v1195_v26 = vpop.f32.mrf.mxu0  ;;  %v1243_v27 = vpop.f32.mrf.mxu1 }
  0xf6   : > { %907 = vst.msk [vmem:[%s1492_s8 + $0x68] sm:$0xff] %vm893_vm1, %v842_v22  ;;  %939 = vst.msk [vmem:[%s1492_s8 + $0x168] sm:$0xff] %vm893_vm1, %v874_v23  ;;  %v841_v28 = vmax.f32 %v571_v24, 0.0  ;;  %v873_v29 = vmax.f32 %v731_v25, 0.0  ;;  %v586_v30 = vadd.f32 %v1195_v26, %v1483_v6  ;;  %v746_v31 = vadd.f32 %v1243_v27, %v1483_v6 }
  0xf7   : > { %v580_v32 = vpop.f32.mrf.mxu0  ;;  %v740_v33 = vpop.f32.mrf.mxu1 }
  0xf8   : > { %906 = vst.msk [vmem:[%s1492_s8 + $0x60] sm:$0xff] %vm893_vm1, %v841_v28  ;;  %938 = vst.msk [vmem:[%s1492_s8 + $0x160] sm:$0xff] %vm893_vm1, %v873_v29  ;;  %v844_v34 = vmax.f32 %v586_v30, 0.0  ;;  %v876_v35 = vmax.f32 %v746_v31, 0.0  ;;  %v581_v36 = vadd.f32 %v1483_v6, %v580_v32  ;;  %v741_v37 = vadd.f32 %v1483_v6, %v740_v33 }
  0xf9   : > { %v1198_v38 = vpop.f32.mrf.mxu0  ;;  %v1246_v39 = vpop.f32.mrf.mxu1 }
  0xfa   : > { %909 = vst.msk [vmem:[%s1492_s8 + $0x78] sm:$0xff] %vm893_vm1, %v844_v34  ;;  %941 = vst.msk [vmem:[%s1492_s8 + $0x178] sm:$0xff] %vm893_vm1, %v876_v35  ;;  %v843_v40 = vmax.f32 %v581_v36, 0.0  ;;  %v875_v41 = vmax.f32 %v741_v37, 0.0  ;;  %v596_v42 = vadd.f32 %v1198_v38, %v1483_v6  ;;  %v756_v43 = vadd.f32 %v1246_v39, %v1483_v6 }
  0xfb   : > { %v590_v44 = vpop.f32.mrf.mxu0  ;;  %v750_v45 = vpop.f32.mrf.mxu1 }
  0xfc   : > { %908 = vst.msk [vmem:[%s1492_s8 + $0x70] sm:$0xff] %vm893_vm1, %v843_v40  ;;  %940 = vst.msk [vmem:[%s1492_s8 + $0x170] sm:$0xff] %vm893_vm1, %v875_v41  ;;  %v846_v46 = vmax.f32 %v596_v42, 0.0  ;;  %v878_v47 = vmax.f32 %v756_v43, 0.0  ;;  %v591_v48 = vadd.f32 %v1483_v6, %v590_v44  ;;  %v751_v49 = vadd.f32 %v1483_v6, %v750_v45 }
  0xfd   : > { %v1201_v50 = vpop.f32.mrf.mxu0  ;;  %v1249_v51 = vpop.f32.mrf.mxu1 }
  0xfe   : > { %911 = vst.msk [vmem:[%s1492_s8 + $0x88] sm:$0xff] %vm893_vm1, %v846_v46  ;;  %943 = vst.msk [vmem:[%s1492_s8 + $0x188] sm:$0xff] %vm893_vm1, %v878_v47  ;;  %v845_v52 = vmax.f32 %v591_v48, 0.0  ;;  %v877_v53 = vmax.f32 %v751_v49, 0.0  ;;  %v606_v54 = vadd.f32 %v1201_v50, %v1483_v6  ;;  %v766_v55 = vadd.f32 %v1249_v51, %v1483_v6 }
  0xff   : > { %v600_v56 = vpop.f32.mrf.mxu0  ;;  %v760_v57 = vpop.f32.mrf.mxu1 }
 0x100   : > { %910 = vst.msk [vmem:[%s1492_s8 + $0x80] sm:$0xff] %vm893_vm1, %v845_v52  ;;  %942 = vst.msk [vmem:[%s1492_s8 + $0x180] sm:$0xff] %vm893_vm1, %v877_v53  ;;  %v848_v58 = vmax.f32 %v606_v54, 0.0  ;;  %v880_v59 = vmax.f32 %v766_v55, 0.0  ;;  %v601_v60 = vadd.f32 %v1483_v6, %v600_v56  ;;  %v761_v61 = vadd.f32 %v1483_v6, %v760_v57 }
 0x101   : > { %v1204_v62 = vpop.f32.mrf.mxu0  ;;  %v1252_v63 = vpop.f32.mrf.mxu1 }
 0x102   : > { %913 = vst.msk [vmem:[%s1492_s8 + $0x98] sm:$0xff] %vm893_vm1, %v848_v58  ;;  %945 = vst.msk [vmem:[%s1492_s8 + $0x198] sm:$0xff] %vm893_vm1, %v880_v59  ;;  %v847_v0 = vmax.f32 %v601_v60, 0.0  ;;  %v879_v1 = vmax.f32 %v761_v61, 0.0  ;;  %v616_v2 = vadd.f32 %v1204_v62, %v1483_v6  ;;  %v776_v3 = vadd.f32 %v1252_v63, %v1483_v6 }
 0x103   : > { %v610_v4 = vpop.f32.mrf.mxu0  ;;  %v770_v5 = vpop.f32.mrf.mxu1 }
 0x104   : > { %912 = vst.msk [vmem:[%s1492_s8 + $0x90] sm:$0xff] %vm893_vm1, %v847_v0  ;;  %944 = vst.msk [vmem:[%s1492_s8 + $0x190] sm:$0xff] %vm893_vm1, %v879_v1  ;;  %v850_v7 = vmax.f32 %v616_v2, 0.0  ;;  %v882_v8 = vmax.f32 %v776_v3, 0.0  ;;  %v611_v9 = vadd.f32 %v1483_v6, %v610_v4  ;;  %v771_v10 = vadd.f32 %v1483_v6, %v770_v5 }
 0x105   : > { %v1207_v11 = vpop.f32.mrf.mxu0  ;;  %v1255_v12 = vpop.f32.mrf.mxu1 }
 0x106   : > { %915 = vst.msk [vmem:[%s1492_s8 + $0xa8] sm:$0xff] %vm893_vm1, %v850_v7  ;;  %947 = vst.msk [vmem:[%s1492_s8 + $0x1a8] sm:$0xff] %vm893_vm1, %v882_v8  ;;  %v849_v13 = vmax.f32 %v611_v9, 0.0  ;;  %v881_v14 = vmax.f32 %v771_v10, 0.0  ;;  %v626_v15 = vadd.f32 %v1207_v11, %v1483_v6  ;;  %v786_v16 = vadd.f32 %v1255_v12, %v1483_v6 }
 0x107   : > { %v620_v17 = vpop.f32.mrf.mxu0  ;;  %v780_v18 = vpop.f32.mrf.mxu1 }
 0x108   : > { %914 = vst.msk [vmem:[%s1492_s8 + $0xa0] sm:$0xff] %vm893_vm1, %v849_v13  ;;  %946 = vst.msk [vmem:[%s1492_s8 + $0x1a0] sm:$0xff] %vm893_vm1, %v881_v14  ;;  %v852_v19 = vmax.f32 %v626_v15, 0.0  ;;  %v884_v20 = vmax.f32 %v786_v16, 0.0  ;;  %v621_v21 = vadd.f32 %v1483_v6, %v620_v17  ;;  %v781_v22 = vadd.f32 %v1483_v6, %v780_v18 }
 0x109   : > { %v1210_v23 = vpop.f32.mrf.mxu0  ;;  %v1258_v24 = vpop.f32.mrf.mxu1 }
 0x10a   : > { %917 = vst.msk [vmem:[%s1492_s8 + $0xb8] sm:$0xff] %vm893_vm1, %v852_v19  ;;  %949 = vst.msk [vmem:[%s1492_s8 + $0x1b8] sm:$0xff] %vm893_vm1, %v884_v20  ;;  %v851_v25 = vmax.f32 %v621_v21, 0.0  ;;  %v883_v26 = vmax.f32 %v781_v22, 0.0  ;;  %v636_v27 = vadd.f32 %v1210_v23, %v1483_v6  ;;  %v796_v28 = vadd.f32 %v1258_v24, %v1483_v6 }
 0x10b   : > { %v630_v29 = vpop.f32.mrf.mxu0  ;;  %v790_v30 = vpop.f32.mrf.mxu1 }
 0x10c   : > { %916 = vst.msk [vmem:[%s1492_s8 + $0xb0] sm:$0xff] %vm893_vm1, %v851_v25  ;;  %948 = vst.msk [vmem:[%s1492_s8 + $0x1b0] sm:$0xff] %vm893_vm1, %v883_v26  ;;  %v854_v31 = vmax.f32 %v636_v27, 0.0  ;;  %v886_v32 = vmax.f32 %v796_v28, 0.0  ;;  %v631_v33 = vadd.f32 %v1483_v6, %v630_v29  ;;  %v791_v34 = vadd.f32 %v1483_v6, %v790_v30 }
 0x10d   : > { %v1213_v35 = vpop.f32.mrf.mxu0  ;;  %v1261_v36 = vpop.f32.mrf.mxu1 }
 0x10e   : > { %919 = vst.msk [vmem:[%s1492_s8 + $0xc8] sm:$0xff] %vm893_vm1, %v854_v31  ;;  %951 = vst.msk [vmem:[%s1492_s8 + $0x1c8] sm:$0xff] %vm893_vm1, %v886_v32  ;;  %v853_v37 = vmax.f32 %v631_v33, 0.0  ;;  %v885_v38 = vmax.f32 %v791_v34, 0.0  ;;  %v646_v39 = vadd.f32 %v1213_v35, %v1483_v6  ;;  %v806_v40 = vadd.f32 %v1261_v36, %v1483_v6 }
 0x10f   : > { %v640_v41 = vpop.f32.mrf.mxu0  ;;  %v800_v42 = vpop.f32.mrf.mxu1 }
 0x110   : > { %918 = vst.msk [vmem:[%s1492_s8 + $0xc0] sm:$0xff] %vm893_vm1, %v853_v37  ;;  %950 = vst.msk [vmem:[%s1492_s8 + $0x1c0] sm:$0xff] %vm893_vm1, %v885_v38  ;;  %v856_v43 = vmax.f32 %v646_v39, 0.0  ;;  %v888_v44 = vmax.f32 %v806_v40, 0.0  ;;  %v641_v45 = vadd.f32 %v1483_v6, %v640_v41  ;;  %v801_v46 = vadd.f32 %v1483_v6, %v800_v42 }
 0x111   : > { %v1216_v47 = vpop.f32.mrf.mxu0  ;;  %v1264_v48 = vpop.f32.mrf.mxu1 }
 0x112   : > { %921 = vst.msk [vmem:[%s1492_s8 + $0xd8] sm:$0xff] %vm893_vm1, %v856_v43  ;;  %953 = vst.msk [vmem:[%s1492_s8 + $0x1d8] sm:$0xff] %vm893_vm1, %v888_v44  ;;  %v855_v49 = vmax.f32 %v641_v45, 0.0  ;;  %v887_v50 = vmax.f32 %v801_v46, 0.0  ;;  %v656_v51 = vadd.f32 %v1216_v47, %v1483_v6  ;;  %v816_v52 = vadd.f32 %v1264_v48, %v1483_v6 }
 0x113   : > { %v650_v53 = vpop.f32.mrf.mxu0  ;;  %v810_v54 = vpop.f32.mrf.mxu1 }
 0x114   : > { %920 = vst.msk [vmem:[%s1492_s8 + $0xd0] sm:$0xff] %vm893_vm1, %v855_v49  ;;  %952 = vst.msk [vmem:[%s1492_s8 + $0x1d0] sm:$0xff] %vm893_vm1, %v887_v50  ;;  %v858_v55 = vmax.f32 %v656_v51, 0.0  ;;  %v890_v56 = vmax.f32 %v816_v52, 0.0  ;;  %v651_v57 = vadd.f32 %v1483_v6, %v650_v53  ;;  %v811_v58 = vadd.f32 %v1483_v6, %v810_v54 }
 0x115   : > { %v1219_v59 = vpop.f32.mrf.mxu0  ;;  %v1267_v60 = vpop.f32.mrf.mxu1 }
 0x116   : > { %923 = vst.msk [vmem:[%s1492_s8 + $0xe8] sm:$0xff] %vm893_vm1, %v858_v55  ;;  %955 = vst.msk [vmem:[%s1492_s8 + $0x1e8] sm:$0xff] %vm893_vm1, %v890_v56  ;;  %v857_v61 = vmax.f32 %v651_v57, 0.0  ;;  %v889_v62 = vmax.f32 %v811_v58, 0.0  ;;  %v666_v63 = vadd.f32 %v1219_v59, %v1483_v6  ;;  %v826_v0 = vadd.f32 %v1267_v60, %v1483_v6 }
 0x117   : > { %v660_v1 = vpop.f32.mrf.mxu0  ;;  %v820_v2 = vpop.f32.mrf.mxu1 }
 0x118   : > { %922 = vst.msk [vmem:[%s1492_s8 + $0xe0] sm:$0xff] %vm893_vm1, %v857_v61  ;;  %954 = vst.msk [vmem:[%s1492_s8 + $0x1e0] sm:$0xff] %vm893_vm1, %v889_v62  ;;  %v860_v3 = vmax.f32 %v666_v63, 0.0  ;;  %v892_v4 = vmax.f32 %v826_v0, 0.0  ;;  %v661_v5 = vadd.f32 %v1483_v6, %v660_v1  ;;  %v821_v7 = vadd.f32 %v1483_v6, %v820_v2 }
 0x11a   : > { %925 = vst.msk [vmem:[%s1492_s8 + $0xf8] sm:$0xff] %vm893_vm1, %v860_v3  ;;  %957 = vst.msk [vmem:[%s1492_s8 + $0x1f8] sm:$0xff] %vm893_vm1, %v892_v4  ;;  %v859_v8 = vmax.f32 %v661_v5, 0.0  ;;  %v891_v9 = vmax.f32 %v821_v7, 0.0 }
 0x11c   : > { %924 = vst.msk [vmem:[%s1492_s8 + $0xf0] sm:$0xff] %vm893_vm1, %v859_v8  ;;  %956 = vst.msk [vmem:[%s1492_s8 + $0x1f0] sm:$0xff] %vm893_vm1, %v891_v9 }
 0x11d PF: > { %s13_s12 = sadd.s32 1, %s1294_s12  }
 0x11e   : > { %p10_p4 = scmp.ge.s32.totalorder %s13_s12, 6  }
 0x120   :  { %12 = sbr.rel (!%p10_p4) target bundleno = 1 (0x1), region = 62 }

// kernel: cnn_encoder_forward.5
= control target key start
LH: loop header
LB: loop body
LE: loop exit
PB: predicated region body
PF: predicated region fallthrough
CT: control target
= control target key end

     0   :  { %v1247_v0 = vmov 0.0   ;;  %vm1175_vm0 = vcmask 261120   ;;  %s2622_s1 = inlined_call_operand.vmem [shape: f32[512,32], index: 1, kind: input, shape index: {}]   ;;  %s2623_s0 = inlined_call_operand.vmem [shape: f32[512,512], index: 0, kind: input, shape index: {}]   ;;  %s2624_s2 = inlined_call_operand.vmem [shape: f32[1,32], index: 2, kind: input, shape index: {}]   ;;  %s2625_s3 = inlined_call_operand.vmem [shape: f32[512,32], index: 3, kind: output, shape index: {}]  }
   0x1   :  { %341 = vmatprep.subr.mxu0 %v1247_v0  ;;  %726 = vmatprep.subr.mxu1 %v1247_v0  ;;  %v285_v1 = vld [vmem:[%s2622_s1 + $0x78] sm:$0xff]  ;;  %v284_v3 = vld [vmem:[%s2622_s1 + $0x70] sm:$0xff]  ;;  %v283_v5 = vld [vmem:[%s2622_s1 + $0x68] sm:$0xff] }
   0x2   :  { %v317_v2 = vld [vmem:[%s2622_s1 + $0x178] sm:$0xff]  ;;  %342 = vmatpush1.msra.mxu0 %v285_v1  ;;  %v316_v4 = vld [vmem:[%s2622_s1 + $0x170] sm:$0xff]  ;;  %v315_v6 = vld [vmem:[%s2622_s1 + $0x168] sm:$0xff] }
   0x3   :  { %727 = vmatpush1.msra.mxu1 %v317_v2  ;;  %343 = vmatprep.subr.mxu0 %v1247_v0  ;;  %v282_v7 = vld [vmem:[%s2622_s1 + $0x60] sm:$0xff]  ;;  %v281_v9 = vld [vmem:[%s2622_s1 + $0x58] sm:$0xff]  ;;  %v280_v11 = vld [vmem:[%s2622_s1 + $0x50] sm:$0xff] }
   0x4   :  { %728 = vmatprep.subr.mxu1 %v1247_v0  ;;  %344 = vmatpush1.msra.mxu0 %v284_v3  ;;  %v314_v8 = vld [vmem:[%s2622_s1 + $0x160] sm:$0xff]  ;;  %v313_v10 = vld [vmem:[%s2622_s1 + $0x158] sm:$0xff]  ;;  %v312_v12 = vld [vmem:[%s2622_s1 + $0x150] sm:$0xff] }
   0x5   :  { %729 = vmatpush1.msra.mxu1 %v316_v4  ;;  %345 = vmatprep.subr.mxu0 %v1247_v0  ;;  %v279_v13 = vld [vmem:[%s2622_s1 + $0x48] sm:$0xff]  ;;  %v278_v15 = vld [vmem:[%s2622_s1 + $0x40] sm:$0xff]  ;;  %v277_v17 = vld [vmem:[%s2622_s1 + $0x38] sm:$0xff] }
   0x6   :  { %730 = vmatprep.subr.mxu1 %v1247_v0  ;;  %346 = vmatpush1.msra.mxu0 %v283_v5  ;;  %v311_v14 = vld [vmem:[%s2622_s1 + $0x148] sm:$0xff]  ;;  %v310_v16 = vld [vmem:[%s2622_s1 + $0x140] sm:$0xff]  ;;  %v309_v18 = vld [vmem:[%s2622_s1 + $0x138] sm:$0xff] }
   0x7   :  { %731 = vmatpush1.msra.mxu1 %v315_v6  ;;  %347 = vmatprep.subr.mxu0 %v1247_v0  ;;  %v276_v19 = vld [vmem:[%s2622_s1 + $0x30] sm:$0xff]  ;;  %v275_v21 = vld [vmem:[%s2622_s1 + $0x28] sm:$0xff]  ;;  %v274_v23 = vld [vmem:[%s2622_s1 + $0x20] sm:$0xff] }
   0x8   :  { %732 = vmatprep.subr.mxu1 %v1247_v0  ;;  %348 = vmatpush1.msra.mxu0 %v282_v7  ;;  %v308_v20 = vld [vmem:[%s2622_s1 + $0x130] sm:$0xff]  ;;  %v307_v22 = vld [vmem:[%s2622_s1 + $0x128] sm:$0xff]  ;;  %v306_v24 = vld [vmem:[%s2622_s1 + $0x120] sm:$0xff] }
   0x9   :  { %733 = vmatpush1.msra.mxu1 %v314_v8  ;;  %349 = vmatprep.subr.mxu0 %v1247_v0  ;;  %v273_v25 = vld [vmem:[%s2622_s1 + $0x18] sm:$0xff]  ;;  %v272_v27 = vld [vmem:[%s2622_s1 + $0x10] sm:$0xff]  ;;  %v271_v29 = vld [vmem:[%s2622_s1 + $0x8] sm:$0xff] }
   0xa   :  { %734 = vmatprep.subr.mxu1 %v1247_v0  ;;  %350 = vmatpush1.msra.mxu0 %v281_v9  ;;  %v305_v26 = vld [vmem:[%s2622_s1 + $0x118] sm:$0xff]  ;;  %v304_v28 = vld [vmem:[%s2622_s1 + $0x110] sm:$0xff]  ;;  %v303_v30 = vld [vmem:[%s2622_s1 + $0x108] sm:$0xff] }
   0xb   :  { %735 = vmatpush1.msra.mxu1 %v313_v10  ;;  %351 = vmatprep.subr.mxu0 %v1247_v0  ;;  %v270_v31 = vld [vmem:[%s2622_s1] sm:$0xff]  ;;  %v301_v33 = vld [vmem:[%s2622_s1 + $0xf8] sm:$0xff]  ;;  %v300_v35 = vld [vmem:[%s2622_s1 + $0xf0] sm:$0xff] }
   0xc   :  { %736 = vmatprep.subr.mxu1 %v1247_v0  ;;  %352 = vmatpush1.msra.mxu0 %v280_v11  ;;  %v302_v32 = vld [vmem:[%s2622_s1 + $0x100] sm:$0xff]  ;;  %v333_v34 = vld [vmem:[%s2622_s1 + $0x1f8] sm:$0xff]  ;;  %v332_v36 = vld [vmem:[%s2622_s1 + $0x1f0] sm:$0xff] }
   0xd   :  { %737 = vmatpush1.msra.mxu1 %v312_v12  ;;  %353 = vmatprep.subr.mxu0 %v1247_v0  ;;  %v299_v37 = vld [vmem:[%s2622_s1 + $0xe8] sm:$0xff]  ;;  %v298_v39 = vld [vmem:[%s2622_s1 + $0xe0] sm:$0xff]  ;;  %v297_v41 = vld [vmem:[%s2622_s1 + $0xd8] sm:$0xff] }
   0xe   :  { %738 = vmatprep.subr.mxu1 %v1247_v0  ;;  %354 = vmatpush1.msra.mxu0 %v279_v13  ;;  %v331_v38 = vld [vmem:[%s2622_s1 + $0x1e8] sm:$0xff]  ;;  %v330_v40 = vld [vmem:[%s2622_s1 + $0x1e0] sm:$0xff]  ;;  %v329_v42 = vld [vmem:[%s2622_s1 + $0x1d8] sm:$0xff] }
   0xf   :  { %739 = vmatpush1.msra.mxu1 %v311_v14  ;;  %355 = vmatprep.subr.mxu0 %v1247_v0  ;;  %v296_v43 = vld [vmem:[%s2622_s1 + $0xd0] sm:$0xff]  ;;  %v295_v45 = vld [vmem:[%s2622_s1 + $0xc8] sm:$0xff]  ;;  %v294_v47 = vld [vmem:[%s2622_s1 + $0xc0] sm:$0xff] }
  0x10   :  { %740 = vmatprep.subr.mxu1 %v1247_v0  ;;  %356 = vmatpush1.msra.mxu0 %v278_v15  ;;  %v328_v44 = vld [vmem:[%s2622_s1 + $0x1d0] sm:$0xff]  ;;  %v327_v46 = vld [vmem:[%s2622_s1 + $0x1c8] sm:$0xff]  ;;  %v326_v48 = vld [vmem:[%s2622_s1 + $0x1c0] sm:$0xff] }
  0x11   :  { %741 = vmatpush1.msra.mxu1 %v310_v16  ;;  %357 = vmatprep.subr.mxu0 %v1247_v0  ;;  %v293_v49 = vld [vmem:[%s2622_s1 + $0xb8] sm:$0xff]  ;;  %v292_v51 = vld [vmem:[%s2622_s1 + $0xb0] sm:$0xff]  ;;  %v291_v53 = vld [vmem:[%s2622_s1 + $0xa8] sm:$0xff] }
  0x12   :  { %742 = vmatprep.subr.mxu1 %v1247_v0  ;;  %358 = vmatpush1.msra.mxu0 %v277_v17  ;;  %v325_v50 = vld [vmem:[%s2622_s1 + $0x1b8] sm:$0xff]  ;;  %v324_v52 = vld [vmem:[%s2622_s1 + $0x1b0] sm:$0xff]  ;;  %v323_v54 = vld [vmem:[%s2622_s1 + $0x1a8] sm:$0xff] }
  0x13   :  { %743 = vmatpush1.msra.mxu1 %v309_v18  ;;  %359 = vmatprep.subr.mxu0 %v1247_v0  ;;  %v290_v55 = vld [vmem:[%s2622_s1 + $0xa0] sm:$0xff]  ;;  %v289_v57 = vld [vmem:[%s2622_s1 + $0x98] sm:$0xff]  ;;  %v288_v59 = vld [vmem:[%s2622_s1 + $0x90] sm:$0xff] }
  0x14   :  { %744 = vmatprep.subr.mxu1 %v1247_v0  ;;  %360 = vmatpush1.msra.mxu0 %v276_v19  ;;  %v322_v56 = vld [vmem:[%s2622_s1 + $0x1a0] sm:$0xff]  ;;  %v321_v58 = vld [vmem:[%s2622_s1 + $0x198] sm:$0xff]  ;;  %v320_v60 = vld [vmem:[%s2622_s1 + $0x190] sm:$0xff] }
  0x15   :  { %745 = vmatpush1.msra.mxu1 %v308_v20  ;;  %361 = vmatprep.subr.mxu0 %v1247_v0  ;;  %v287_v61 = vld [vmem:[%s2622_s1 + $0x88] sm:$0xff]  ;;  %v286_v63 = vld [vmem:[%s2622_s1 + $0x80] sm:$0xff]  ;;  %v17_v3 = vld [vmem:[%s2623_s0 + $0x18] sm:$0xff] }
  0x16   :  { %746 = vmatprep.subr.mxu1 %v1247_v0  ;;  %362 = vmatpush1.msra.mxu0 %v275_v21  ;;  %v319_v62 = vld [vmem:[%s2622_s1 + $0x188] sm:$0xff]  ;;  %v318_v2 = vld [vmem:[%s2622_s1 + $0x180] sm:$0xff]  ;;  %v16_v5 = vld [vmem:[%s2623_s0 + $0x10] sm:$0xff] }
  0x17   :  { %747 = vmatpush1.msra.mxu1 %v307_v22  ;;  %363 = vmatprep.subr.mxu0 %v1247_v0  ;;  %v15_v1 = vld [vmem:[%s2623_s0 + $0x8] sm:$0xff]  ;;  %v14_v4 = vld [vmem:[%s2623_s0] sm:$0xff]  ;;  %v21_v7 = vld [vmem:[%s2623_s0 + $0x38] sm:$0xff] }
  0x18   :  { %748 = vmatprep.subr.mxu1 %v1247_v0  ;;  %364 = vmatpush1.msra.mxu0 %v274_v23  ;;  %v19_v6 = vld [vmem:[%s2623_s0 + $0x28] sm:$0xff]  ;;  %v20_v8 = vld [vmem:[%s2623_s0 + $0x30] sm:$0xff]  ;;  %v25_v10 = vld [vmem:[%s2623_s0 + $0x58] sm:$0xff] }
  0x19   :  { %749 = vmatpush1.msra.mxu1 %v306_v24  ;;  %365 = vmatprep.subr.mxu0 %v1247_v0  ;;  %v23_v9 = vld [vmem:[%s2623_s0 + $0x48] sm:$0xff]  ;;  %v22_v11 = vld [vmem:[%s2623_s0 + $0x40] sm:$0xff]  ;;  %v24_v12 = vld [vmem:[%s2623_s0 + $0x50] sm:$0xff] }
  0x1a   :  { %750 = vmatprep.subr.mxu1 %v1247_v0  ;;  %366 = vmatpush1.msra.mxu0 %v273_v25  ;;  %v27_v13 = vld [vmem:[%s2623_s0 + $0x68] sm:$0xff]  ;;  %v29_v14 = vld [vmem:[%s2623_s0 + $0x78] sm:$0xff]  ;;  %v26_v15 = vld [vmem:[%s2623_s0 + $0x60] sm:$0xff] }
  0x1b   :  { %751 = vmatpush1.msra.mxu1 %v305_v26  ;;  %367 = vmatprep.subr.mxu0 %v1247_v0  ;;  %v28_v16 = vld [vmem:[%s2623_s0 + $0x70] sm:$0xff]  ;;  %v31_v17 = vld [vmem:[%s2623_s0 + $0x88] sm:$0xff]  ;;  %v33_v18 = vld [vmem:[%s2623_s0 + $0x98] sm:$0xff] }
  0x1c   :  { %752 = vmatprep.subr.mxu1 %v1247_v0  ;;  %368 = vmatpush1.msra.mxu0 %v272_v27  ;;  %v30_v19 = vld [vmem:[%s2623_s0 + $0x80] sm:$0xff]  ;;  %v32_v20 = vld [vmem:[%s2623_s0 + $0x90] sm:$0xff]  ;;  %v35_v21 = vld [vmem:[%s2623_s0 + $0xa8] sm:$0xff] }
  0x1d   :  { %753 = vmatpush1.msra.mxu1 %v304_v28  ;;  %369 = vmatprep.subr.mxu0 %v1247_v0  ;;  %v37_v22 = vld [vmem:[%s2623_s0 + $0xb8] sm:$0xff]  ;;  %v34_v23 = vld [vmem:[%s2623_s0 + $0xa0] sm:$0xff]  ;;  %v36_v24 = vld [vmem:[%s2623_s0 + $0xb0] sm:$0xff] }
  0x1e   :  { %754 = vmatprep.subr.mxu1 %v1247_v0  ;;  %370 = vmatpush1.msra.mxu0 %v271_v29  ;;  %v39_v25 = vld [vmem:[%s2623_s0 + $0xc8] sm:$0xff]  ;;  %v41_v26 = vld [vmem:[%s2623_s0 + $0xd8] sm:$0xff]  ;;  %v38_v27 = vld [vmem:[%s2623_s0 + $0xc0] sm:$0xff] }
  0x1f   :  { %755 = vmatpush1.msra.mxu1 %v303_v30  ;;  %371 = vmatprep.subr.mxu0 %v1247_v0  ;;  %v40_v28 = vld [vmem:[%s2623_s0 + $0xd0] sm:$0xff]  ;;  %v43_v29 = vld [vmem:[%s2623_s0 + $0xe8] sm:$0xff]  ;;  %v45_v30 = vld [vmem:[%s2623_s0 + $0xf8] sm:$0xff] }
  0x20   :  { %756 = vmatprep.subr.mxu1 %v1247_v0  ;;  %372 = vmatpush1.msra.mxu0 %v270_v31  ;;  %v42_v31 = vld [vmem:[%s2623_s0 + $0xe0] sm:$0xff] }
  0x21   :  { %757 = vmatpush1.msra.mxu1 %v302_v32  ;;  %373 = vmatprep.subr.mxu0 %v1247_v0  ;;  %v44_v32 = vld [vmem:[%s2623_s0 + $0xf0] sm:$0xff] }
  0x22   :  { %758 = vmatprep.subr.mxu1 %v1247_v0  ;;  %374 = vmatpush2.msra.mxu0 %v301_v33  ;;  %v47_v33 = vld [vmem:[%s2623_s0 + $0x108] sm:$0xff] }
  0x23   :  { %759 = vmatpush2.msra.mxu1 %v333_v34  ;;  %375 = vmatprep.subr.mxu0 %v1247_v0  ;;  %v49_v34 = vld [vmem:[%s2623_s0 + $0x118] sm:$0xff] }
  0x24   :  { %760 = vmatprep.subr.mxu1 %v1247_v0  ;;  %376 = vmatpush2.msra.mxu0 %v300_v35  ;;  %v46_v35 = vld [vmem:[%s2623_s0 + $0x100] sm:$0xff] }
  0x25   :  { %761 = vmatpush2.msra.mxu1 %v332_v36  ;;  %377 = vmatprep.subr.mxu0 %v1247_v0  ;;  %v48_v36 = vld [vmem:[%s2623_s0 + $0x110] sm:$0xff] }
  0x26   :  { %762 = vmatprep.subr.mxu1 %v1247_v0  ;;  %378 = vmatpush2.msra.mxu0 %v299_v37  ;;  %v51_v37 = vld [vmem:[%s2623_s0 + $0x128] sm:$0xff] }
  0x27   :  { %763 = vmatpush2.msra.mxu1 %v331_v38  ;;  %379 = vmatprep.subr.mxu0 %v1247_v0  ;;  %v53_v38 = vld [vmem:[%s2623_s0 + $0x138] sm:$0xff] }
  0x28   :  { %764 = vmatprep.subr.mxu1 %v1247_v0  ;;  %380 = vmatpush2.msra.mxu0 %v298_v39  ;;  %v50_v39 = vld [vmem:[%s2623_s0 + $0x120] sm:$0xff] }
  0x29   :  { %765 = vmatpush2.msra.mxu1 %v330_v40  ;;  %381 = vmatprep.subr.mxu0 %v1247_v0  ;;  %v52_v40 = vld [vmem:[%s2623_s0 + $0x130] sm:$0xff] }
  0x2a   :  { %766 = vmatprep.subr.mxu1 %v1247_v0  ;;  %382 = vmatpush2.msra.mxu0 %v297_v41  ;;  %v55_v41 = vld [vmem:[%s2623_s0 + $0x148] sm:$0xff] }
  0x2b   :  { %767 = vmatpush2.msra.mxu1 %v329_v42  ;;  %383 = vmatprep.subr.mxu0 %v1247_v0  ;;  %v57_v42 = vld [vmem:[%s2623_s0 + $0x158] sm:$0xff] }
  0x2c   :  { %768 = vmatprep.subr.mxu1 %v1247_v0  ;;  %384 = vmatpush2.msra.mxu0 %v296_v43  ;;  %v54_v43 = vld [vmem:[%s2623_s0 + $0x140] sm:$0xff] }
  0x2d   :  { %769 = vmatpush2.msra.mxu1 %v328_v44  ;;  %385 = vmatprep.subr.mxu0 %v1247_v0  ;;  %v56_v44 = vld [vmem:[%s2623_s0 + $0x150] sm:$0xff] }
  0x2e   :  { %770 = vmatprep.subr.mxu1 %v1247_v0  ;;  %386 = vmatpush2.msra.mxu0 %v295_v45  ;;  %v59_v45 = vld [vmem:[%s2623_s0 + $0x168] sm:$0xff] }
  0x2f   :  { %771 = vmatpush2.msra.mxu1 %v327_v46  ;;  %387 = vmatprep.subr.mxu0 %v1247_v0  ;;  %v61_v46 = vld [vmem:[%s2623_s0 + $0x178] sm:$0xff] }
  0x30   :  { %772 = vmatprep.subr.mxu1 %v1247_v0  ;;  %388 = vmatpush2.msra.mxu0 %v294_v47  ;;  %v58_v47 = vld [vmem:[%s2623_s0 + $0x160] sm:$0xff] }
  0x31   :  { %773 = vmatpush2.msra.mxu1 %v326_v48  ;;  %389 = vmatprep.subr.mxu0 %v1247_v0  ;;  %v60_v48 = vld [vmem:[%s2623_s0 + $0x170] sm:$0xff] }
  0x32   :  { %774 = vmatprep.subr.mxu1 %v1247_v0  ;;  %390 = vmatpush2.msra.mxu0 %v293_v49  ;;  %v63_v49 = vld [vmem:[%s2623_s0 + $0x188] sm:$0xff] }
  0x33   :  { %775 = vmatpush2.msra.mxu1 %v325_v50  ;;  %391 = vmatprep.subr.mxu0 %v1247_v0  ;;  %v65_v50 = vld [vmem:[%s2623_s0 + $0x198] sm:$0xff] }
  0x34   :  { %776 = vmatprep.subr.mxu1 %v1247_v0  ;;  %392 = vmatpush2.msra.mxu0 %v292_v51  ;;  %v62_v51 = vld [vmem:[%s2623_s0 + $0x180] sm:$0xff] }
  0x35   :  { %777 = vmatpush2.msra.mxu1 %v324_v52  ;;  %393 = vmatprep.subr.mxu0 %v1247_v0  ;;  %v64_v52 = vld [vmem:[%s2623_s0 + $0x190] sm:$0xff] }
  0x36   :  { %778 = vmatprep.subr.mxu1 %v1247_v0  ;;  %394 = vmatpush2.msra.mxu0 %v291_v53  ;;  %v67_v53 = vld [vmem:[%s2623_s0 + $0x1a8] sm:$0xff] }
  0x37   :  { %779 = vmatpush2.msra.mxu1 %v323_v54  ;;  %395 = vmatprep.subr.mxu0 %v1247_v0  ;;  %v69_v54 = vld [vmem:[%s2623_s0 + $0x1b8] sm:$0xff] }
  0x38   :  { %780 = vmatprep.subr.mxu1 %v1247_v0  ;;  %396 = vmatpush2.msra.mxu0 %v290_v55  ;;  %v66_v55 = vld [vmem:[%s2623_s0 + $0x1a0] sm:$0xff] }
  0x39   :  { %781 = vmatpush2.msra.mxu1 %v322_v56  ;;  %397 = vmatprep.subr.mxu0 %v1247_v0  ;;  %v68_v56 = vld [vmem:[%s2623_s0 + $0x1b0] sm:$0xff] }
  0x3a   :  { %782 = vmatprep.subr.mxu1 %v1247_v0  ;;  %398 = vmatpush2.msra.mxu0 %v289_v57  ;;  %v71_v57 = vld [vmem:[%s2623_s0 + $0x1c8] sm:$0xff] }
  0x3b   :  { %783 = vmatpush2.msra.mxu1 %v321_v58  ;;  %399 = vmatprep.subr.mxu0 %v1247_v0  ;;  %v73_v58 = vld [vmem:[%s2623_s0 + $0x1d8] sm:$0xff] }
  0x3c   :  { %784 = vmatprep.subr.mxu1 %v1247_v0  ;;  %400 = vmatpush2.msra.mxu0 %v288_v59  ;;  %v70_v59 = vld [vmem:[%s2623_s0 + $0x1c0] sm:$0xff] }
  0x3d   :  { %785 = vmatpush2.msra.mxu1 %v320_v60  ;;  %401 = vmatprep.subr.mxu0 %v1247_v0  ;;  %v72_v60 = vld [vmem:[%s2623_s0 + $0x1d0] sm:$0xff] }
  0x3e   :  { %786 = vmatprep.subr.mxu1 %v1247_v0  ;;  %402 = vmatpush2.msra.mxu0 %v287_v61  ;;  %v75_v61 = vld [vmem:[%s2623_s0 + $0x1e8] sm:$0xff] }
  0x3f   :  { %787 = vmatpush2.msra.mxu1 %v319_v62  ;;  %403 = vmatprep.subr.mxu0 %v1247_v0  ;;  %v77_v62 = vld [vmem:[%s2623_s0 + $0x1f8] sm:$0xff] }
  0x40   :  { %788 = vmatprep.subr.mxu1 %v1247_v0  ;;  %404 = vmatpush2.msra.mxu0 %v286_v63  ;;  %v18_v0 = vld [vmem:[%s2623_s0 + $0x20] sm:$0xff] }
  0x41   :  { %405 = vmatprep.mubr.f32.mxu0 %v15_v1  ;;  %789 = vmatpush2.msra.mxu1 %v318_v2  ;;  %v74_v63 = vld [vmem:[%s2623_s0 + $0x1e0] sm:$0xff]  ;;  %v76_v1 = vld [vmem:[%s2623_s0 + $0x1f0] sm:$0xff]  ;;  %v79_v2 = vld [vmem:[%s2623_s0 + $0x208] sm:$0xff] }
  0x42   :  { %790 = vmatprep.mubr.f32.mxu1 %v17_v3  ;;  %406 = vmatmul.mubr.f32.vlgmr.msra.gmra.mxu0 %v14_v4  ;;  %v81_v3 = vld [vmem:[%s2623_s0 + $0x218] sm:$0xff]  ;;  %v78_v4 = vld [vmem:[%s2623_s0 + $0x200] sm:$0xff] }
  0x43   :  { %791 = vmatmul.mubr.f32.vlgmr.msra.gmra.mxu1 %v16_v5  ;;  %410 = vmatprep.mubr.f32.mxu0 %v19_v6  ;;  %v80_v5 = vld [vmem:[%s2623_s0 + $0x210] sm:$0xff]  ;;  %v83_v6 = vld [vmem:[%s2623_s0 + $0x228] sm:$0xff] }
  0x44   :  { %795 = vmatprep.mubr.f32.mxu1 %v21_v7  ;;  %v85_v7 = vld [vmem:[%s2623_s0 + $0x238] sm:$0xff] }
  0x46   :  { %411 = vmatmul.mubr.f32.gmra.mxu0 %v18_v0  ;;  %v82_v0 = vld [vmem:[%s2623_s0 + $0x220] sm:$0xff] }
  0x47   :  { %796 = vmatmul.mubr.f32.gmra.mxu1 %v20_v8  ;;  %415 = vmatprep.mubr.f32.mxu0 %v23_v9  ;;  %v84_v8 = vld [vmem:[%s2623_s0 + $0x230] sm:$0xff]  ;;  %v87_v9 = vld [vmem:[%s2623_s0 + $0x248] sm:$0xff] }
  0x48   :  { %800 = vmatprep.mubr.f32.mxu1 %v25_v10  ;;  %v89_v10 = vld [vmem:[%s2623_s0 + $0x258] sm:$0xff] }
  0x4a   :  { %416 = vmatmul.mubr.f32.gmra.mxu0 %v22_v11  ;;  %v86_v11 = vld [vmem:[%s2623_s0 + $0x240] sm:$0xff] }
  0x4b   :  { %801 = vmatmul.mubr.f32.gmra.mxu1 %v24_v12  ;;  %420 = vmatprep.mubr.f32.mxu0 %v27_v13  ;;  %v88_v12 = vld [vmem:[%s2623_s0 + $0x250] sm:$0xff]  ;;  %v91_v13 = vld [vmem:[%s2623_s0 + $0x268] sm:$0xff] }
  0x4c   :  { %805 = vmatprep.mubr.f32.mxu1 %v29_v14  ;;  %v93_v14 = vld [vmem:[%s2623_s0 + $0x278] sm:$0xff] }
  0x4e   :  { %421 = vmatmul.mubr.f32.gmra.mxu0 %v26_v15  ;;  %v90_v15 = vld [vmem:[%s2623_s0 + $0x260] sm:$0xff] }
  0x4f   :  { %806 = vmatmul.mubr.f32.gmra.mxu1 %v28_v16  ;;  %425 = vmatprep.mubr.f32.mxu0 %v31_v17  ;;  %v92_v16 = vld [vmem:[%s2623_s0 + $0x270] sm:$0xff]  ;;  %v95_v17 = vld [vmem:[%s2623_s0 + $0x288] sm:$0xff] }
  0x50   :  { %810 = vmatprep.mubr.f32.mxu1 %v33_v18  ;;  %v97_v18 = vld [vmem:[%s2623_s0 + $0x298] sm:$0xff] }
  0x52   :  { %426 = vmatmul.mubr.f32.gmra.mxu0 %v30_v19  ;;  %v94_v19 = vld [vmem:[%s2623_s0 + $0x280] sm:$0xff] }
  0x53   :  { %811 = vmatmul.mubr.f32.gmra.mxu1 %v32_v20  ;;  %430 = vmatprep.mubr.f32.mxu0 %v35_v21  ;;  %v96_v20 = vld [vmem:[%s2623_s0 + $0x290] sm:$0xff]  ;;  %v99_v21 = vld [vmem:[%s2623_s0 + $0x2a8] sm:$0xff] }
  0x54   :  { %815 = vmatprep.mubr.f32.mxu1 %v37_v22  ;;  %v101_v22 = vld [vmem:[%s2623_s0 + $0x2b8] sm:$0xff] }
  0x56   :  { %431 = vmatmul.mubr.f32.gmra.mxu0 %v34_v23  ;;  %v98_v23 = vld [vmem:[%s2623_s0 + $0x2a0] sm:$0xff] }
  0x57   :  { %816 = vmatmul.mubr.f32.gmra.mxu1 %v36_v24  ;;  %435 = vmatprep.mubr.f32.mxu0 %v39_v25  ;;  %v100_v24 = vld [vmem:[%s2623_s0 + $0x2b0] sm:$0xff]  ;;  %v103_v25 = vld [vmem:[%s2623_s0 + $0x2c8] sm:$0xff] }
  0x58   :  { %820 = vmatprep.mubr.f32.mxu1 %v41_v26  ;;  %v105_v26 = vld [vmem:[%s2623_s0 + $0x2d8] sm:$0xff] }
  0x5a   :  { %436 = vmatmul.mubr.f32.gmra.mxu0 %v38_v27  ;;  %v102_v27 = vld [vmem:[%s2623_s0 + $0x2c0] sm:$0xff] }
  0x5b   :  { %821 = vmatmul.mubr.f32.gmra.mxu1 %v40_v28  ;;  %440 = vmatprep.mubr.f32.mxu0 %v43_v29  ;;  %v104_v28 = vld [vmem:[%s2623_s0 + $0x2d0] sm:$0xff]  ;;  %v107_v29 = vld [vmem:[%s2623_s0 + $0x2e8] sm:$0xff] }
  0x5c   :  { %825 = vmatprep.mubr.f32.mxu1 %v45_v30  ;;  %v109_v30 = vld [vmem:[%s2623_s0 + $0x2f8] sm:$0xff] }
  0x5e   :  { %441 = vmatmul.mubr.f32.gmra.mxu0 %v42_v31  ;;  %v106_v31 = vld [vmem:[%s2623_s0 + $0x2e0] sm:$0xff] }
  0x5f   :  { %826 = vmatmul.mubr.f32.gmra.mxu1 %v44_v32  ;;  %445 = vmatprep.mubr.f32.mxu0 %v47_v33  ;;  %v108_v32 = vld [vmem:[%s2623_s0 + $0x2f0] sm:$0xff]  ;;  %v111_v33 = vld [vmem:[%s2623_s0 + $0x308] sm:$0xff] }
  0x60   :  { %830 = vmatprep.mubr.f32.mxu1 %v49_v34  ;;  %v113_v34 = vld [vmem:[%s2623_s0 + $0x318] sm:$0xff] }
  0x62   :  { %446 = vmatmul.mubr.f32.gmra.mxu0 %v46_v35  ;;  %v110_v35 = vld [vmem:[%s2623_s0 + $0x300] sm:$0xff] }
  0x63   :  { %831 = vmatmul.mubr.f32.gmra.mxu1 %v48_v36  ;;  %450 = vmatprep.mubr.f32.mxu0 %v51_v37  ;;  %v112_v36 = vld [vmem:[%s2623_s0 + $0x310] sm:$0xff]  ;;  %v115_v37 = vld [vmem:[%s2623_s0 + $0x328] sm:$0xff] }
  0x64   :  { %835 = vmatprep.mubr.f32.mxu1 %v53_v38  ;;  %v117_v38 = vld [vmem:[%s2623_s0 + $0x338] sm:$0xff] }
  0x66   :  { %451 = vmatmul.mubr.f32.gmra.mxu0 %v50_v39  ;;  %v114_v39 = vld [vmem:[%s2623_s0 + $0x320] sm:$0xff] }
  0x67   :  { %836 = vmatmul.mubr.f32.gmra.mxu1 %v52_v40  ;;  %455 = vmatprep.mubr.f32.mxu0 %v55_v41  ;;  %v116_v40 = vld [vmem:[%s2623_s0 + $0x330] sm:$0xff]  ;;  %v119_v41 = vld [vmem:[%s2623_s0 + $0x348] sm:$0xff] }
  0x68   :  { %840 = vmatprep.mubr.f32.mxu1 %v57_v42  ;;  %v121_v42 = vld [vmem:[%s2623_s0 + $0x358] sm:$0xff] }
  0x6a   :  { %456 = vmatmul.mubr.f32.gmra.mxu0 %v54_v43  ;;  %v118_v43 = vld [vmem:[%s2623_s0 + $0x340] sm:$0xff] }
  0x6b   :  { %841 = vmatmul.mubr.f32.gmra.mxu1 %v56_v44  ;;  %460 = vmatprep.mubr.f32.mxu0 %v59_v45  ;;  %v120_v44 = vld [vmem:[%s2623_s0 + $0x350] sm:$0xff]  ;;  %v123_v45 = vld [vmem:[%s2623_s0 + $0x368] sm:$0xff] }
  0x6c   :  { %845 = vmatprep.mubr.f32.mxu1 %v61_v46  ;;  %v125_v46 = vld [vmem:[%s2623_s0 + $0x378] sm:$0xff] }
  0x6e   :  { %461 = vmatmul.mubr.f32.gmra.mxu0 %v58_v47  ;;  %v122_v47 = vld [vmem:[%s2623_s0 + $0x360] sm:$0xff] }
  0x6f   :  { %846 = vmatmul.mubr.f32.gmra.mxu1 %v60_v48  ;;  %465 = vmatprep.mubr.f32.mxu0 %v63_v49  ;;  %v124_v48 = vld [vmem:[%s2623_s0 + $0x370] sm:$0xff]  ;;  %v127_v49 = vld [vmem:[%s2623_s0 + $0x388] sm:$0xff] }
  0x70   :  { %850 = vmatprep.mubr.f32.mxu1 %v65_v50  ;;  %v129_v50 = vld [vmem:[%s2623_s0 + $0x398] sm:$0xff] }
  0x72   :  { %466 = vmatmul.mubr.f32.gmra.mxu0 %v62_v51  ;;  %v126_v51 = vld [vmem:[%s2623_s0 + $0x380] sm:$0xff] }
  0x73   :  { %851 = vmatmul.mubr.f32.gmra.mxu1 %v64_v52  ;;  %470 = vmatprep.mubr.f32.mxu0 %v67_v53  ;;  %v128_v52 = vld [vmem:[%s2623_s0 + $0x390] sm:$0xff]  ;;  %v131_v53 = vld [vmem:[%s2623_s0 + $0x3a8] sm:$0xff] }
  0x74   :  { %855 = vmatprep.mubr.f32.mxu1 %v69_v54  ;;  %v133_v54 = vld [vmem:[%s2623_s0 + $0x3b8] sm:$0xff] }
  0x76   :  { %471 = vmatmul.mubr.f32.gmra.mxu0 %v66_v55  ;;  %v130_v55 = vld [vmem:[%s2623_s0 + $0x3a0] sm:$0xff] }
  0x77   :  { %856 = vmatmul.mubr.f32.gmra.mxu1 %v68_v56  ;;  %475 = vmatprep.mubr.f32.mxu0 %v71_v57  ;;  %v132_v56 = vld [vmem:[%s2623_s0 + $0x3b0] sm:$0xff]  ;;  %v135_v57 = vld [vmem:[%s2623_s0 + $0x3c8] sm:$0xff] }
  0x78   :  { %860 = vmatprep.mubr.f32.mxu1 %v73_v58  ;;  %v137_v58 = vld [vmem:[%s2623_s0 + $0x3d8] sm:$0xff] }
  0x7a   :  { %476 = vmatmul.mubr.f32.gmra.mxu0 %v70_v59  ;;  %v134_v59 = vld [vmem:[%s2623_s0 + $0x3c0] sm:$0xff] }
  0x7b   :  { %861 = vmatmul.mubr.f32.gmra.mxu1 %v72_v60  ;;  %480 = vmatprep.mubr.f32.mxu0 %v75_v61  ;;  %v136_v60 = vld [vmem:[%s2623_s0 + $0x3d0] sm:$0xff]  ;;  %v139_v61 = vld [vmem:[%s2623_s0 + $0x3e8] sm:$0xff] }
  0x7c   :  { %865 = vmatprep.mubr.f32.mxu1 %v77_v62  ;;  %v141_v62 = vld [vmem:[%s2623_s0 + $0x3f8] sm:$0xff] }
  0x7e   :  { %481 = vmatmul.mubr.f32.gmra.mxu0 %v74_v63  ;;  %v138_v63 = vld [vmem:[%s2623_s0 + $0x3e0] sm:$0xff] }
  0x7f   :  { %866 = vmatmul.mubr.f32.gmra.mxu1 %v76_v1  ;;  %485 = vmatprep.mubr.f32.mxu0 %v79_v2  ;;  %v140_v1 = vld [vmem:[%s2623_s0 + $0x3f0] sm:$0xff]  ;;  %v143_v2 = vld [vmem:[%s2623_s0 + $0x408] sm:$0xff] }
  0x80   :  { %870 = vmatprep.mubr.f32.mxu1 %v81_v3  ;;  %v145_v3 = vld [vmem:[%s2623_s0 + $0x418] sm:$0xff] }
  0x82   :  { %486 = vmatmul.mubr.f32.gmra.mxu0 %v78_v4  ;;  %v142_v4 = vld [vmem:[%s2623_s0 + $0x400] sm:$0xff] }
  0x83   :  { %871 = vmatmul.mubr.f32.gmra.mxu1 %v80_v5  ;;  %490 = vmatprep.mubr.f32.mxu0 %v83_v6  ;;  %v144_v5 = vld [vmem:[%s2623_s0 + $0x410] sm:$0xff]  ;;  %v147_v6 = vld [vmem:[%s2623_s0 + $0x428] sm:$0xff] }
  0x84   :  { %875 = vmatprep.mubr.f32.mxu1 %v85_v7  ;;  %v149_v7 = vld [vmem:[%s2623_s0 + $0x438] sm:$0xff] }
  0x86   :  { %491 = vmatmul.mubr.f32.gmra.mxu0 %v82_v0  ;;  %v146_v0 = vld [vmem:[%s2623_s0 + $0x420] sm:$0xff] }
  0x87   :  { %876 = vmatmul.mubr.f32.gmra.mxu1 %v84_v8  ;;  %495 = vmatprep.mubr.f32.mxu0 %v87_v9  ;;  %v148_v8 = vld [vmem:[%s2623_s0 + $0x430] sm:$0xff]  ;;  %v151_v9 = vld [vmem:[%s2623_s0 + $0x448] sm:$0xff] }
  0x88   :  { %880 = vmatprep.mubr.f32.mxu1 %v89_v10  ;;  %v153_v10 = vld [vmem:[%s2623_s0 + $0x458] sm:$0xff] }
  0x8a   :  { %496 = vmatmul.mubr.f32.gmra.mxu0 %v86_v11  ;;  %v150_v11 = vld [vmem:[%s2623_s0 + $0x440] sm:$0xff] }
  0x8b   :  { %881 = vmatmul.mubr.f32.gmra.mxu1 %v88_v12  ;;  %500 = vmatprep.mubr.f32.mxu0 %v91_v13  ;;  %v152_v12 = vld [vmem:[%s2623_s0 + $0x450] sm:$0xff]  ;;  %v155_v13 = vld [vmem:[%s2623_s0 + $0x468] sm:$0xff] }
  0x8c   :  { %885 = vmatprep.mubr.f32.mxu1 %v93_v14  ;;  %v157_v14 = vld [vmem:[%s2623_s0 + $0x478] sm:$0xff] }
  0x8e   :  { %501 = vmatmul.mubr.f32.gmra.mxu0 %v90_v15  ;;  %v154_v15 = vld [vmem:[%s2623_s0 + $0x460] sm:$0xff] }
  0x8f   :  { %886 = vmatmul.mubr.f32.gmra.mxu1 %v92_v16  ;;  %505 = vmatprep.mubr.f32.mxu0 %v95_v17  ;;  %v156_v16 = vld [vmem:[%s2623_s0 + $0x470] sm:$0xff]  ;;  %v159_v17 = vld [vmem:[%s2623_s0 + $0x488] sm:$0xff] }
  0x90   :  { %890 = vmatprep.mubr.f32.mxu1 %v97_v18  ;;  %v161_v18 = vld [vmem:[%s2623_s0 + $0x498] sm:$0xff] }
  0x92   :  { %506 = vmatmul.mubr.f32.gmra.mxu0 %v94_v19  ;;  %v158_v19 = vld [vmem:[%s2623_s0 + $0x480] sm:$0xff] }
  0x93   :  { %891 = vmatmul.mubr.f32.gmra.mxu1 %v96_v20  ;;  %510 = vmatprep.mubr.f32.mxu0 %v99_v21  ;;  %v160_v20 = vld [vmem:[%s2623_s0 + $0x490] sm:$0xff]  ;;  %v163_v21 = vld [vmem:[%s2623_s0 + $0x4a8] sm:$0xff] }
  0x94   :  { %895 = vmatprep.mubr.f32.mxu1 %v101_v22  ;;  %v165_v22 = vld [vmem:[%s2623_s0 + $0x4b8] sm:$0xff] }
  0x96   :  { %511 = vmatmul.mubr.f32.gmra.mxu0 %v98_v23  ;;  %v162_v23 = vld [vmem:[%s2623_s0 + $0x4a0] sm:$0xff] }
  0x97   :  { %896 = vmatmul.mubr.f32.gmra.mxu1 %v100_v24  ;;  %515 = vmatprep.mubr.f32.mxu0 %v103_v25  ;;  %v164_v24 = vld [vmem:[%s2623_s0 + $0x4b0] sm:$0xff]  ;;  %v167_v25 = vld [vmem:[%s2623_s0 + $0x4c8] sm:$0xff] }
  0x98   :  { %900 = vmatprep.mubr.f32.mxu1 %v105_v26  ;;  %v169_v26 = vld [vmem:[%s2623_s0 + $0x4d8] sm:$0xff] }
  0x9a   :  { %516 = vmatmul.mubr.f32.gmra.mxu0 %v102_v27  ;;  %v166_v27 = vld [vmem:[%s2623_s0 + $0x4c0] sm:$0xff] }
  0x9b   :  { %901 = vmatmul.mubr.f32.gmra.mxu1 %v104_v28  ;;  %520 = vmatprep.mubr.f32.mxu0 %v107_v29  ;;  %v168_v28 = vld [vmem:[%s2623_s0 + $0x4d0] sm:$0xff]  ;;  %v171_v29 = vld [vmem:[%s2623_s0 + $0x4e8] sm:$0xff] }
  0x9c   :  { %905 = vmatprep.mubr.f32.mxu1 %v109_v30  ;;  %v173_v30 = vld [vmem:[%s2623_s0 + $0x4f8] sm:$0xff] }
  0x9e   :  { %521 = vmatmul.mubr.f32.gmra.mxu0 %v106_v31  ;;  %v170_v31 = vld [vmem:[%s2623_s0 + $0x4e0] sm:$0xff] }
  0x9f   :  { %906 = vmatmul.mubr.f32.gmra.mxu1 %v108_v32  ;;  %525 = vmatprep.mubr.f32.mxu0 %v111_v33  ;;  %v172_v32 = vld [vmem:[%s2623_s0 + $0x4f0] sm:$0xff]  ;;  %v175_v33 = vld [vmem:[%s2623_s0 + $0x508] sm:$0xff] }
  0xa0   :  { %910 = vmatprep.mubr.f32.mxu1 %v113_v34  ;;  %v177_v34 = vld [vmem:[%s2623_s0 + $0x518] sm:$0xff] }
  0xa2   :  { %526 = vmatmul.mubr.f32.gmra.mxu0 %v110_v35  ;;  %v174_v35 = vld [vmem:[%s2623_s0 + $0x500] sm:$0xff] }
  0xa3   :  { %911 = vmatmul.mubr.f32.gmra.mxu1 %v112_v36  ;;  %530 = vmatprep.mubr.f32.mxu0 %v115_v37  ;;  %v176_v36 = vld [vmem:[%s2623_s0 + $0x510] sm:$0xff]  ;;  %v179_v37 = vld [vmem:[%s2623_s0 + $0x528] sm:$0xff] }
  0xa4   :  { %915 = vmatprep.mubr.f32.mxu1 %v117_v38  ;;  %v181_v38 = vld [vmem:[%s2623_s0 + $0x538] sm:$0xff] }
  0xa6   :  { %531 = vmatmul.mubr.f32.gmra.mxu0 %v114_v39  ;;  %v178_v39 = vld [vmem:[%s2623_s0 + $0x520] sm:$0xff] }
  0xa7   :  { %916 = vmatmul.mubr.f32.gmra.mxu1 %v116_v40  ;;  %535 = vmatprep.mubr.f32.mxu0 %v119_v41  ;;  %v180_v40 = vld [vmem:[%s2623_s0 + $0x530] sm:$0xff]  ;;  %v183_v41 = vld [vmem:[%s2623_s0 + $0x548] sm:$0xff] }
  0xa8   :  { %920 = vmatprep.mubr.f32.mxu1 %v121_v42  ;;  %v185_v42 = vld [vmem:[%s2623_s0 + $0x558] sm:$0xff] }
  0xaa   :  { %536 = vmatmul.mubr.f32.gmra.mxu0 %v118_v43  ;;  %v182_v43 = vld [vmem:[%s2623_s0 + $0x540] sm:$0xff] }
  0xab   :  { %921 = vmatmul.mubr.f32.gmra.mxu1 %v120_v44  ;;  %540 = vmatprep.mubr.f32.mxu0 %v123_v45  ;;  %v184_v44 = vld [vmem:[%s2623_s0 + $0x550] sm:$0xff]  ;;  %v187_v45 = vld [vmem:[%s2623_s0 + $0x568] sm:$0xff] }
  0xac   :  { %925 = vmatprep.mubr.f32.mxu1 %v125_v46  ;;  %v189_v46 = vld [vmem:[%s2623_s0 + $0x578] sm:$0xff] }
  0xae   :  { %541 = vmatmul.mubr.f32.gmra.mxu0 %v122_v47  ;;  %v186_v47 = vld [vmem:[%s2623_s0 + $0x560] sm:$0xff] }
  0xaf   :  { %926 = vmatmul.mubr.f32.gmra.mxu1 %v124_v48  ;;  %545 = vmatprep.mubr.f32.mxu0 %v127_v49  ;;  %v188_v48 = vld [vmem:[%s2623_s0 + $0x570] sm:$0xff]  ;;  %v191_v49 = vld [vmem:[%s2623_s0 + $0x588] sm:$0xff] }
  0xb0   :  { %930 = vmatprep.mubr.f32.mxu1 %v129_v50  ;;  %v193_v50 = vld [vmem:[%s2623_s0 + $0x598] sm:$0xff] }
  0xb2   :  { %546 = vmatmul.mubr.f32.gmra.mxu0 %v126_v51  ;;  %v190_v51 = vld [vmem:[%s2623_s0 + $0x580] sm:$0xff] }
  0xb3   :  { %931 = vmatmul.mubr.f32.gmra.mxu1 %v128_v52  ;;  %550 = vmatprep.mubr.f32.mxu0 %v131_v53  ;;  %v192_v52 = vld [vmem:[%s2623_s0 + $0x590] sm:$0xff]  ;;  %v195_v53 = vld [vmem:[%s2623_s0 + $0x5a8] sm:$0xff] }
  0xb4   :  { %935 = vmatprep.mubr.f32.mxu1 %v133_v54  ;;  %v197_v54 = vld [vmem:[%s2623_s0 + $0x5b8] sm:$0xff] }
  0xb6   :  { %551 = vmatmul.mubr.f32.gmra.mxu0 %v130_v55  ;;  %v194_v55 = vld [vmem:[%s2623_s0 + $0x5a0] sm:$0xff] }
  0xb7   :  { %936 = vmatmul.mubr.f32.gmra.mxu1 %v132_v56  ;;  %555 = vmatprep.mubr.f32.mxu0 %v135_v57  ;;  %v196_v56 = vld [vmem:[%s2623_s0 + $0x5b0] sm:$0xff]  ;;  %v199_v57 = vld [vmem:[%s2623_s0 + $0x5c8] sm:$0xff] }
  0xb8   :  { %940 = vmatprep.mubr.f32.mxu1 %v137_v58  ;;  %v201_v58 = vld [vmem:[%s2623_s0 + $0x5d8] sm:$0xff] }
  0xba   :  { %556 = vmatmul.mubr.f32.gmra.mxu0 %v134_v59  ;;  %v198_v59 = vld [vmem:[%s2623_s0 + $0x5c0] sm:$0xff] }
  0xbb   :  { %941 = vmatmul.mubr.f32.gmra.mxu1 %v136_v60  ;;  %560 = vmatprep.mubr.f32.mxu0 %v139_v61  ;;  %v200_v60 = vld [vmem:[%s2623_s0 + $0x5d0] sm:$0xff]  ;;  %v203_v61 = vld [vmem:[%s2623_s0 + $0x5e8] sm:$0xff] }
  0xbc   :  { %945 = vmatprep.mubr.f32.mxu1 %v141_v62  ;;  %v205_v62 = vld [vmem:[%s2623_s0 + $0x5f8] sm:$0xff] }
  0xbe   :  { %561 = vmatmul.mubr.f32.gmra.mxu0 %v138_v63  ;;  %v202_v63 = vld [vmem:[%s2623_s0 + $0x5e0] sm:$0xff] }
  0xbf   :  { %946 = vmatmul.mubr.f32.gmra.mxu1 %v140_v1  ;;  %565 = vmatprep.mubr.f32.mxu0 %v143_v2  ;;  %v204_v1 = vld [vmem:[%s2623_s0 + $0x5f0] sm:$0xff]  ;;  %v207_v2 = vld [vmem:[%s2623_s0 + $0x608] sm:$0xff] }
  0xc0   :  { %950 = vmatprep.mubr.f32.mxu1 %v145_v3  ;;  %v209_v3 = vld [vmem:[%s2623_s0 + $0x618] sm:$0xff] }
  0xc2   :  { %566 = vmatmul.mubr.f32.gmra.mxu0 %v142_v4  ;;  %v206_v4 = vld [vmem:[%s2623_s0 + $0x600] sm:$0xff] }
  0xc3   :  { %951 = vmatmul.mubr.f32.gmra.mxu1 %v144_v5  ;;  %570 = vmatprep.mubr.f32.mxu0 %v147_v6  ;;  %v208_v5 = vld [vmem:[%s2623_s0 + $0x610] sm:$0xff]  ;;  %v2115_v6 = vld [vmem:[%s2624_s2] ss:$0 sm:$0xff] }
  0xc4   :  { %955 = vmatprep.mubr.f32.mxu1 %v149_v7  ;;  %v211_v7 = vld [vmem:[%s2623_s0 + $0x628] sm:$0xff] }
  0xc6   :  { %571 = vmatmul.mubr.f32.gmra.mxu0 %v146_v0  ;;  %v213_v0 = vld [vmem:[%s2623_s0 + $0x638] sm:$0xff] }
  0xc7   :  { %956 = vmatmul.mubr.f32.gmra.mxu1 %v148_v8  ;;  %575 = vmatprep.mubr.f32.mxu0 %v151_v9 }
  0xc8   :  { %960 = vmatprep.mubr.f32.mxu1 %v153_v10 }
  0xca   :  { %576 = vmatmul.mubr.f32.gmra.mxu0 %v150_v11  ;;  %v210_v11 = vld [vmem:[%s2623_s0 + $0x620] sm:$0xff] }
  0xcb   :  { %961 = vmatmul.mubr.f32.gmra.mxu1 %v152_v12  ;;  %580 = vmatprep.mubr.f32.mxu0 %v155_v13  ;;  %v212_v12 = vld [vmem:[%s2623_s0 + $0x630] sm:$0xff] }
  0xcc   :  { %965 = vmatprep.mubr.f32.mxu1 %v157_v14 }
  0xce   :  { %581 = vmatmul.mubr.f32.gmra.mxu0 %v154_v15  ;;  %v215_v15 = vld [vmem:[%s2623_s0 + $0x648] sm:$0xff] }
  0xcf   :  { %966 = vmatmul.mubr.f32.gmra.mxu1 %v156_v16  ;;  %585 = vmatprep.mubr.f32.mxu0 %v159_v17  ;;  %v217_v16 = vld [vmem:[%s2623_s0 + $0x658] sm:$0xff] }
  0xd0   :  { %970 = vmatprep.mubr.f32.mxu1 %v161_v18 }
  0xd2   :  { %586 = vmatmul.mubr.f32.gmra.mxu0 %v158_v19 }
  0xd3   :  { %971 = vmatmul.mubr.f32.gmra.mxu1 %v160_v20  ;;  %590 = vmatprep.mubr.f32.mxu0 %v163_v21 }
  0xd4   :  { %975 = vmatprep.mubr.f32.mxu1 %v165_v22  ;;  %v214_v22 = vld [vmem:[%s2623_s0 + $0x640] sm:$0xff] }
  0xd6   :  { %591 = vmatmul.mubr.f32.gmra.mxu0 %v162_v23  ;;  %v216_v23 = vld [vmem:[%s2623_s0 + $0x650] sm:$0xff] }
  0xd7   :  { %976 = vmatmul.mubr.f32.gmra.mxu1 %v164_v24  ;;  %595 = vmatprep.mubr.f32.mxu0 %v167_v25 }
  0xd8   :  { %980 = vmatprep.mubr.f32.mxu1 %v169_v26  ;;  %v219_v26 = vld [vmem:[%s2623_s0 + $0x668] sm:$0xff] }
  0xda   :  { %596 = vmatmul.mubr.f32.gmra.mxu0 %v166_v27  ;;  %v221_v27 = vld [vmem:[%s2623_s0 + $0x678] sm:$0xff] }
  0xdb   :  { %981 = vmatmul.mubr.f32.gmra.mxu1 %v168_v28  ;;  %600 = vmatprep.mubr.f32.mxu0 %v171_v29 }
  0xdc   :  { %985 = vmatprep.mubr.f32.mxu1 %v173_v30 }
  0xde   :  { %601 = vmatmul.mubr.f32.gmra.mxu0 %v170_v31 }
  0xdf   :  { %986 = vmatmul.mubr.f32.gmra.mxu1 %v172_v32  ;;  %605 = vmatprep.mubr.f32.mxu0 %v175_v33  ;;  %v218_v33 = vld [vmem:[%s2623_s0 + $0x660] sm:$0xff] }
  0xe0   :  { %990 = vmatprep.mubr.f32.mxu1 %v177_v34  ;;  %v220_v34 = vld [vmem:[%s2623_s0 + $0x670] sm:$0xff] }
  0xe2   :  { %606 = vmatmul.mubr.f32.gmra.mxu0 %v174_v35 }
  0xe3   :  { %991 = vmatmul.mubr.f32.gmra.mxu1 %v176_v36  ;;  %610 = vmatprep.mubr.f32.mxu0 %v179_v37  ;;  %v223_v37 = vld [vmem:[%s2623_s0 + $0x688] sm:$0xff] }
  0xe4   :  { %995 = vmatprep.mubr.f32.mxu1 %v181_v38  ;;  %v225_v38 = vld [vmem:[%s2623_s0 + $0x698] sm:$0xff] }
  0xe6   :  { %611 = vmatmul.mubr.f32.gmra.mxu0 %v178_v39 }
  0xe7   :  { %996 = vmatmul.mubr.f32.gmra.mxu1 %v180_v40  ;;  %615 = vmatprep.mubr.f32.mxu0 %v183_v41 }
  0xe8   :  { %1000 = vmatprep.mubr.f32.mxu1 %v185_v42 }
  0xea   :  { %616 = vmatmul.mubr.f32.gmra.mxu0 %v182_v43 }
  0xeb   :  { %1001 = vmatmul.mubr.f32.gmra.mxu1 %v184_v44  ;;  %620 = vmatprep.mubr.f32.mxu0 %v187_v45  ;;  %v222_v44 = vld [vmem:[%s2623_s0 + $0x680] sm:$0xff]  ;;  %v224_v45 = vld [vmem:[%s2623_s0 + $0x690] sm:$0xff] }
  0xec   :  { %1005 = vmatprep.mubr.f32.mxu1 %v189_v46 }
  0xee   :  { %621 = vmatmul.mubr.f32.gmra.mxu0 %v186_v47 }
  0xef   :  { %1006 = vmatmul.mubr.f32.gmra.mxu1 %v188_v48  ;;  %625 = vmatprep.mubr.f32.mxu0 %v191_v49  ;;  %v227_v48 = vld [vmem:[%s2623_s0 + $0x6a8] sm:$0xff]  ;;  %v229_v49 = vld [vmem:[%s2623_s0 + $0x6b8] sm:$0xff] }
  0xf0   :  { %1010 = vmatprep.mubr.f32.mxu1 %v193_v50 }
  0xf2   :  { %626 = vmatmul.mubr.f32.gmra.mxu0 %v190_v51 }
  0xf3   :  { %1011 = vmatmul.mubr.f32.gmra.mxu1 %v192_v52  ;;  %630 = vmatprep.mubr.f32.mxu0 %v195_v53 }
  0xf4   :  { %1015 = vmatprep.mubr.f32.mxu1 %v197_v54 }
  0xf6   :  { %631 = vmatmul.mubr.f32.gmra.mxu0 %v194_v55  ;;  %v226_v55 = vld [vmem:[%s2623_s0 + $0x6a0] sm:$0xff] }
  0xf7   :  { %1016 = vmatmul.mubr.f32.gmra.mxu1 %v196_v56  ;;  %635 = vmatprep.mubr.f32.mxu0 %v199_v57  ;;  %v228_v56 = vld [vmem:[%s2623_s0 + $0x6b0] sm:$0xff] }
  0xf8   :  { %1020 = vmatprep.mubr.f32.mxu1 %v201_v58 }
  0xfa   :  { %636 = vmatmul.mubr.f32.gmra.mxu0 %v198_v59  ;;  %v231_v59 = vld [vmem:[%s2623_s0 + $0x6c8] sm:$0xff] }
  0xfb   :  { %1021 = vmatmul.mubr.f32.gmra.mxu1 %v200_v60  ;;  %640 = vmatprep.mubr.f32.mxu0 %v203_v61  ;;  %v233_v60 = vld [vmem:[%s2623_s0 + $0x6d8] sm:$0xff] }
  0xfc   :  { %1025 = vmatprep.mubr.f32.mxu1 %v205_v62 }
  0xfe   :  { %641 = vmatmul.mubr.f32.gmra.mxu0 %v202_v63 }
  0xff   :  { %1026 = vmatmul.mubr.f32.gmra.mxu1 %v204_v1  ;;  %645 = vmatprep.mubr.f32.mxu0 %v207_v2 }
 0x100   :  { %1030 = vmatprep.mubr.f32.mxu1 %v209_v3  ;;  %v230_v3 = vld [vmem:[%s2623_s0 + $0x6c0] sm:$0xff] }
 0x102   :  { %v407_v8 = vpop.f32.mrf.mxu0  ;;  %646 = vmatmul.mubr.f32.gmra.mxu0 %v206_v4  ;;  %v232_v4 = vld [vmem:[%s2623_s0 + $0x6d0] sm:$0xff] }
 0x103   :  { %v792_v9 = vpop.f32.mrf.mxu1  ;;  %1031 = vmatmul.mubr.f32.gmra.mxu1 %v208_v5  ;;  %v408_v10 = vadd.f32 %v2115_v6, %v407_v8  ;;  %650 = vmatprep.mubr.f32.mxu0 %v211_v7  ;;  %v237_v8 = vld [vmem:[%s2623_s0 + $0x6f8] sm:$0xff] }
 0x104   :  { %1035 = vmatprep.mubr.f32.mxu1 %v213_v0  ;;  %v409_v13 = vpop.f32.mrf.mxu0  ;;  %v235_v0 = vld [vmem:[%s2623_s0 + $0x6e8] sm:$0xff] }
 0x105   :  { %v794_v14 = vpop.f32.mrf.mxu1  ;;  %v793_v17 = vadd.f32 %v792_v9, %v408_v10 }
 0x106   :  { %v412_v18 = vpop.f32.mrf.mxu0  ;;  %651 = vmatmul.mubr.f32.gmra.mxu0 %v210_v11  ;;  %v234_v14 = vld [vmem:[%s2623_s0 + $0x6e0] sm:$0xff] }
 0x107   :  { %v797_v19 = vpop.f32.mrf.mxu1  ;;  %1036 = vmatmul.mubr.f32.gmra.mxu1 %v212_v12  ;;  %v1111_v20 = vmax.f32 %v793_v17, 0.0  ;;  %v413_v21 = vadd.f32 %v2115_v6, %v412_v18  ;;  %655 = vmatprep.mubr.f32.mxu0 %v215_v15  ;;  %v236_v15 = vld [vmem:[%s2623_s0 + $0x6f0] sm:$0xff]  ;;  %v239_v18 = vld [vmem:[%s2623_s0 + $0x708] sm:$0xff] }
 0x108   :  { %1040 = vmatprep.mubr.f32.mxu1 %v217_v16  ;;  %v414_v24 = vpop.f32.mrf.mxu0 }
 0x109   :  { %v799_v25 = vpop.f32.mrf.mxu1  ;;  %1176 = vst.msk [vmem:[%s2625_s3] sm:$0xff] %vm1175_vm0, %v1111_v20  ;;  %v798_v28 = vadd.f32 %v797_v19, %v413_v21  ;;  %v241_v19 = vld [vmem:[%s2623_s0 + $0x718] sm:$0xff] }
 0x10a   :  { %v417_v29 = vpop.f32.mrf.mxu0  ;;  %656 = vmatmul.mubr.f32.gmra.mxu0 %v214_v22  ;;  %v238_v25 = vld [vmem:[%s2623_s0 + $0x700] sm:$0xff] }
 0x10b   :  { %v802_v30 = vpop.f32.mrf.mxu1  ;;  %1041 = vmatmul.mubr.f32.gmra.mxu1 %v216_v23  ;;  %v1112_v31 = vmax.f32 %v798_v28, 0.0  ;;  %v418_v32 = vadd.f32 %v2115_v6, %v417_v29  ;;  %660 = vmatprep.mubr.f32.mxu0 %v219_v26  ;;  %v240_v26 = vld [vmem:[%s2623_s0 + $0x710] sm:$0xff]  ;;  %v243_v29 = vld [vmem:[%s2623_s0 + $0x728] sm:$0xff] }
 0x10c   :  { %1045 = vmatprep.mubr.f32.mxu1 %v221_v27  ;;  %v419_v35 = vpop.f32.mrf.mxu0 }
 0x10d   :  { %v804_v36 = vpop.f32.mrf.mxu1  ;;  %1177 = vst.msk [vmem:[%s2625_s3 + $0x8] sm:$0xff] %vm1175_vm0, %v1112_v31  ;;  %v803_v39 = vadd.f32 %v802_v30, %v418_v32  ;;  %v245_v30 = vld [vmem:[%s2623_s0 + $0x738] sm:$0xff] }
 0x10e   :  { %v422_v40 = vpop.f32.mrf.mxu0  ;;  %661 = vmatmul.mubr.f32.gmra.mxu0 %v218_v33  ;;  %v242_v36 = vld [vmem:[%s2623_s0 + $0x720] sm:$0xff] }
 0x10f   :  { %v807_v41 = vpop.f32.mrf.mxu1  ;;  %1046 = vmatmul.mubr.f32.gmra.mxu1 %v220_v34  ;;  %v1113_v42 = vmax.f32 %v803_v39, 0.0  ;;  %v423_v43 = vadd.f32 %v2115_v6, %v422_v40  ;;  %665 = vmatprep.mubr.f32.mxu0 %v223_v37  ;;  %v244_v37 = vld [vmem:[%s2623_s0 + $0x730] sm:$0xff]  ;;  %v247_v40 = vld [vmem:[%s2623_s0 + $0x748] sm:$0xff] }
 0x110   :  { %1050 = vmatprep.mubr.f32.mxu1 %v225_v38  ;;  %v424_v46 = vpop.f32.mrf.mxu0 }
 0x111   :  { %v809_v47 = vpop.f32.mrf.mxu1  ;;  %1178 = vst.msk [vmem:[%s2625_s3 + $0x10] sm:$0xff] %vm1175_vm0, %v1113_v42  ;;  %v808_v50 = vadd.f32 %v807_v41, %v423_v43  ;;  %v249_v41 = vld [vmem:[%s2623_s0 + $0x758] sm:$0xff] }
 0x112   :  { %v427_v51 = vpop.f32.mrf.mxu0  ;;  %666 = vmatmul.mubr.f32.gmra.mxu0 %v222_v44  ;;  %v246_v47 = vld [vmem:[%s2623_s0 + $0x740] sm:$0xff] }
 0x113   :  { %v812_v52 = vpop.f32.mrf.mxu1  ;;  %1051 = vmatmul.mubr.f32.gmra.mxu1 %v224_v45  ;;  %v1114_v53 = vmax.f32 %v808_v50, 0.0  ;;  %v428_v54 = vadd.f32 %v2115_v6, %v427_v51  ;;  %670 = vmatprep.mubr.f32.mxu0 %v227_v48  ;;  %v248_v48 = vld [vmem:[%s2623_s0 + $0x750] sm:$0xff]  ;;  %v251_v51 = vld [vmem:[%s2623_s0 + $0x768] sm:$0xff] }
 0x114   :  { %1055 = vmatprep.mubr.f32.mxu1 %v229_v49  ;;  %v429_v57 = vpop.f32.mrf.mxu0 }
 0x115   :  { %v814_v58 = vpop.f32.mrf.mxu1  ;;  %1179 = vst.msk [vmem:[%s2625_s3 + $0x18] sm:$0xff] %vm1175_vm0, %v1114_v53  ;;  %v813_v61 = vadd.f32 %v812_v52, %v428_v54  ;;  %v253_v52 = vld [vmem:[%s2623_s0 + $0x778] sm:$0xff] }
 0x116   :  { %v432_v62 = vpop.f32.mrf.mxu0  ;;  %671 = vmatmul.mubr.f32.gmra.mxu0 %v226_v55  ;;  %v250_v58 = vld [vmem:[%s2623_s0 + $0x760] sm:$0xff] }
 0x117   :  { %v817_v63 = vpop.f32.mrf.mxu1  ;;  %1056 = vmatmul.mubr.f32.gmra.mxu1 %v228_v56  ;;  %v1115_v1 = vmax.f32 %v813_v61, 0.0  ;;  %v433_v2 = vadd.f32 %v2115_v6, %v432_v62  ;;  %675 = vmatprep.mubr.f32.mxu0 %v231_v59  ;;  %v252_v59 = vld [vmem:[%s2623_s0 + $0x770] sm:$0xff]  ;;  %v255_v62 = vld [vmem:[%s2623_s0 + $0x788] sm:$0xff] }
 0x118   :  { %1060 = vmatprep.mubr.f32.mxu1 %v233_v60  ;;  %v434_v5 = vpop.f32.mrf.mxu0 }
 0x119   :  { %v819_v7 = vpop.f32.mrf.mxu1  ;;  %1180 = vst.msk [vmem:[%s2625_s3 + $0x20] sm:$0xff] %vm1175_vm0, %v1115_v1  ;;  %v818_v9 = vadd.f32 %v817_v63, %v433_v2  ;;  %v257_v63 = vld [vmem:[%s2623_s0 + $0x798] sm:$0xff] }
 0x11a   :  { %v437_v10 = vpop.f32.mrf.mxu0  ;;  %676 = vmatmul.mubr.f32.gmra.mxu0 %v230_v3  ;;  %v254_v7 = vld [vmem:[%s2623_s0 + $0x780] sm:$0xff] }
 0x11b   :  { %v822_v11 = vpop.f32.mrf.mxu1  ;;  %1061 = vmatmul.mubr.f32.gmra.mxu1 %v232_v4  ;;  %v1116_v12 = vmax.f32 %v818_v9, 0.0  ;;  %v438_v13 = vadd.f32 %v2115_v6, %v437_v10  ;;  %680 = vmatprep.mubr.f32.mxu0 %v235_v0  ;;  %v256_v0 = vld [vmem:[%s2623_s0 + $0x790] sm:$0xff]  ;;  %v259_v10 = vld [vmem:[%s2623_s0 + $0x7a8] sm:$0xff] }
 0x11c   :  { %1065 = vmatprep.mubr.f32.mxu1 %v237_v8  ;;  %v439_v16 = vpop.f32.mrf.mxu0 }
 0x11d   :  { %v824_v17 = vpop.f32.mrf.mxu1  ;;  %1181 = vst.msk [vmem:[%s2625_s3 + $0x28] sm:$0xff] %vm1175_vm0, %v1116_v12  ;;  %v823_v20 = vadd.f32 %v822_v11, %v438_v13  ;;  %v261_v11 = vld [vmem:[%s2623_s0 + $0x7b8] sm:$0xff] }
 0x11e   :  { %v442_v21 = vpop.f32.mrf.mxu0  ;;  %681 = vmatmul.mubr.f32.gmra.mxu0 %v234_v14  ;;  %v258_v17 = vld [vmem:[%s2623_s0 + $0x7a0] sm:$0xff] }
 0x11f   :  { %v827_v22 = vpop.f32.mrf.mxu1  ;;  %1066 = vmatmul.mubr.f32.gmra.mxu1 %v236_v15  ;;  %v1117_v23 = vmax.f32 %v823_v20, 0.0  ;;  %v443_v24 = vadd.f32 %v2115_v6, %v442_v21  ;;  %685 = vmatprep.mubr.f32.mxu0 %v239_v18  ;;  %v260_v18 = vld [vmem:[%s2623_s0 + $0x7b0] sm:$0xff]  ;;  %v263_v21 = vld [vmem:[%s2623_s0 + $0x7c8] sm:$0xff] }
 0x120   :  { %1070 = vmatprep.mubr.f32.mxu1 %v241_v19  ;;  %v444_v27 = vpop.f32.mrf.mxu0 }
 0x121   :  { %v829_v28 = vpop.f32.mrf.mxu1  ;;  %1182 = vst.msk [vmem:[%s2625_s3 + $0x30] sm:$0xff] %vm1175_vm0, %v1117_v23  ;;  %v828_v31 = vadd.f32 %v827_v22, %v443_v24  ;;  %v265_v22 = vld [vmem:[%s2623_s0 + $0x7d8] sm:$0xff] }
 0x122   :  { %v447_v32 = vpop.f32.mrf.mxu0  ;;  %686 = vmatmul.mubr.f32.gmra.mxu0 %v238_v25  ;;  %v262_v28 = vld [vmem:[%s2623_s0 + $0x7c0] sm:$0xff] }
 0x123   :  { %v832_v33 = vpop.f32.mrf.mxu1  ;;  %1071 = vmatmul.mubr.f32.gmra.mxu1 %v240_v26  ;;  %v1118_v34 = vmax.f32 %v828_v31, 0.0  ;;  %v448_v35 = vadd.f32 %v2115_v6, %v447_v32  ;;  %690 = vmatprep.mubr.f32.mxu0 %v243_v29  ;;  %v264_v29 = vld [vmem:[%s2623_s0 + $0x7d0] sm:$0xff]  ;;  %v267_v32 = vld [vmem:[%s2623_s0 + $0x7e8] sm:$0xff] }
 0x124   :  { %1075 = vmatprep.mubr.f32.mxu1 %v245_v30  ;;  %v449_v38 = vpop.f32.mrf.mxu0 }
 0x125   :  { %v834_v39 = vpop.f32.mrf.mxu1  ;;  %1183 = vst.msk [vmem:[%s2625_s3 + $0x38] sm:$0xff] %vm1175_vm0, %v1118_v34  ;;  %v833_v42 = vadd.f32 %v832_v33, %v448_v35  ;;  %v269_v33 = vld [vmem:[%s2623_s0 + $0x7f8] sm:$0xff] }
 0x126   :  { %v452_v43 = vpop.f32.mrf.mxu0  ;;  %691 = vmatmul.mubr.f32.gmra.mxu0 %v242_v36  ;;  %v266_v39 = vld [vmem:[%s2623_s0 + $0x7e0] sm:$0xff] }
 0x127   :  { %v837_v44 = vpop.f32.mrf.mxu1  ;;  %1076 = vmatmul.mubr.f32.gmra.mxu1 %v244_v37  ;;  %v1119_v45 = vmax.f32 %v833_v42, 0.0  ;;  %v453_v46 = vadd.f32 %v2115_v6, %v452_v43  ;;  %695 = vmatprep.mubr.f32.mxu0 %v247_v40  ;;  %v268_v40 = vld [vmem:[%s2623_s0 + $0x7f0] sm:$0xff] }
 0x128   :  { %1080 = vmatprep.mubr.f32.mxu1 %v249_v41  ;;  %v454_v49 = vpop.f32.mrf.mxu0 }
 0x129   :  { %v839_v50 = vpop.f32.mrf.mxu1  ;;  %1184 = vst.msk [vmem:[%s2625_s3 + $0x40] sm:$0xff] %vm1175_vm0, %v1119_v45  ;;  %v838_v53 = vadd.f32 %v837_v44, %v453_v46 }
 0x12a   :  { %v457_v54 = vpop.f32.mrf.mxu0  ;;  %696 = vmatmul.mubr.f32.gmra.mxu0 %v246_v47 }
 0x12b   :  { %v842_v55 = vpop.f32.mrf.mxu1  ;;  %1081 = vmatmul.mubr.f32.gmra.mxu1 %v248_v48  ;;  %v1120_v56 = vmax.f32 %v838_v53, 0.0  ;;  %v458_v57 = vadd.f32 %v2115_v6, %v457_v54  ;;  %700 = vmatprep.mubr.f32.mxu0 %v251_v51 }
 0x12c   :  { %1085 = vmatprep.mubr.f32.mxu1 %v253_v52  ;;  %v459_v60 = vpop.f32.mrf.mxu0 }
 0x12d   :  { %v844_v61 = vpop.f32.mrf.mxu1  ;;  %1185 = vst.msk [vmem:[%s2625_s3 + $0x48] sm:$0xff] %vm1175_vm0, %v1120_v56  ;;  %v843_v1 = vadd.f32 %v842_v55, %v458_v57 }
 0x12e   :  { %v462_v2 = vpop.f32.mrf.mxu0  ;;  %701 = vmatmul.mubr.f32.gmra.mxu0 %v250_v58 }
 0x12f   :  { %v847_v3 = vpop.f32.mrf.mxu1  ;;  %1086 = vmatmul.mubr.f32.gmra.mxu1 %v252_v59  ;;  %v1121_v4 = vmax.f32 %v843_v1, 0.0  ;;  %v463_v5 = vadd.f32 %v2115_v6, %v462_v2  ;;  %705 = vmatprep.mubr.f32.mxu0 %v255_v62 }
 0x130   :  { %1090 = vmatprep.mubr.f32.mxu1 %v257_v63  ;;  %v464_v8 = vpop.f32.mrf.mxu0 }
 0x131   :  { %v849_v9 = vpop.f32.mrf.mxu1  ;;  %1186 = vst.msk [vmem:[%s2625_s3 + $0x50] sm:$0xff] %vm1175_vm0, %v1121_v4  ;;  %v848_v12 = vadd.f32 %v847_v3, %v463_v5 }
 0x132   :  { %v467_v13 = vpop.f32.mrf.mxu0  ;;  %706 = vmatmul.mubr.f32.gmra.mxu0 %v254_v7 }
 0x133   :  { %v852_v14 = vpop.f32.mrf.mxu1  ;;  %1091 = vmatmul.mubr.f32.gmra.mxu1 %v256_v0  ;;  %v1122_v15 = vmax.f32 %v848_v12, 0.0  ;;  %v468_v16 = vadd.f32 %v2115_v6, %v467_v13  ;;  %710 = vmatprep.mubr.f32.mxu0 %v259_v10 }
 0x134   :  { %1095 = vmatprep.mubr.f32.mxu1 %v261_v11  ;;  %v469_v19 = vpop.f32.mrf.mxu0 }
 0x135   :  { %v854_v20 = vpop.f32.mrf.mxu1  ;;  %1187 = vst.msk [vmem:[%s2625_s3 + $0x58] sm:$0xff] %vm1175_vm0, %v1122_v15  ;;  %v853_v23 = vadd.f32 %v852_v14, %v468_v16 }
 0x136   :  { %v472_v24 = vpop.f32.mrf.mxu0  ;;  %711 = vmatmul.mubr.f32.gmra.mxu0 %v258_v17 }
 0x137   :  { %v857_v25 = vpop.f32.mrf.mxu1  ;;  %1096 = vmatmul.mubr.f32.gmra.mxu1 %v260_v18  ;;  %v1123_v26 = vmax.f32 %v853_v23, 0.0  ;;  %v473_v27 = vadd.f32 %v2115_v6, %v472_v24  ;;  %715 = vmatprep.mubr.f32.mxu0 %v263_v21 }
 0x138   :  { %1100 = vmatprep.mubr.f32.mxu1 %v265_v22  ;;  %v474_v30 = vpop.f32.mrf.mxu0 }
 0x139   :  { %v859_v31 = vpop.f32.mrf.mxu1  ;;  %1188 = vst.msk [vmem:[%s2625_s3 + $0x60] sm:$0xff] %vm1175_vm0, %v1123_v26  ;;  %v858_v34 = vadd.f32 %v857_v25, %v473_v27 }
 0x13a   :  { %v477_v35 = vpop.f32.mrf.mxu0  ;;  %716 = vmatmul.mubr.f32.gmra.mxu0 %v262_v28 }
 0x13b   :  { %v862_v36 = vpop.f32.mrf.mxu1  ;;  %1101 = vmatmul.mubr.f32.gmra.mxu1 %v264_v29  ;;  %v1124_v37 = vmax.f32 %v858_v34, 0.0  ;;  %v478_v38 = vadd.f32 %v2115_v6, %v477_v35  ;;  %720 = vmatprep.mubr.f32.mxu0 %v267_v32 }
 0x13c   :  { %1105 = vmatprep.mubr.f32.mxu1 %v269_v33  ;;  %v479_v41 = vpop.f32.mrf.mxu0 }
 0x13d   :  { %v864_v42 = vpop.f32.mrf.mxu1  ;;  %1189 = vst.msk [vmem:[%s2625_s3 + $0x68] sm:$0xff] %vm1175_vm0, %v1124_v37  ;;  %v863_v43 = vadd.f32 %v862_v36, %v478_v38 }
 0x13e   :  { %v482_v44 = vpop.f32.mrf.mxu0  ;;  %721 = vmatmul.mubr.f32.gmra.mxu0 %v266_v39 }
 0x13f   :  { %v867_v45 = vpop.f32.mrf.mxu1  ;;  %1106 = vmatmul.mubr.f32.gmra.mxu1 %v268_v40  ;;  %v1125_v46 = vmax.f32 %v863_v43, 0.0  ;;  %v483_v47 = vadd.f32 %v2115_v6, %v482_v44 }
 0x140   :  { %v484_v48 = vpop.f32.mrf.mxu0 }
 0x141   :  { %v869_v49 = vpop.f32.mrf.mxu1  ;;  %1190 = vst.msk [vmem:[%s2625_s3 + $0x70] sm:$0xff] %vm1175_vm0, %v1125_v46  ;;  %v868_v50 = vadd.f32 %v867_v45, %v483_v47 }
 0x142   :  { %v487_v51 = vpop.f32.mrf.mxu0 }
 0x143   :  { %v872_v52 = vpop.f32.mrf.mxu1  ;;  %v1126_v53 = vmax.f32 %v868_v50, 0.0  ;;  %v488_v54 = vadd.f32 %v2115_v6, %v487_v51 }
 0x144   :  { %v489_v55 = vpop.f32.mrf.mxu0 }
 0x145   :  { %v874_v56 = vpop.f32.mrf.mxu1  ;;  %1191 = vst.msk [vmem:[%s2625_s3 + $0x78] sm:$0xff] %vm1175_vm0, %v1126_v53  ;;  %v873_v57 = vadd.f32 %v872_v52, %v488_v54 }
 0x146   :  { %v492_v58 = vpop.f32.mrf.mxu0 }
 0x147   :  { %v877_v59 = vpop.f32.mrf.mxu1  ;;  %v1127_v60 = vmax.f32 %v873_v57, 0.0  ;;  %v493_v61 = vadd.f32 %v2115_v6, %v492_v58 }
 0x148   :  { %v494_v62 = vpop.f32.mrf.mxu0 }
 0x149   :  { %v879_v63 = vpop.f32.mrf.mxu1  ;;  %1192 = vst.msk [vmem:[%s2625_s3 + $0x80] sm:$0xff] %vm1175_vm0, %v1127_v60  ;;  %v878_v1 = vadd.f32 %v877_v59, %v493_v61 }
 0x14a   :  { %v497_v2 = vpop.f32.mrf.mxu0 }
 0x14b   :  { %v882_v3 = vpop.f32.mrf.mxu1  ;;  %v1128_v4 = vmax.f32 %v878_v1, 0.0  ;;  %v498_v5 = vadd.f32 %v2115_v6, %v497_v2 }
 0x14c   :  { %v499_v7 = vpop.f32.mrf.mxu0 }
 0x14d   :  { %v884_v0 = vpop.f32.mrf.mxu1  ;;  %1193 = vst.msk [vmem:[%s2625_s3 + $0x88] sm:$0xff] %vm1175_vm0, %v1128_v4  ;;  %v883_v8 = vadd.f32 %v882_v3, %v498_v5 }
 0x14e   :  { %v502_v9 = vpop.f32.mrf.mxu0 }
 0x14f   :  { %v887_v10 = vpop.f32.mrf.mxu1  ;;  %v1129_v11 = vmax.f32 %v883_v8, 0.0  ;;  %v503_v12 = vadd.f32 %v2115_v6, %v502_v9 }
 0x150   :  { %v504_v13 = vpop.f32.mrf.mxu0 }
 0x151   :  { %v889_v14 = vpop.f32.mrf.mxu1  ;;  %1194 = vst.msk [vmem:[%s2625_s3 + $0x90] sm:$0xff] %vm1175_vm0, %v1129_v11  ;;  %v888_v15 = vadd.f32 %v887_v10, %v503_v12 }
 0x152   :  { %v507_v16 = vpop.f32.mrf.mxu0 }
 0x153   :  { %v892_v17 = vpop.f32.mrf.mxu1  ;;  %v1130_v18 = vmax.f32 %v888_v15, 0.0  ;;  %v508_v19 = vadd.f32 %v2115_v6, %v507_v16 }
 0x154   :  { %v509_v20 = vpop.f32.mrf.mxu0 }
 0x155   :  { %v894_v21 = vpop.f32.mrf.mxu1  ;;  %1195 = vst.msk [vmem:[%s2625_s3 + $0x98] sm:$0xff] %vm1175_vm0, %v1130_v18  ;;  %v893_v22 = vadd.f32 %v892_v17, %v508_v19 }
 0x156   :  { %v512_v23 = vpop.f32.mrf.mxu0 }
 0x157   :  { %v897_v24 = vpop.f32.mrf.mxu1  ;;  %v1131_v25 = vmax.f32 %v893_v22, 0.0  ;;  %v513_v26 = vadd.f32 %v2115_v6, %v512_v23 }
 0x158   :  { %v514_v27 = vpop.f32.mrf.mxu0 }
 0x159   :  { %v899_v28 = vpop.f32.mrf.mxu1  ;;  %1196 = vst.msk [vmem:[%s2625_s3 + $0xa0] sm:$0xff] %vm1175_vm0, %v1131_v25  ;;  %v898_v29 = vadd.f32 %v897_v24, %v513_v26 }
 0x15a   :  { %v517_v30 = vpop.f32.mrf.mxu0 }
 0x15b   :  { %v902_v31 = vpop.f32.mrf.mxu1  ;;  %v1132_v32 = vmax.f32 %v898_v29, 0.0  ;;  %v518_v33 = vadd.f32 %v2115_v6, %v517_v30 }
 0x15c   :  { %v519_v34 = vpop.f32.mrf.mxu0 }
 0x15d   :  { %v904_v35 = vpop.f32.mrf.mxu1  ;;  %1197 = vst.msk [vmem:[%s2625_s3 + $0xa8] sm:$0xff] %vm1175_vm0, %v1132_v32  ;;  %v903_v36 = vadd.f32 %v902_v31, %v518_v33 }
 0x15e   :  { %v522_v37 = vpop.f32.mrf.mxu0 }
 0x15f   :  { %v907_v38 = vpop.f32.mrf.mxu1  ;;  %v1133_v39 = vmax.f32 %v903_v36, 0.0  ;;  %v523_v40 = vadd.f32 %v2115_v6, %v522_v37 }
 0x160   :  { %v524_v41 = vpop.f32.mrf.mxu0 }
 0x161   :  { %v909_v42 = vpop.f32.mrf.mxu1  ;;  %1198 = vst.msk [vmem:[%s2625_s3 + $0xb0] sm:$0xff] %vm1175_vm0, %v1133_v39  ;;  %v908_v43 = vadd.f32 %v907_v38, %v523_v40 }
 0x162   :  { %v527_v44 = vpop.f32.mrf.mxu0 }
 0x163   :  { %v912_v45 = vpop.f32.mrf.mxu1  ;;  %v1134_v46 = vmax.f32 %v908_v43, 0.0  ;;  %v528_v47 = vadd.f32 %v2115_v6, %v527_v44 }
 0x164   :  { %v529_v48 = vpop.f32.mrf.mxu0 }
 0x165   :  { %v914_v49 = vpop.f32.mrf.mxu1  ;;  %1199 = vst.msk [vmem:[%s2625_s3 + $0xb8] sm:$0xff] %vm1175_vm0, %v1134_v46  ;;  %v913_v50 = vadd.f32 %v912_v45, %v528_v47 }
 0x166   :  { %v532_v51 = vpop.f32.mrf.mxu0 }
 0x167   :  { %v917_v52 = vpop.f32.mrf.mxu1  ;;  %v1135_v53 = vmax.f32 %v913_v50, 0.0  ;;  %v533_v54 = vadd.f32 %v2115_v6, %v532_v51 }
 0x168   :  { %v534_v55 = vpop.f32.mrf.mxu0 }
 0x169   :  { %v919_v56 = vpop.f32.mrf.mxu1  ;;  %1200 = vst.msk [vmem:[%s2625_s3 + $0xc0] sm:$0xff] %vm1175_vm0, %v1135_v53  ;;  %v918_v57 = vadd.f32 %v917_v52, %v533_v54 }
 0x16a   :  { %v537_v58 = vpop.f32.mrf.mxu0 }
 0x16b   :  { %v922_v59 = vpop.f32.mrf.mxu1  ;;  %v1136_v60 = vmax.f32 %v918_v57, 0.0  ;;  %v538_v61 = vadd.f32 %v2115_v6, %v537_v58 }
 0x16c   :  { %v539_v62 = vpop.f32.mrf.mxu0 }
 0x16d   :  { %v924_v63 = vpop.f32.mrf.mxu1  ;;  %1201 = vst.msk [vmem:[%s2625_s3 + $0xc8] sm:$0xff] %vm1175_vm0, %v1136_v60  ;;  %v923_v1 = vadd.f32 %v922_v59, %v538_v61 }
 0x16e   :  { %v542_v2 = vpop.f32.mrf.mxu0 }
 0x16f   :  { %v927_v3 = vpop.f32.mrf.mxu1  ;;  %v1137_v4 = vmax.f32 %v923_v1, 0.0  ;;  %v543_v5 = vadd.f32 %v2115_v6, %v542_v2 }
 0x170   :  { %v544_v7 = vpop.f32.mrf.mxu0 }
 0x171   :  { %v929_v0 = vpop.f32.mrf.mxu1  ;;  %1202 = vst.msk [vmem:[%s2625_s3 + $0xd0] sm:$0xff] %vm1175_vm0, %v1137_v4  ;;  %v928_v8 = vadd.f32 %v927_v3, %v543_v5 }
 0x172   :  { %v547_v9 = vpop.f32.mrf.mxu0 }
 0x173   :  { %v932_v10 = vpop.f32.mrf.mxu1  ;;  %v1138_v11 = vmax.f32 %v928_v8, 0.0  ;;  %v548_v12 = vadd.f32 %v2115_v6, %v547_v9 }
 0x174   :  { %v549_v13 = vpop.f32.mrf.mxu0 }
 0x175   :  { %v934_v14 = vpop.f32.mrf.mxu1  ;;  %1203 = vst.msk [vmem:[%s2625_s3 + $0xd8] sm:$0xff] %vm1175_vm0, %v1138_v11  ;;  %v933_v15 = vadd.f32 %v932_v10, %v548_v12 }
 0x176   :  { %v552_v16 = vpop.f32.mrf.mxu0 }
 0x177   :  { %v937_v17 = vpop.f32.mrf.mxu1  ;;  %v1139_v18 = vmax.f32 %v933_v15, 0.0  ;;  %v553_v19 = vadd.f32 %v2115_v6, %v552_v16 }
 0x178   :  { %v554_v20 = vpop.f32.mrf.mxu0 }
 0x179   :  { %v939_v21 = vpop.f32.mrf.mxu1  ;;  %1204 = vst.msk [vmem:[%s2625_s3 + $0xe0] sm:$0xff] %vm1175_vm0, %v1139_v18  ;;  %v938_v22 = vadd.f32 %v937_v17, %v553_v19 }
 0x17a   :  { %v557_v23 = vpop.f32.mrf.mxu0 }
 0x17b   :  { %v942_v24 = vpop.f32.mrf.mxu1  ;;  %v1140_v25 = vmax.f32 %v938_v22, 0.0  ;;  %v558_v26 = vadd.f32 %v2115_v6, %v557_v23 }
 0x17c   :  { %v559_v27 = vpop.f32.mrf.mxu0 }
 0x17d   :  { %v944_v28 = vpop.f32.mrf.mxu1  ;;  %1205 = vst.msk [vmem:[%s2625_s3 + $0xe8] sm:$0xff] %vm1175_vm0, %v1140_v25  ;;  %v943_v29 = vadd.f32 %v942_v24, %v558_v26 }
 0x17e   :  { %v562_v30 = vpop.f32.mrf.mxu0 }
 0x17f   :  { %v947_v31 = vpop.f32.mrf.mxu1  ;;  %v1141_v32 = vmax.f32 %v943_v29, 0.0  ;;  %v563_v33 = vadd.f32 %v2115_v6, %v562_v30 }
 0x180   :  { %v564_v34 = vpop.f32.mrf.mxu0 }
 0x181   :  { %v949_v35 = vpop.f32.mrf.mxu1  ;;  %1206 = vst.msk [vmem:[%s2625_s3 + $0xf0] sm:$0xff] %vm1175_vm0, %v1141_v32  ;;  %v948_v36 = vadd.f32 %v947_v31, %v563_v33 }
 0x182   :  { %v567_v37 = vpop.f32.mrf.mxu0 }
 0x183   :  { %v952_v38 = vpop.f32.mrf.mxu1  ;;  %v1142_v39 = vmax.f32 %v948_v36, 0.0  ;;  %v568_v40 = vadd.f32 %v2115_v6, %v567_v37 }
 0x184   :  { %v569_v41 = vpop.f32.mrf.mxu0 }
 0x185   :  { %v954_v42 = vpop.f32.mrf.mxu1  ;;  %1207 = vst.msk [vmem:[%s2625_s3 + $0xf8] sm:$0xff] %vm1175_vm0, %v1142_v39  ;;  %v953_v43 = vadd.f32 %v952_v38, %v568_v40 }
 0x186   :  { %v572_v44 = vpop.f32.mrf.mxu0 }
 0x187   :  { %v957_v45 = vpop.f32.mrf.mxu1  ;;  %v1143_v46 = vmax.f32 %v953_v43, 0.0  ;;  %v573_v47 = vadd.f32 %v2115_v6, %v572_v44 }
 0x188   :  { %v574_v48 = vpop.f32.mrf.mxu0 }
 0x189   :  { %v959_v49 = vpop.f32.mrf.mxu1  ;;  %1208 = vst.msk [vmem:[%s2625_s3 + $0x100] sm:$0xff] %vm1175_vm0, %v1143_v46  ;;  %v958_v50 = vadd.f32 %v957_v45, %v573_v47 }
 0x18a   :  { %v577_v51 = vpop.f32.mrf.mxu0 }
 0x18b   :  { %v962_v52 = vpop.f32.mrf.mxu1  ;;  %v1144_v53 = vmax.f32 %v958_v50, 0.0  ;;  %v578_v54 = vadd.f32 %v2115_v6, %v577_v51 }
 0x18c   :  { %v579_v55 = vpop.f32.mrf.mxu0 }
 0x18d   :  { %v964_v56 = vpop.f32.mrf.mxu1  ;;  %1209 = vst.msk [vmem:[%s2625_s3 + $0x108] sm:$0xff] %vm1175_vm0, %v1144_v53  ;;  %v963_v57 = vadd.f32 %v962_v52, %v578_v54 }
 0x18e   :  { %v582_v58 = vpop.f32.mrf.mxu0 }
 0x18f   :  { %v967_v59 = vpop.f32.mrf.mxu1  ;;  %v1145_v60 = vmax.f32 %v963_v57, 0.0  ;;  %v583_v61 = vadd.f32 %v2115_v6, %v582_v58 }
 0x190   :  { %v584_v62 = vpop.f32.mrf.mxu0 }
 0x191   :  { %v969_v63 = vpop.f32.mrf.mxu1  ;;  %1210 = vst.msk [vmem:[%s2625_s3 + $0x110] sm:$0xff] %vm1175_vm0, %v1145_v60  ;;  %v968_v1 = vadd.f32 %v967_v59, %v583_v61 }
 0x192   :  { %v587_v2 = vpop.f32.mrf.mxu0 }
 0x193   :  { %v972_v3 = vpop.f32.mrf.mxu1  ;;  %v1146_v4 = vmax.f32 %v968_v1, 0.0  ;;  %v588_v5 = vadd.f32 %v2115_v6, %v587_v2 }
 0x194   :  { %v589_v7 = vpop.f32.mrf.mxu0 }
 0x195   :  { %v974_v0 = vpop.f32.mrf.mxu1  ;;  %1211 = vst.msk [vmem:[%s2625_s3 + $0x118] sm:$0xff] %vm1175_vm0, %v1146_v4  ;;  %v973_v8 = vadd.f32 %v972_v3, %v588_v5 }
 0x196   :  { %v592_v9 = vpop.f32.mrf.mxu0 }
 0x197   :  { %v977_v10 = vpop.f32.mrf.mxu1  ;;  %v1147_v11 = vmax.f32 %v973_v8, 0.0  ;;  %v593_v12 = vadd.f32 %v2115_v6, %v592_v9 }
 0x198   :  { %v594_v13 = vpop.f32.mrf.mxu0 }
 0x199   :  { %v979_v14 = vpop.f32.mrf.mxu1  ;;  %1212 = vst.msk [vmem:[%s2625_s3 + $0x120] sm:$0xff] %vm1175_vm0, %v1147_v11  ;;  %v978_v15 = vadd.f32 %v977_v10, %v593_v12 }
 0x19a   :  { %v597_v16 = vpop.f32.mrf.mxu0 }
 0x19b   :  { %v982_v17 = vpop.f32.mrf.mxu1  ;;  %v1148_v18 = vmax.f32 %v978_v15, 0.0  ;;  %v598_v19 = vadd.f32 %v2115_v6, %v597_v16 }
 0x19c   :  { %v599_v20 = vpop.f32.mrf.mxu0 }
 0x19d   :  { %v984_v21 = vpop.f32.mrf.mxu1  ;;  %1213 = vst.msk [vmem:[%s2625_s3 + $0x128] sm:$0xff] %vm1175_vm0, %v1148_v18  ;;  %v983_v22 = vadd.f32 %v982_v17, %v598_v19 }
 0x19e   :  { %v602_v23 = vpop.f32.mrf.mxu0 }
 0x19f   :  { %v987_v24 = vpop.f32.mrf.mxu1  ;;  %v1149_v25 = vmax.f32 %v983_v22, 0.0  ;;  %v603_v26 = vadd.f32 %v2115_v6, %v602_v23 }
 0x1a0   :  { %v604_v27 = vpop.f32.mrf.mxu0 }
 0x1a1   :  { %v989_v28 = vpop.f32.mrf.mxu1  ;;  %1214 = vst.msk [vmem:[%s2625_s3 + $0x130] sm:$0xff] %vm1175_vm0, %v1149_v25  ;;  %v988_v29 = vadd.f32 %v987_v24, %v603_v26 }
 0x1a2   :  { %v607_v30 = vpop.f32.mrf.mxu0 }
 0x1a3   :  { %v992_v31 = vpop.f32.mrf.mxu1  ;;  %v1150_v32 = vmax.f32 %v988_v29, 0.0  ;;  %v608_v33 = vadd.f32 %v2115_v6, %v607_v30 }
 0x1a4   :  { %v609_v34 = vpop.f32.mrf.mxu0 }
 0x1a5   :  { %v994_v35 = vpop.f32.mrf.mxu1  ;;  %1215 = vst.msk [vmem:[%s2625_s3 + $0x138] sm:$0xff] %vm1175_vm0, %v1150_v32  ;;  %v993_v36 = vadd.f32 %v992_v31, %v608_v33  ;;  %v2541_v33 = vld [vmem:[%s2624_s2] ss:$0 sm:$0xff] }
 0x1a6   :  { %v612_v37 = vpop.f32.mrf.mxu0 }
 0x1a7   :  { %v997_v38 = vpop.f32.mrf.mxu1  ;;  %v1151_v39 = vmax.f32 %v993_v36, 0.0  ;;  %v613_v40 = vadd.f32 %v2115_v6, %v612_v37 }
 0x1a8   :  { %v614_v41 = vpop.f32.mrf.mxu0 }
 0x1a9   :  { %v999_v42 = vpop.f32.mrf.mxu1  ;;  %1216 = vst.msk [vmem:[%s2625_s3 + $0x140] sm:$0xff] %vm1175_vm0, %v1151_v39  ;;  %v998_v43 = vadd.f32 %v997_v38, %v613_v40 }
 0x1aa   :  { %v617_v44 = vpop.f32.mrf.mxu0 }
 0x1ab   :  { %v1002_v45 = vpop.f32.mrf.mxu1  ;;  %v1152_v46 = vmax.f32 %v998_v43, 0.0  ;;  %v618_v47 = vadd.f32 %v2115_v6, %v617_v44 }
 0x1ac   :  { %v619_v48 = vpop.f32.mrf.mxu0 }
 0x1ad   :  { %v1004_v49 = vpop.f32.mrf.mxu1  ;;  %1217 = vst.msk [vmem:[%s2625_s3 + $0x148] sm:$0xff] %vm1175_vm0, %v1152_v46  ;;  %v1003_v50 = vadd.f32 %v1002_v45, %v618_v47 }
 0x1ae   :  { %v622_v51 = vpop.f32.mrf.mxu0 }
 0x1af   :  { %v1007_v52 = vpop.f32.mrf.mxu1  ;;  %v1153_v53 = vmax.f32 %v1003_v50, 0.0  ;;  %v623_v54 = vadd.f32 %v2115_v6, %v622_v51 }
 0x1b0   :  { %v624_v55 = vpop.f32.mrf.mxu0 }
 0x1b1   :  { %v1009_v56 = vpop.f32.mrf.mxu1  ;;  %1218 = vst.msk [vmem:[%s2625_s3 + $0x150] sm:$0xff] %vm1175_vm0, %v1153_v53  ;;  %v1008_v57 = vadd.f32 %v1007_v52, %v623_v54 }
 0x1b2   :  { %v627_v58 = vpop.f32.mrf.mxu0 }
 0x1b3   :  { %v1012_v59 = vpop.f32.mrf.mxu1  ;;  %v1154_v60 = vmax.f32 %v1008_v57, 0.0  ;;  %v628_v61 = vadd.f32 %v2115_v6, %v627_v58 }
 0x1b4   :  { %v629_v62 = vpop.f32.mrf.mxu0 }
 0x1b5   :  { %v1014_v63 = vpop.f32.mrf.mxu1  ;;  %1219 = vst.msk [vmem:[%s2625_s3 + $0x158] sm:$0xff] %vm1175_vm0, %v1154_v60  ;;  %v1013_v1 = vadd.f32 %v1012_v59, %v628_v61 }
 0x1b6   :  { %v632_v2 = vpop.f32.mrf.mxu0 }
 0x1b7   :  { %v1017_v3 = vpop.f32.mrf.mxu1  ;;  %v1155_v4 = vmax.f32 %v1013_v1, 0.0  ;;  %v633_v5 = vadd.f32 %v2115_v6, %v632_v2 }
 0x1b8   :  { %v634_v7 = vpop.f32.mrf.mxu0 }
 0x1b9   :  { %v1019_v0 = vpop.f32.mrf.mxu1  ;;  %1220 = vst.msk [vmem:[%s2625_s3 + $0x160] sm:$0xff] %vm1175_vm0, %v1155_v4  ;;  %v1018_v8 = vadd.f32 %v1017_v3, %v633_v5 }
 0x1ba   :  { %v637_v9 = vpop.f32.mrf.mxu0 }
 0x1bb   :  { %v1022_v10 = vpop.f32.mrf.mxu1  ;;  %v1156_v11 = vmax.f32 %v1018_v8, 0.0  ;;  %v638_v12 = vadd.f32 %v2115_v6, %v637_v9 }
 0x1bc   :  { %v639_v13 = vpop.f32.mrf.mxu0 }
 0x1bd   :  { %v1024_v14 = vpop.f32.mrf.mxu1  ;;  %1221 = vst.msk [vmem:[%s2625_s3 + $0x168] sm:$0xff] %vm1175_vm0, %v1156_v11  ;;  %v1023_v15 = vadd.f32 %v1022_v10, %v638_v12 }
 0x1be   :  { %v642_v16 = vpop.f32.mrf.mxu0 }
 0x1bf   :  { %v1027_v17 = vpop.f32.mrf.mxu1  ;;  %v1157_v18 = vmax.f32 %v1023_v15, 0.0  ;;  %v643_v19 = vadd.f32 %v2115_v6, %v642_v16 }
 0x1c0   :  { %v644_v20 = vpop.f32.mrf.mxu0 }
 0x1c1   :  { %v1029_v21 = vpop.f32.mrf.mxu1  ;;  %1222 = vst.msk [vmem:[%s2625_s3 + $0x170] sm:$0xff] %vm1175_vm0, %v1157_v18  ;;  %v1028_v22 = vadd.f32 %v1027_v17, %v643_v19 }
 0x1c2   :  { %v647_v23 = vpop.f32.mrf.mxu0 }
 0x1c3   :  { %v1032_v24 = vpop.f32.mrf.mxu1  ;;  %v1158_v25 = vmax.f32 %v1028_v22, 0.0  ;;  %v648_v26 = vadd.f32 %v2115_v6, %v647_v23 }
 0x1c4   :  { %v649_v27 = vpop.f32.mrf.mxu0 }
 0x1c5   :  { %v1034_v28 = vpop.f32.mrf.mxu1  ;;  %1223 = vst.msk [vmem:[%s2625_s3 + $0x178] sm:$0xff] %vm1175_vm0, %v1158_v25  ;;  %v1033_v29 = vadd.f32 %v1032_v24, %v648_v26 }
 0x1c6   :  { %v652_v30 = vpop.f32.mrf.mxu0 }
 0x1c7   :  { %v1037_v31 = vpop.f32.mrf.mxu1  ;;  %v1159_v32 = vmax.f32 %v1033_v29, 0.0  ;;  %v653_v34 = vadd.f32 %v2541_v33, %v652_v30 }
 0x1c8   :  { %v654_v35 = vpop.f32.mrf.mxu0 }
 0x1c9   :  { %v1039_v6 = vpop.f32.mrf.mxu1  ;;  %1224 = vst.msk [vmem:[%s2625_s3 + $0x180] sm:$0xff] %vm1175_vm0, %v1159_v32  ;;  %v1038_v36 = vadd.f32 %v1037_v31, %v653_v34 }
 0x1ca   :  { %v657_v37 = vpop.f32.mrf.mxu0 }
 0x1cb   :  { %v1042_v38 = vpop.f32.mrf.mxu1  ;;  %v1160_v39 = vmax.f32 %v1038_v36, 0.0  ;;  %v658_v40 = vadd.f32 %v2541_v33, %v657_v37 }
 0x1cc   :  { %v659_v41 = vpop.f32.mrf.mxu0 }
 0x1cd   :  { %v1044_v42 = vpop.f32.mrf.mxu1  ;;  %1225 = vst.msk [vmem:[%s2625_s3 + $0x188] sm:$0xff] %vm1175_vm0, %v1160_v39  ;;  %v1043_v43 = vadd.f32 %v1042_v38, %v658_v40 }
 0x1ce   :  { %v662_v44 = vpop.f32.mrf.mxu0 }
 0x1cf   :  { %v1047_v45 = vpop.f32.mrf.mxu1  ;;  %v1161_v46 = vmax.f32 %v1043_v43, 0.0  ;;  %v663_v47 = vadd.f32 %v2541_v33, %v662_v44 }
 0x1d0   :  { %v664_v48 = vpop.f32.mrf.mxu0 }
 0x1d1   :  { %v1049_v49 = vpop.f32.mrf.mxu1  ;;  %1226 = vst.msk [vmem:[%s2625_s3 + $0x190] sm:$0xff] %vm1175_vm0, %v1161_v46  ;;  %v1048_v50 = vadd.f32 %v1047_v45, %v663_v47 }
 0x1d2   :  { %v667_v51 = vpop.f32.mrf.mxu0 }
 0x1d3   :  { %v1052_v52 = vpop.f32.mrf.mxu1  ;;  %v1162_v53 = vmax.f32 %v1048_v50, 0.0  ;;  %v668_v54 = vadd.f32 %v2541_v33, %v667_v51 }
 0x1d4   :  { %v669_v55 = vpop.f32.mrf.mxu0 }
 0x1d5   :  { %v1054_v56 = vpop.f32.mrf.mxu1  ;;  %1227 = vst.msk [vmem:[%s2625_s3 + $0x198] sm:$0xff] %vm1175_vm0, %v1162_v53  ;;  %v1053_v57 = vadd.f32 %v1052_v52, %v668_v54 }
 0x1d6   :  { %v672_v58 = vpop.f32.mrf.mxu0 }
 0x1d7   :  { %v1057_v59 = vpop.f32.mrf.mxu1  ;;  %v1163_v60 = vmax.f32 %v1053_v57, 0.0  ;;  %v673_v61 = vadd.f32 %v2541_v33, %v672_v58 }
 0x1d8   :  { %v674_v62 = vpop.f32.mrf.mxu0 }
 0x1d9   :  { %v1059_v63 = vpop.f32.mrf.mxu1  ;;  %1228 = vst.msk [vmem:[%s2625_s3 + $0x1a0] sm:$0xff] %vm1175_vm0, %v1163_v60  ;;  %v1058_v1 = vadd.f32 %v1057_v59, %v673_v61 }
 0x1da   :  { %v677_v2 = vpop.f32.mrf.mxu0 }
 0x1db   :  { %v1062_v3 = vpop.f32.mrf.mxu1  ;;  %v1164_v4 = vmax.f32 %v1058_v1, 0.0  ;;  %v678_v5 = vadd.f32 %v2541_v33, %v677_v2 }
 0x1dc   :  { %v679_v7 = vpop.f32.mrf.mxu0 }
 0x1dd   :  { %v1064_v0 = vpop.f32.mrf.mxu1  ;;  %1229 = vst.msk [vmem:[%s2625_s3 + $0x1a8] sm:$0xff] %vm1175_vm0, %v1164_v4  ;;  %v1063_v8 = vadd.f32 %v1062_v3, %v678_v5 }
 0x1de   :  { %v682_v9 = vpop.f32.mrf.mxu0 }
 0x1df   :  { %v1067_v10 = vpop.f32.mrf.mxu1  ;;  %v1165_v11 = vmax.f32 %v1063_v8, 0.0  ;;  %v683_v12 = vadd.f32 %v2541_v33, %v682_v9 }
 0x1e0   :  { %v684_v13 = vpop.f32.mrf.mxu0 }
 0x1e1   :  { %v1069_v14 = vpop.f32.mrf.mxu1  ;;  %1230 = vst.msk [vmem:[%s2625_s3 + $0x1b0] sm:$0xff] %vm1175_vm0, %v1165_v11  ;;  %v1068_v15 = vadd.f32 %v1067_v10, %v683_v12 }
 0x1e2   :  { %v687_v16 = vpop.f32.mrf.mxu0 }
 0x1e3   :  { %v1072_v17 = vpop.f32.mrf.mxu1  ;;  %v1166_v18 = vmax.f32 %v1068_v15, 0.0  ;;  %v688_v19 = vadd.f32 %v2541_v33, %v687_v16 }
 0x1e4   :  { %v689_v20 = vpop.f32.mrf.mxu0 }
 0x1e5   :  { %v1074_v21 = vpop.f32.mrf.mxu1  ;;  %1231 = vst.msk [vmem:[%s2625_s3 + $0x1b8] sm:$0xff] %vm1175_vm0, %v1166_v18  ;;  %v1073_v22 = vadd.f32 %v1072_v17, %v688_v19 }
 0x1e6   :  { %v692_v23 = vpop.f32.mrf.mxu0 }
 0x1e7   :  { %v1077_v24 = vpop.f32.mrf.mxu1  ;;  %v1167_v25 = vmax.f32 %v1073_v22, 0.0  ;;  %v693_v26 = vadd.f32 %v2541_v33, %v692_v23 }
 0x1e8   :  { %v694_v27 = vpop.f32.mrf.mxu0 }
 0x1e9   :  { %v1079_v28 = vpop.f32.mrf.mxu1  ;;  %1232 = vst.msk [vmem:[%s2625_s3 + $0x1c0] sm:$0xff] %vm1175_vm0, %v1167_v25  ;;  %v1078_v29 = vadd.f32 %v1077_v24, %v693_v26 }
 0x1ea   :  { %v697_v30 = vpop.f32.mrf.mxu0 }
 0x1eb   :  { %v1082_v31 = vpop.f32.mrf.mxu1  ;;  %v1168_v32 = vmax.f32 %v1078_v29, 0.0  ;;  %v698_v34 = vadd.f32 %v2541_v33, %v697_v30 }
 0x1ec   :  { %v699_v35 = vpop.f32.mrf.mxu0 }
 0x1ed   :  { %v1084_v6 = vpop.f32.mrf.mxu1  ;;  %1233 = vst.msk [vmem:[%s2625_s3 + $0x1c8] sm:$0xff] %vm1175_vm0, %v1168_v32  ;;  %v1083_v36 = vadd.f32 %v1082_v31, %v698_v34 }
 0x1ee   :  { %v702_v37 = vpop.f32.mrf.mxu0 }
 0x1ef   :  { %v1087_v38 = vpop.f32.mrf.mxu1  ;;  %v1169_v39 = vmax.f32 %v1083_v36, 0.0  ;;  %v703_v40 = vadd.f32 %v2541_v33, %v702_v37 }
 0x1f0   :  { %v704_v41 = vpop.f32.mrf.mxu0 }
 0x1f1   :  { %v1089_v42 = vpop.f32.mrf.mxu1  ;;  %1234 = vst.msk [vmem:[%s2625_s3 + $0x1d0] sm:$0xff] %vm1175_vm0, %v1169_v39  ;;  %v1088_v43 = vadd.f32 %v1087_v38, %v703_v40 }
 0x1f2   :  { %v707_v44 = vpop.f32.mrf.mxu0 }
 0x1f3   :  { %v1092_v45 = vpop.f32.mrf.mxu1  ;;  %v1170_v46 = vmax.f32 %v1088_v43, 0.0  ;;  %v708_v47 = vadd.f32 %v2541_v33, %v707_v44 }
 0x1f4   :  { %v709_v48 = vpop.f32.mrf.mxu0 }
 0x1f5   :  { %v1094_v49 = vpop.f32.mrf.mxu1  ;;  %1235 = vst.msk [vmem:[%s2625_s3 + $0x1d8] sm:$0xff] %vm1175_vm0, %v1170_v46  ;;  %v1093_v50 = vadd.f32 %v1092_v45, %v708_v47 }
 0x1f6   :  { %v712_v51 = vpop.f32.mrf.mxu0 }
 0x1f7   :  { %v1097_v52 = vpop.f32.mrf.mxu1  ;;  %v1171_v53 = vmax.f32 %v1093_v50, 0.0  ;;  %v713_v54 = vadd.f32 %v2541_v33, %v712_v51 }
 0x1f8   :  { %v714_v55 = vpop.f32.mrf.mxu0 }
 0x1f9   :  { %v1099_v56 = vpop.f32.mrf.mxu1  ;;  %1236 = vst.msk [vmem:[%s2625_s3 + $0x1e0] sm:$0xff] %vm1175_vm0, %v1171_v53  ;;  %v1098_v57 = vadd.f32 %v1097_v52, %v713_v54 }
 0x1fa   :  { %v717_v58 = vpop.f32.mrf.mxu0 }
 0x1fb   :  { %v1102_v59 = vpop.f32.mrf.mxu1  ;;  %v1172_v60 = vmax.f32 %v1098_v57, 0.0  ;;  %v718_v61 = vadd.f32 %v2541_v33, %v717_v58 }
 0x1fc   :  { %v719_v62 = vpop.f32.mrf.mxu0 }
 0x1fd   :  { %v1104_v63 = vpop.f32.mrf.mxu1  ;;  %1237 = vst.msk [vmem:[%s2625_s3 + $0x1e8] sm:$0xff] %vm1175_vm0, %v1172_v60  ;;  %v1103_v1 = vadd.f32 %v1102_v59, %v718_v61 }
 0x1fe   :  { %v722_v2 = vpop.f32.mrf.mxu0 }
 0x1ff   :  { %v1107_v3 = vpop.f32.mrf.mxu1  ;;  %v1173_v4 = vmax.f32 %v1103_v1, 0.0  ;;  %v723_v5 = vadd.f32 %v2541_v33, %v722_v2 }
 0x200   :  { %v724_v7 = vpop.f32.mrf.mxu0 }
 0x201   :  { %v1109_v0 = vpop.f32.mrf.mxu1  ;;  %1238 = vst.msk [vmem:[%s2625_s3 + $0x1f0] sm:$0xff] %vm1175_vm0, %v1173_v4  ;;  %v1108_v8 = vadd.f32 %v1107_v3, %v723_v5 }
 0x203   :  { %v1174_v9 = vmax.f32 %v1108_v8, 0.0 }
 0x205   :  { %1239 = vst.msk [vmem:[%s2625_s3 + $0x1f8] sm:$0xff] %vm1175_vm0, %v1174_v9 }

// kernel: cnn_encoder_forward.6
= control target key start
LH: loop header
LB: loop body
LE: loop exit
PB: predicated region body
PF: predicated region fallthrough
CT: control target
= control target key end

     0   :  { %vm455_vm0 = vcmask 523264   ;;  %s1126_s1 = inlined_call_operand.vmem [shape: f32[512,64], index: 1, kind: input, shape index: {}]   ;;  %s1127_s0 = inlined_call_operand.vmem [shape: f32[128,512], index: 0, kind: input, shape index: {}]   ;;  %s1128_s2 = inlined_call_operand.vmem [shape: f32[1,64], index: 2, kind: input, shape index: {}]   ;;  %s1129_s3 = inlined_call_operand.vmem [shape: f32[128,64], index: 3, kind: output, shape index: {}]  }
   0x1   :  { %v109_v0 = vld [vmem:[%s1126_s1 + $0xf8] sm:$0xff]  ;;  %v108_v4 = vld [vmem:[%s1126_s1 + $0xf0] sm:$0xff]  ;;  %v107_v8 = vld [vmem:[%s1126_s1 + $0xe8] sm:$0xff] }
   0x2   :  { %v141_v1 = vld [vmem:[%s1126_s1 + $0x1f8] sm:$0xff]  ;;  %477 = vmatprep.subr.mxu0 %v109_v0  ;;  %v140_v5 = vld [vmem:[%s1126_s1 + $0x1f0] sm:$0xff]  ;;  %v139_v9 = vld [vmem:[%s1126_s1 + $0x1e8] sm:$0xff] }
   0x3   :  { %v93_v2 = vld [vmem:[%s1126_s1 + $0x78] sm:$0xff]  ;;  %557 = vmatprep.subr.mxu1 %v141_v1  ;;  %v92_v6 = vld [vmem:[%s1126_s1 + $0x70] sm:$0xff]  ;;  %v91_v10 = vld [vmem:[%s1126_s1 + $0x68] sm:$0xff] }
   0x4   :  { %v125_v3 = vld [vmem:[%s1126_s1 + $0x178] sm:$0xff]  ;;  %478 = vmatpush3.msra.mxu0 %v93_v2  ;;  %v124_v7 = vld [vmem:[%s1126_s1 + $0x170] sm:$0xff]  ;;  %v123_v11 = vld [vmem:[%s1126_s1 + $0x168] sm:$0xff] }
   0x5   :  { %558 = vmatpush3.msra.mxu1 %v125_v3  ;;  %479 = vmatprep.subr.mxu0 %v108_v4  ;;  %v106_v12 = vld [vmem:[%s1126_s1 + $0xe0] sm:$0xff]  ;;  %v105_v16 = vld [vmem:[%s1126_s1 + $0xd8] sm:$0xff]  ;;  %v104_v20 = vld [vmem:[%s1126_s1 + $0xd0] sm:$0xff] }
   0x6   :  { %559 = vmatprep.subr.mxu1 %v140_v5  ;;  %480 = vmatpush3.msra.mxu0 %v92_v6  ;;  %v138_v13 = vld [vmem:[%s1126_s1 + $0x1e0] sm:$0xff]  ;;  %v137_v17 = vld [vmem:[%s1126_s1 + $0x1d8] sm:$0xff]  ;;  %v136_v21 = vld [vmem:[%s1126_s1 + $0x1d0] sm:$0xff] }
   0x7   :  { %560 = vmatpush3.msra.mxu1 %v124_v7  ;;  %481 = vmatprep.subr.mxu0 %v107_v8  ;;  %v90_v14 = vld [vmem:[%s1126_s1 + $0x60] sm:$0xff]  ;;  %v89_v18 = vld [vmem:[%s1126_s1 + $0x58] sm:$0xff]  ;;  %v88_v22 = vld [vmem:[%s1126_s1 + $0x50] sm:$0xff] }
   0x8   :  { %561 = vmatprep.subr.mxu1 %v139_v9  ;;  %v122_v15 = vld [vmem:[%s1126_s1 + $0x160] sm:$0xff]  ;;  %482 = vmatpush3.msra.mxu0 %v91_v10  ;;  %v121_v19 = vld [vmem:[%s1126_s1 + $0x158] sm:$0xff]  ;;  %v120_v23 = vld [vmem:[%s1126_s1 + $0x150] sm:$0xff] }
   0x9   :  { %562 = vmatpush3.msra.mxu1 %v123_v11  ;;  %483 = vmatprep.subr.mxu0 %v106_v12  ;;  %v103_v24 = vld [vmem:[%s1126_s1 + $0xc8] sm:$0xff]  ;;  %v102_v28 = vld [vmem:[%s1126_s1 + $0xc0] sm:$0xff]  ;;  %v101_v32 = vld [vmem:[%s1126_s1 + $0xb8] sm:$0xff] }
   0xa   :  { %563 = vmatprep.subr.mxu1 %v138_v13  ;;  %484 = vmatpush3.msra.mxu0 %v90_v14  ;;  %v135_v25 = vld [vmem:[%s1126_s1 + $0x1c8] sm:$0xff]  ;;  %v134_v29 = vld [vmem:[%s1126_s1 + $0x1c0] sm:$0xff]  ;;  %v133_v33 = vld [vmem:[%s1126_s1 + $0x1b8] sm:$0xff] }
   0xb   :  { %564 = vmatpush3.msra.mxu1 %v122_v15  ;;  %485 = vmatprep.subr.mxu0 %v105_v16  ;;  %v87_v26 = vld [vmem:[%s1126_s1 + $0x48] sm:$0xff]  ;;  %v86_v30 = vld [vmem:[%s1126_s1 + $0x40] sm:$0xff]  ;;  %v85_v34 = vld [vmem:[%s1126_s1 + $0x38] sm:$0xff] }
   0xc   :  { %565 = vmatprep.subr.mxu1 %v137_v17  ;;  %486 = vmatpush3.msra.mxu0 %v89_v18  ;;  %v119_v27 = vld [vmem:[%s1126_s1 + $0x148] sm:$0xff]  ;;  %v118_v31 = vld [vmem:[%s1126_s1 + $0x140] sm:$0xff]  ;;  %v117_v35 = vld [vmem:[%s1126_s1 + $0x138] sm:$0xff] }
   0xd   :  { %566 = vmatpush3.msra.mxu1 %v121_v19  ;;  %487 = vmatprep.subr.mxu0 %v104_v20  ;;  %v100_v36 = vld [vmem:[%s1126_s1 + $0xb0] sm:$0xff]  ;;  %v99_v40 = vld [vmem:[%s1126_s1 + $0xa8] sm:$0xff]  ;;  %v98_v44 = vld [vmem:[%s1126_s1 + $0xa0] sm:$0xff] }
   0xe   :  { %567 = vmatprep.subr.mxu1 %v136_v21  ;;  %488 = vmatpush3.msra.mxu0 %v88_v22  ;;  %v132_v37 = vld [vmem:[%s1126_s1 + $0x1b0] sm:$0xff]  ;;  %v131_v41 = vld [vmem:[%s1126_s1 + $0x1a8] sm:$0xff]  ;;  %v130_v45 = vld [vmem:[%s1126_s1 + $0x1a0] sm:$0xff] }
   0xf   :  { %568 = vmatpush3.msra.mxu1 %v120_v23  ;;  %489 = vmatprep.subr.mxu0 %v103_v24  ;;  %v84_v38 = vld [vmem:[%s1126_s1 + $0x30] sm:$0xff]  ;;  %v83_v42 = vld [vmem:[%s1126_s1 + $0x28] sm:$0xff]  ;;  %v82_v46 = vld [vmem:[%s1126_s1 + $0x20] sm:$0xff] }
  0x10   :  { %569 = vmatprep.subr.mxu1 %v135_v25  ;;  %490 = vmatpush3.msra.mxu0 %v87_v26  ;;  %v116_v39 = vld [vmem:[%s1126_s1 + $0x130] sm:$0xff]  ;;  %v115_v43 = vld [vmem:[%s1126_s1 + $0x128] sm:$0xff]  ;;  %v114_v47 = vld [vmem:[%s1126_s1 + $0x120] sm:$0xff] }
  0x11   :  { %570 = vmatpush3.msra.mxu1 %v119_v27  ;;  %491 = vmatprep.subr.mxu0 %v102_v28  ;;  %v97_v48 = vld [vmem:[%s1126_s1 + $0x98] sm:$0xff]  ;;  %v96_v52 = vld [vmem:[%s1126_s1 + $0x90] sm:$0xff]  ;;  %v95_v56 = vld [vmem:[%s1126_s1 + $0x88] sm:$0xff] }
  0x12   :  { %571 = vmatprep.subr.mxu1 %v134_v29  ;;  %492 = vmatpush3.msra.mxu0 %v86_v30  ;;  %v129_v49 = vld [vmem:[%s1126_s1 + $0x198] sm:$0xff]  ;;  %v128_v53 = vld [vmem:[%s1126_s1 + $0x190] sm:$0xff]  ;;  %v127_v57 = vld [vmem:[%s1126_s1 + $0x188] sm:$0xff] }
  0x13   :  { %572 = vmatpush3.msra.mxu1 %v118_v31  ;;  %493 = vmatprep.subr.mxu0 %v101_v32  ;;  %v81_v50 = vld [vmem:[%s1126_s1 + $0x18] sm:$0xff]  ;;  %v80_v54 = vld [vmem:[%s1126_s1 + $0x10] sm:$0xff]  ;;  %v79_v58 = vld [vmem:[%s1126_s1 + $0x8] sm:$0xff] }
  0x14   :  { %573 = vmatprep.subr.mxu1 %v133_v33  ;;  %494 = vmatpush3.msra.mxu0 %v85_v34  ;;  %v113_v51 = vld [vmem:[%s1126_s1 + $0x118] sm:$0xff]  ;;  %v112_v55 = vld [vmem:[%s1126_s1 + $0x110] sm:$0xff]  ;;  %v111_v59 = vld [vmem:[%s1126_s1 + $0x108] sm:$0xff] }
  0x15   :  { %574 = vmatpush3.msra.mxu1 %v117_v35  ;;  %495 = vmatprep.subr.mxu0 %v100_v36  ;;  %v94_v60 = vld [vmem:[%s1126_s1 + $0x80] sm:$0xff]  ;;  %v15_v63 = vld [vmem:[%s1127_s0 + $0x8] sm:$0xff]  ;;  %v17_v1 = vld [vmem:[%s1127_s0 + $0x18] sm:$0xff] }
  0x16   :  { %575 = vmatprep.subr.mxu1 %v132_v37  ;;  %496 = vmatpush3.msra.mxu0 %v84_v38  ;;  %v126_v61 = vld [vmem:[%s1126_s1 + $0x180] sm:$0xff]  ;;  %v16_v3 = vld [vmem:[%s1127_s0 + $0x10] sm:$0xff]  ;;  %v19_v4 = vld [vmem:[%s1127_s0 + $0x28] sm:$0xff] }
  0x17   :  { %576 = vmatpush3.msra.mxu1 %v116_v39  ;;  %497 = vmatprep.subr.mxu0 %v99_v40  ;;  %v78_v62 = vld [vmem:[%s1126_s1] sm:$0xff]  ;;  %v21_v5 = vld [vmem:[%s1127_s0 + $0x38] sm:$0xff]  ;;  %v20_v7 = vld [vmem:[%s1127_s0 + $0x30] sm:$0xff] }
  0x18   :  { %577 = vmatprep.subr.mxu1 %v131_v41  ;;  %498 = vmatpush3.msra.mxu0 %v83_v42  ;;  %v110_v0 = vld [vmem:[%s1126_s1 + $0x100] sm:$0xff]  ;;  %v23_v8 = vld [vmem:[%s1127_s0 + $0x48] sm:$0xff]  ;;  %v25_v9 = vld [vmem:[%s1127_s0 + $0x58] sm:$0xff] }
  0x19   :  { %578 = vmatpush3.msra.mxu1 %v115_v43  ;;  %499 = vmatprep.subr.mxu0 %v98_v44  ;;  %v14_v2 = vld [vmem:[%s1127_s0] sm:$0xff]  ;;  %v24_v11 = vld [vmem:[%s1127_s0 + $0x50] sm:$0xff]  ;;  %v27_v12 = vld [vmem:[%s1127_s0 + $0x68] sm:$0xff] }
  0x1a   :  { %579 = vmatprep.subr.mxu1 %v130_v45  ;;  %500 = vmatpush3.msra.mxu0 %v82_v46  ;;  %v18_v6 = vld [vmem:[%s1127_s0 + $0x20] sm:$0xff]  ;;  %v29_v13 = vld [vmem:[%s1127_s0 + $0x78] sm:$0xff]  ;;  %v28_v15 = vld [vmem:[%s1127_s0 + $0x70] sm:$0xff] }
  0x1b   :  { %580 = vmatpush3.msra.mxu1 %v114_v47  ;;  %501 = vmatprep.subr.mxu0 %v97_v48  ;;  %v22_v10 = vld [vmem:[%s1127_s0 + $0x40] sm:$0xff]  ;;  %v31_v16 = vld [vmem:[%s1127_s0 + $0x88] sm:$0xff]  ;;  %v33_v17 = vld [vmem:[%s1127_s0 + $0x98] sm:$0xff] }
  0x1c   :  { %581 = vmatprep.subr.mxu1 %v129_v49  ;;  %502 = vmatpush3.msra.mxu0 %v81_v50  ;;  %v26_v14 = vld [vmem:[%s1127_s0 + $0x60] sm:$0xff]  ;;  %v32_v19 = vld [vmem:[%s1127_s0 + $0x90] sm:$0xff]  ;;  %v35_v20 = vld [vmem:[%s1127_s0 + $0xa8] sm:$0xff] }
  0x1d   :  { %582 = vmatpush3.msra.mxu1 %v113_v51  ;;  %503 = vmatprep.subr.mxu0 %v96_v52  ;;  %v30_v18 = vld [vmem:[%s1127_s0 + $0x80] sm:$0xff]  ;;  %v37_v21 = vld [vmem:[%s1127_s0 + $0xb8] sm:$0xff]  ;;  %v36_v23 = vld [vmem:[%s1127_s0 + $0xb0] sm:$0xff] }
  0x1e   :  { %583 = vmatprep.subr.mxu1 %v128_v53  ;;  %504 = vmatpush3.msra.mxu0 %v80_v54  ;;  %v34_v22 = vld [vmem:[%s1127_s0 + $0xa0] sm:$0xff]  ;;  %v39_v24 = vld [vmem:[%s1127_s0 + $0xc8] sm:$0xff]  ;;  %v41_v25 = vld [vmem:[%s1127_s0 + $0xd8] sm:$0xff] }
  0x1f   :  { %584 = vmatpush3.msra.mxu1 %v112_v55  ;;  %505 = vmatprep.subr.mxu0 %v95_v56  ;;  %v38_v26 = vld [vmem:[%s1127_s0 + $0xc0] sm:$0xff]  ;;  %v40_v27 = vld [vmem:[%s1127_s0 + $0xd0] sm:$0xff]  ;;  %v43_v28 = vld [vmem:[%s1127_s0 + $0xe8] sm:$0xff] }
  0x20   :  { %585 = vmatprep.subr.mxu1 %v127_v57  ;;  %506 = vmatpush3.msra.mxu0 %v79_v58  ;;  %v45_v29 = vld [vmem:[%s1127_s0 + $0xf8] sm:$0xff]  ;;  %v42_v30 = vld [vmem:[%s1127_s0 + $0xe0] sm:$0xff]  ;;  %v44_v31 = vld [vmem:[%s1127_s0 + $0xf0] sm:$0xff] }
  0x21   :  { %586 = vmatpush3.msra.mxu1 %v111_v59  ;;  %507 = vmatprep.subr.mxu0 %v94_v60  ;;  %v47_v32 = vld [vmem:[%s1127_s0 + $0x108] sm:$0xff]  ;;  %v49_v33 = vld [vmem:[%s1127_s0 + $0x118] sm:$0xff]  ;;  %v46_v34 = vld [vmem:[%s1127_s0 + $0x100] sm:$0xff] }
  0x22   :  { %587 = vmatprep.subr.mxu1 %v126_v61  ;;  %508 = vmatpush3.msra.mxu0 %v78_v62  ;;  %v48_v35 = vld [vmem:[%s1127_s0 + $0x110] sm:$0xff]  ;;  %v51_v36 = vld [vmem:[%s1127_s0 + $0x128] sm:$0xff]  ;;  %v53_v37 = vld [vmem:[%s1127_s0 + $0x138] sm:$0xff] }
  0x23   :  { %213 = vmatprep.mubr.f32.mxu0 %v15_v63  ;;  %588 = vmatpush3.msra.mxu1 %v110_v0  ;;  %v50_v38 = vld [vmem:[%s1127_s0 + $0x120] sm:$0xff]  ;;  %v52_v39 = vld [vmem:[%s1127_s0 + $0x130] sm:$0xff]  ;;  %v55_v40 = vld [vmem:[%s1127_s0 + $0x148] sm:$0xff] }
  0x24   :  { %358 = vmatprep.mubr.f32.mxu1 %v17_v1  ;;  %214 = vmatmul.mubr.f32.vlgmr.msra.gmra.mxu0 %v14_v2  ;;  %v57_v41 = vld [vmem:[%s1127_s0 + $0x158] sm:$0xff]  ;;  %v54_v42 = vld [vmem:[%s1127_s0 + $0x140] sm:$0xff]  ;;  %v56_v43 = vld [vmem:[%s1127_s0 + $0x150] sm:$0xff] }
  0x25   :  { %359 = vmatmul.mubr.f32.vlgmr.msra.gmra.mxu1 %v16_v3  ;;  %218 = vmatprep.mubr.f32.mxu0 %v19_v4  ;;  %v59_v44 = vld [vmem:[%s1127_s0 + $0x168] sm:$0xff]  ;;  %v61_v45 = vld [vmem:[%s1127_s0 + $0x178] sm:$0xff]  ;;  %v58_v46 = vld [vmem:[%s1127_s0 + $0x160] sm:$0xff] }
  0x26   :  { %363 = vmatprep.mubr.f32.mxu1 %v21_v5  ;;  %v60_v47 = vld [vmem:[%s1127_s0 + $0x170] sm:$0xff]  ;;  %v63_v48 = vld [vmem:[%s1127_s0 + $0x188] sm:$0xff]  ;;  %v65_v49 = vld [vmem:[%s1127_s0 + $0x198] sm:$0xff] }
  0x27   :  { %v62_v50 = vld [vmem:[%s1127_s0 + $0x180] sm:$0xff]  ;;  %v64_v51 = vld [vmem:[%s1127_s0 + $0x190] sm:$0xff]  ;;  %v67_v52 = vld [vmem:[%s1127_s0 + $0x1a8] sm:$0xff] }
  0x28   :  { %219 = vmatmul.mubr.f32.gmra.mxu0 %v18_v6  ;;  %v69_v53 = vld [vmem:[%s1127_s0 + $0x1b8] sm:$0xff]  ;;  %v66_v54 = vld [vmem:[%s1127_s0 + $0x1a0] sm:$0xff]  ;;  %v68_v55 = vld [vmem:[%s1127_s0 + $0x1b0] sm:$0xff] }
  0x29   :  { %364 = vmatmul.mubr.f32.gmra.mxu1 %v20_v7  ;;  %223 = vmatprep.mubr.f32.mxu0 %v23_v8  ;;  %v71_v56 = vld [vmem:[%s1127_s0 + $0x1c8] sm:$0xff]  ;;  %v73_v57 = vld [vmem:[%s1127_s0 + $0x1d8] sm:$0xff]  ;;  %v70_v58 = vld [vmem:[%s1127_s0 + $0x1c0] sm:$0xff] }
  0x2a   :  { %368 = vmatprep.mubr.f32.mxu1 %v25_v9  ;;  %v72_v59 = vld [vmem:[%s1127_s0 + $0x1d0] sm:$0xff]  ;;  %v75_v60 = vld [vmem:[%s1127_s0 + $0x1e8] sm:$0xff]  ;;  %v77_v61 = vld [vmem:[%s1127_s0 + $0x1f8] sm:$0xff] }
  0x2b   :  { %v74_v62 = vld [vmem:[%s1127_s0 + $0x1e0] sm:$0xff]  ;;  %v76_v63 = vld [vmem:[%s1127_s0 + $0x1f0] sm:$0xff] }
  0x2c   :  { %224 = vmatmul.mubr.f32.gmra.mxu0 %v22_v10  ;;  %v1044_v2 = vld [vmem:[%s1128_s2] ss:$0 sm:$0xff] }
  0x2d   :  { %369 = vmatmul.mubr.f32.gmra.mxu1 %v24_v11  ;;  %228 = vmatprep.mubr.f32.mxu0 %v27_v12 }
  0x2e   :  { %373 = vmatprep.mubr.f32.mxu1 %v29_v13 }
  0x30   :  { %229 = vmatmul.mubr.f32.gmra.mxu0 %v26_v14 }
  0x31   :  { %374 = vmatmul.mubr.f32.gmra.mxu1 %v28_v15  ;;  %233 = vmatprep.mubr.f32.mxu0 %v31_v16 }
  0x32   :  { %378 = vmatprep.mubr.f32.mxu1 %v33_v17 }
  0x34   :  { %234 = vmatmul.mubr.f32.gmra.mxu0 %v30_v18 }
  0x35   :  { %379 = vmatmul.mubr.f32.gmra.mxu1 %v32_v19  ;;  %238 = vmatprep.mubr.f32.mxu0 %v35_v20 }
  0x36   :  { %383 = vmatprep.mubr.f32.mxu1 %v37_v21 }
  0x38   :  { %239 = vmatmul.mubr.f32.gmra.mxu0 %v34_v22 }
  0x39   :  { %384 = vmatmul.mubr.f32.gmra.mxu1 %v36_v23  ;;  %243 = vmatprep.mubr.f32.mxu0 %v39_v24 }
  0x3a   :  { %388 = vmatprep.mubr.f32.mxu1 %v41_v25 }
  0x3c   :  { %244 = vmatmul.mubr.f32.gmra.mxu0 %v38_v26 }
  0x3d   :  { %389 = vmatmul.mubr.f32.gmra.mxu1 %v40_v27  ;;  %248 = vmatprep.mubr.f32.mxu0 %v43_v28 }
  0x3e   :  { %393 = vmatprep.mubr.f32.mxu1 %v45_v29 }
  0x40   :  { %249 = vmatmul.mubr.f32.gmra.mxu0 %v42_v30 }
  0x41   :  { %394 = vmatmul.mubr.f32.gmra.mxu1 %v44_v31  ;;  %253 = vmatprep.mubr.f32.mxu0 %v47_v32 }
  0x42   :  { %398 = vmatprep.mubr.f32.mxu1 %v49_v33 }
  0x44   :  { %254 = vmatmul.mubr.f32.gmra.mxu0 %v46_v34 }
  0x45   :  { %399 = vmatmul.mubr.f32.gmra.mxu1 %v48_v35  ;;  %258 = vmatprep.mubr.f32.mxu0 %v51_v36 }
  0x46   :  { %403 = vmatprep.mubr.f32.mxu1 %v53_v37 }
  0x48   :  { %259 = vmatmul.mubr.f32.gmra.mxu0 %v50_v38 }
  0x49   :  { %404 = vmatmul.mubr.f32.gmra.mxu1 %v52_v39  ;;  %263 = vmatprep.mubr.f32.mxu0 %v55_v40 }
  0x4a   :  { %408 = vmatprep.mubr.f32.mxu1 %v57_v41 }
  0x4c   :  { %264 = vmatmul.mubr.f32.gmra.mxu0 %v54_v42 }
  0x4d   :  { %409 = vmatmul.mubr.f32.gmra.mxu1 %v56_v43  ;;  %268 = vmatprep.mubr.f32.mxu0 %v59_v44 }
  0x4e   :  { %413 = vmatprep.mubr.f32.mxu1 %v61_v45 }
  0x50   :  { %269 = vmatmul.mubr.f32.gmra.mxu0 %v58_v46 }
  0x51   :  { %414 = vmatmul.mubr.f32.gmra.mxu1 %v60_v47  ;;  %273 = vmatprep.mubr.f32.mxu0 %v63_v48 }
  0x52   :  { %418 = vmatprep.mubr.f32.mxu1 %v65_v49 }
  0x54   :  { %274 = vmatmul.mubr.f32.gmra.mxu0 %v62_v50 }
  0x55   :  { %419 = vmatmul.mubr.f32.gmra.mxu1 %v64_v51  ;;  %278 = vmatprep.mubr.f32.mxu0 %v67_v52 }
  0x56   :  { %423 = vmatprep.mubr.f32.mxu1 %v69_v53 }
  0x58   :  { %279 = vmatmul.mubr.f32.gmra.mxu0 %v66_v54 }
  0x59   :  { %424 = vmatmul.mubr.f32.gmra.mxu1 %v68_v55  ;;  %283 = vmatprep.mubr.f32.mxu0 %v71_v56 }
  0x5a   :  { %428 = vmatprep.mubr.f32.mxu1 %v73_v57 }
  0x5c   :  { %284 = vmatmul.mubr.f32.gmra.mxu0 %v70_v58 }
  0x5d   :  { %429 = vmatmul.mubr.f32.gmra.mxu1 %v72_v59  ;;  %288 = vmatprep.mubr.f32.mxu0 %v75_v60 }
  0x5e   :  { %433 = vmatprep.mubr.f32.mxu1 %v77_v61 }
  0x60   :  { %289 = vmatmul.mubr.f32.gmra.mxu0 %v74_v62 }
  0x61   :  { %434 = vmatmul.mubr.f32.gmra.mxu1 %v76_v63 }
  0xe4   :  { %v509_v0 = vpop.f32.mrf.mxu0 }
  0xe5   :  { %v589_v1 = vpop.f32.mrf.mxu1 }
  0xe6   :  { %v510_v3 = vpop.f32.mrf.mxu0 }
  0xe7   :  { %v590_v4 = vpop.f32.mrf.mxu1  ;;  %v511_v5 = vadd.f32 %v510_v3, %v509_v0 }
  0xe8   :  { %v512_v6 = vpop.f32.mrf.mxu0  ;;  %v591_v9 = vadd.f32 %v590_v4, %v589_v1 }
  0xe9   :  { %v592_v7 = vpop.f32.mrf.mxu1  ;;  %v216_v8 = vadd.f32 %v511_v5, %v1044_v2 }
  0xea   :  { %v513_v10 = vpop.f32.mrf.mxu0 }
  0xeb   :  { %v593_v11 = vpop.f32.mrf.mxu1  ;;  %v361_v12 = vadd.f32 %v591_v9, %v216_v8  ;;  %v514_v13 = vadd.f32 %v513_v10, %v512_v6 }
  0xec   :  { %v515_v14 = vpop.f32.mrf.mxu0  ;;  %v594_v18 = vadd.f32 %v593_v11, %v592_v7 }
  0xed   :  { %v595_v15 = vpop.f32.mrf.mxu1  ;;  %v439_v16 = vmax.f32 %v361_v12, 0.0  ;;  %v221_v17 = vadd.f32 %v514_v13, %v1044_v2 }
  0xee   :  { %v516_v19 = vpop.f32.mrf.mxu0 }
  0xef   :  { %v596_v20 = vpop.f32.mrf.mxu1  ;;  %456 = vst.msk [vmem:[%s1129_s3] sm:$0xff] %vm455_vm0, %v439_v16  ;;  %v366_v21 = vadd.f32 %v594_v18, %v221_v17  ;;  %v517_v22 = vadd.f32 %v516_v19, %v515_v14 }
  0xf0   :  { %v518_v23 = vpop.f32.mrf.mxu0  ;;  %v597_v27 = vadd.f32 %v596_v20, %v595_v15 }
  0xf1   :  { %v598_v24 = vpop.f32.mrf.mxu1  ;;  %v440_v25 = vmax.f32 %v366_v21, 0.0  ;;  %v226_v26 = vadd.f32 %v517_v22, %v1044_v2 }
  0xf2   :  { %v519_v28 = vpop.f32.mrf.mxu0 }
  0xf3   :  { %v599_v29 = vpop.f32.mrf.mxu1  ;;  %457 = vst.msk [vmem:[%s1129_s3 + $0x8] sm:$0xff] %vm455_vm0, %v440_v25  ;;  %v371_v30 = vadd.f32 %v597_v27, %v226_v26  ;;  %v520_v31 = vadd.f32 %v519_v28, %v518_v23 }
  0xf4   :  { %v521_v32 = vpop.f32.mrf.mxu0  ;;  %v600_v36 = vadd.f32 %v599_v29, %v598_v24 }
  0xf5   :  { %v601_v33 = vpop.f32.mrf.mxu1  ;;  %v441_v34 = vmax.f32 %v371_v30, 0.0  ;;  %v231_v35 = vadd.f32 %v520_v31, %v1044_v2 }
  0xf6   :  { %v522_v37 = vpop.f32.mrf.mxu0 }
  0xf7   :  { %v602_v38 = vpop.f32.mrf.mxu1  ;;  %458 = vst.msk [vmem:[%s1129_s3 + $0x10] sm:$0xff] %vm455_vm0, %v441_v34  ;;  %v376_v39 = vadd.f32 %v600_v36, %v231_v35  ;;  %v523_v40 = vadd.f32 %v522_v37, %v521_v32 }
  0xf8   :  { %v524_v41 = vpop.f32.mrf.mxu0  ;;  %v603_v45 = vadd.f32 %v602_v38, %v601_v33 }
  0xf9   :  { %v604_v42 = vpop.f32.mrf.mxu1  ;;  %v442_v43 = vmax.f32 %v376_v39, 0.0  ;;  %v236_v44 = vadd.f32 %v523_v40, %v1044_v2 }
  0xfa   :  { %v525_v46 = vpop.f32.mrf.mxu0 }
  0xfb   :  { %v605_v47 = vpop.f32.mrf.mxu1  ;;  %459 = vst.msk [vmem:[%s1129_s3 + $0x18] sm:$0xff] %vm455_vm0, %v442_v43  ;;  %v381_v48 = vadd.f32 %v603_v45, %v236_v44  ;;  %v526_v49 = vadd.f32 %v525_v46, %v524_v41 }
  0xfc   :  { %v527_v50 = vpop.f32.mrf.mxu0  ;;  %v606_v54 = vadd.f32 %v605_v47, %v604_v42 }
  0xfd   :  { %v607_v51 = vpop.f32.mrf.mxu1  ;;  %v443_v52 = vmax.f32 %v381_v48, 0.0  ;;  %v241_v53 = vadd.f32 %v526_v49, %v1044_v2 }
  0xfe   :  { %v528_v55 = vpop.f32.mrf.mxu0 }
  0xff   :  { %v608_v56 = vpop.f32.mrf.mxu1  ;;  %460 = vst.msk [vmem:[%s1129_s3 + $0x20] sm:$0xff] %vm455_vm0, %v443_v52  ;;  %v386_v57 = vadd.f32 %v606_v54, %v241_v53  ;;  %v529_v58 = vadd.f32 %v528_v55, %v527_v50 }
 0x100   :  { %v530_v59 = vpop.f32.mrf.mxu0  ;;  %v609_v63 = vadd.f32 %v608_v56, %v607_v51 }
 0x101   :  { %v610_v60 = vpop.f32.mrf.mxu1  ;;  %v444_v61 = vmax.f32 %v386_v57, 0.0  ;;  %v246_v62 = vadd.f32 %v529_v58, %v1044_v2 }
 0x102   :  { %v531_v0 = vpop.f32.mrf.mxu0 }
 0x103   :  { %v611_v1 = vpop.f32.mrf.mxu1  ;;  %461 = vst.msk [vmem:[%s1129_s3 + $0x28] sm:$0xff] %vm455_vm0, %v444_v61  ;;  %v391_v3 = vadd.f32 %v609_v63, %v246_v62  ;;  %v532_v4 = vadd.f32 %v531_v0, %v530_v59 }
 0x104   :  { %v533_v5 = vpop.f32.mrf.mxu0  ;;  %v612_v9 = vadd.f32 %v611_v1, %v610_v60 }
 0x105   :  { %v613_v6 = vpop.f32.mrf.mxu1  ;;  %v445_v7 = vmax.f32 %v391_v3, 0.0  ;;  %v251_v8 = vadd.f32 %v532_v4, %v1044_v2 }
 0x106   :  { %v534_v10 = vpop.f32.mrf.mxu0 }
 0x107   :  { %v614_v11 = vpop.f32.mrf.mxu1  ;;  %462 = vst.msk [vmem:[%s1129_s3 + $0x30] sm:$0xff] %vm455_vm0, %v445_v7  ;;  %v396_v12 = vadd.f32 %v612_v9, %v251_v8  ;;  %v535_v13 = vadd.f32 %v534_v10, %v533_v5 }
 0x108   :  { %v536_v14 = vpop.f32.mrf.mxu0  ;;  %v615_v18 = vadd.f32 %v614_v11, %v613_v6 }
 0x109   :  { %v616_v15 = vpop.f32.mrf.mxu1  ;;  %v446_v16 = vmax.f32 %v396_v12, 0.0  ;;  %v256_v17 = vadd.f32 %v535_v13, %v1044_v2 }
 0x10a   :  { %v537_v19 = vpop.f32.mrf.mxu0 }
 0x10b   :  { %v617_v20 = vpop.f32.mrf.mxu1  ;;  %463 = vst.msk [vmem:[%s1129_s3 + $0x38] sm:$0xff] %vm455_vm0, %v446_v16  ;;  %v401_v21 = vadd.f32 %v615_v18, %v256_v17  ;;  %v538_v22 = vadd.f32 %v537_v19, %v536_v14 }
 0x10c   :  { %v539_v23 = vpop.f32.mrf.mxu0  ;;  %v618_v27 = vadd.f32 %v617_v20, %v616_v15 }
 0x10d   :  { %v619_v24 = vpop.f32.mrf.mxu1  ;;  %v447_v25 = vmax.f32 %v401_v21, 0.0  ;;  %v261_v26 = vadd.f32 %v538_v22, %v1044_v2 }
 0x10e   :  { %v540_v28 = vpop.f32.mrf.mxu0 }
 0x10f   :  { %v620_v29 = vpop.f32.mrf.mxu1  ;;  %464 = vst.msk [vmem:[%s1129_s3 + $0x40] sm:$0xff] %vm455_vm0, %v447_v25  ;;  %v406_v30 = vadd.f32 %v618_v27, %v261_v26  ;;  %v541_v31 = vadd.f32 %v540_v28, %v539_v23 }
 0x110   :  { %v542_v32 = vpop.f32.mrf.mxu0  ;;  %v621_v36 = vadd.f32 %v620_v29, %v619_v24 }
 0x111   :  { %v622_v33 = vpop.f32.mrf.mxu1  ;;  %v448_v34 = vmax.f32 %v406_v30, 0.0  ;;  %v266_v35 = vadd.f32 %v541_v31, %v1044_v2 }
 0x112   :  { %v543_v37 = vpop.f32.mrf.mxu0 }
 0x113   :  { %v623_v38 = vpop.f32.mrf.mxu1  ;;  %465 = vst.msk [vmem:[%s1129_s3 + $0x48] sm:$0xff] %vm455_vm0, %v448_v34  ;;  %v411_v39 = vadd.f32 %v621_v36, %v266_v35  ;;  %v544_v40 = vadd.f32 %v543_v37, %v542_v32 }
 0x114   :  { %v545_v41 = vpop.f32.mrf.mxu0  ;;  %v624_v45 = vadd.f32 %v623_v38, %v622_v33 }
 0x115   :  { %v625_v42 = vpop.f32.mrf.mxu1  ;;  %v449_v43 = vmax.f32 %v411_v39, 0.0  ;;  %v271_v44 = vadd.f32 %v544_v40, %v1044_v2 }
 0x116   :  { %v546_v46 = vpop.f32.mrf.mxu0 }
 0x117   :  { %v626_v47 = vpop.f32.mrf.mxu1  ;;  %466 = vst.msk [vmem:[%s1129_s3 + $0x50] sm:$0xff] %vm455_vm0, %v449_v43  ;;  %v416_v48 = vadd.f32 %v624_v45, %v271_v44  ;;  %v547_v49 = vadd.f32 %v546_v46, %v545_v41 }
 0x118   :  { %v548_v50 = vpop.f32.mrf.mxu0  ;;  %v627_v54 = vadd.f32 %v626_v47, %v625_v42 }
 0x119   :  { %v628_v51 = vpop.f32.mrf.mxu1  ;;  %v450_v52 = vmax.f32 %v416_v48, 0.0  ;;  %v276_v53 = vadd.f32 %v547_v49, %v1044_v2 }
 0x11a   :  { %v549_v55 = vpop.f32.mrf.mxu0 }
 0x11b   :  { %v629_v56 = vpop.f32.mrf.mxu1  ;;  %467 = vst.msk [vmem:[%s1129_s3 + $0x58] sm:$0xff] %vm455_vm0, %v450_v52  ;;  %v421_v57 = vadd.f32 %v627_v54, %v276_v53  ;;  %v550_v58 = vadd.f32 %v549_v55, %v548_v50 }
 0x11c   :  { %v551_v59 = vpop.f32.mrf.mxu0  ;;  %v630_v63 = vadd.f32 %v629_v56, %v628_v51 }
 0x11d   :  { %v631_v60 = vpop.f32.mrf.mxu1  ;;  %v451_v61 = vmax.f32 %v421_v57, 0.0  ;;  %v281_v62 = vadd.f32 %v550_v58, %v1044_v2 }
 0x11e   :  { %v552_v0 = vpop.f32.mrf.mxu0 }
 0x11f   :  { %v632_v1 = vpop.f32.mrf.mxu1  ;;  %468 = vst.msk [vmem:[%s1129_s3 + $0x60] sm:$0xff] %vm455_vm0, %v451_v61  ;;  %v426_v3 = vadd.f32 %v630_v63, %v281_v62  ;;  %v553_v4 = vadd.f32 %v552_v0, %v551_v59 }
 0x120   :  { %v554_v5 = vpop.f32.mrf.mxu0  ;;  %v633_v9 = vadd.f32 %v632_v1, %v631_v60 }
 0x121   :  { %v634_v6 = vpop.f32.mrf.mxu1  ;;  %v452_v7 = vmax.f32 %v426_v3, 0.0  ;;  %v286_v8 = vadd.f32 %v553_v4, %v1044_v2 }
 0x122   :  { %v555_v10 = vpop.f32.mrf.mxu0 }
 0x123   :  { %v635_v11 = vpop.f32.mrf.mxu1  ;;  %469 = vst.msk [vmem:[%s1129_s3 + $0x68] sm:$0xff] %vm455_vm0, %v452_v7  ;;  %v431_v12 = vadd.f32 %v633_v9, %v286_v8  ;;  %v556_v13 = vadd.f32 %v555_v10, %v554_v5 }
 0x124   :  { %v636_v16 = vadd.f32 %v635_v11, %v634_v6 }
 0x125   :  { %v453_v14 = vmax.f32 %v431_v12, 0.0  ;;  %v291_v15 = vadd.f32 %v556_v13, %v1044_v2 }
 0x127   :  { %470 = vst.msk [vmem:[%s1129_s3 + $0x70] sm:$0xff] %vm455_vm0, %v453_v14  ;;  %v436_v17 = vadd.f32 %v636_v16, %v291_v15 }
 0x129   :  { %v454_v18 = vmax.f32 %v436_v17, 0.0 }
 0x12b   :  { %471 = vst.msk [vmem:[%s1129_s3 + $0x78] sm:$0xff] %vm455_vm0, %v454_v18 }

// kernel: cnn_encoder_forward.7
= control target key start
LH: loop header
LB: loop body
LE: loop exit
PB: predicated region body
PF: predicated region fallthrough
CT: control target
= control target key end

     0   :  { %vm525_vm0 = vcmask 523264   ;;  %s1230_s1 = inlined_call_operand.vmem [shape: f32[1024,64], index: 1, kind: input, shape index: {}]   ;;  %s1231_s0 = inlined_call_operand.vmem [shape: f32[32,1024], index: 0, kind: input, shape index: {}]   ;;  %s1232_s2 = inlined_call_operand.vmem [shape: f32[1,64], index: 2, kind: input, shape index: {}]   ;;  %s1233_s3 = inlined_call_operand.vmem [shape: f32[32,64], index: 3, kind: output, shape index: {}]  }
   0x1   :  { %v77_v0 = vld [vmem:[%s1230_s1 + $0xf8] sm:$0xff]  ;;  %v76_v4 = vld [vmem:[%s1230_s1 + $0xf0] sm:$0xff]  ;;  %v75_v8 = vld [vmem:[%s1230_s1 + $0xe8] sm:$0xff] }
   0x2   :  { %v109_v1 = vld [vmem:[%s1230_s1 + $0x1f8] sm:$0xff]  ;;  %535 = vmatprep.subr.mxu0 %v77_v0  ;;  %v108_v5 = vld [vmem:[%s1230_s1 + $0x1f0] sm:$0xff]  ;;  %v107_v9 = vld [vmem:[%s1230_s1 + $0x1e8] sm:$0xff] }
   0x3   :  { %v61_v2 = vld [vmem:[%s1230_s1 + $0x78] sm:$0xff]  ;;  %579 = vmatprep.subr.mxu1 %v109_v1  ;;  %v60_v6 = vld [vmem:[%s1230_s1 + $0x70] sm:$0xff]  ;;  %v59_v10 = vld [vmem:[%s1230_s1 + $0x68] sm:$0xff] }
   0x4   :  { %v93_v3 = vld [vmem:[%s1230_s1 + $0x178] sm:$0xff]  ;;  %536 = vmatpush3.msra.mxu0 %v61_v2  ;;  %v92_v7 = vld [vmem:[%s1230_s1 + $0x170] sm:$0xff]  ;;  %v91_v11 = vld [vmem:[%s1230_s1 + $0x168] sm:$0xff] }
   0x5   :  { %580 = vmatpush3.msra.mxu1 %v93_v3  ;;  %537 = vmatprep.subr.mxu0 %v76_v4  ;;  %v74_v12 = vld [vmem:[%s1230_s1 + $0xe0] sm:$0xff]  ;;  %v73_v16 = vld [vmem:[%s1230_s1 + $0xd8] sm:$0xff]  ;;  %v72_v20 = vld [vmem:[%s1230_s1 + $0xd0] sm:$0xff] }
   0x6   :  { %581 = vmatprep.subr.mxu1 %v108_v5  ;;  %538 = vmatpush3.msra.mxu0 %v60_v6  ;;  %v106_v13 = vld [vmem:[%s1230_s1 + $0x1e0] sm:$0xff]  ;;  %v105_v17 = vld [vmem:[%s1230_s1 + $0x1d8] sm:$0xff]  ;;  %v104_v21 = vld [vmem:[%s1230_s1 + $0x1d0] sm:$0xff] }
   0x7   :  { %582 = vmatpush3.msra.mxu1 %v92_v7  ;;  %539 = vmatprep.subr.mxu0 %v75_v8  ;;  %v58_v14 = vld [vmem:[%s1230_s1 + $0x60] sm:$0xff]  ;;  %v57_v18 = vld [vmem:[%s1230_s1 + $0x58] sm:$0xff]  ;;  %v56_v22 = vld [vmem:[%s1230_s1 + $0x50] sm:$0xff] }
   0x8   :  { %583 = vmatprep.subr.mxu1 %v107_v9  ;;  %v90_v15 = vld [vmem:[%s1230_s1 + $0x160] sm:$0xff]  ;;  %540 = vmatpush3.msra.mxu0 %v59_v10  ;;  %v89_v19 = vld [vmem:[%s1230_s1 + $0x158] sm:$0xff]  ;;  %v88_v23 = vld [vmem:[%s1230_s1 + $0x150] sm:$0xff] }
   0x9   :  { %584 = vmatpush3.msra.mxu1 %v91_v11  ;;  %541 = vmatprep.subr.mxu0 %v74_v12  ;;  %v71_v24 = vld [vmem:[%s1230_s1 + $0xc8] sm:$0xff]  ;;  %v70_v28 = vld [vmem:[%s1230_s1 + $0xc0] sm:$0xff]  ;;  %v69_v32 = vld [vmem:[%s1230_s1 + $0xb8] sm:$0xff] }
   0xa   :  { %585 = vmatprep.subr.mxu1 %v106_v13  ;;  %542 = vmatpush3.msra.mxu0 %v58_v14  ;;  %v103_v25 = vld [vmem:[%s1230_s1 + $0x1c8] sm:$0xff]  ;;  %v102_v29 = vld [vmem:[%s1230_s1 + $0x1c0] sm:$0xff]  ;;  %v101_v33 = vld [vmem:[%s1230_s1 + $0x1b8] sm:$0xff] }
   0xb   :  { %586 = vmatpush3.msra.mxu1 %v90_v15  ;;  %543 = vmatprep.subr.mxu0 %v73_v16  ;;  %v55_v26 = vld [vmem:[%s1230_s1 + $0x48] sm:$0xff]  ;;  %v54_v30 = vld [vmem:[%s1230_s1 + $0x40] sm:$0xff]  ;;  %v53_v34 = vld [vmem:[%s1230_s1 + $0x38] sm:$0xff] }
   0xc   :  { %587 = vmatprep.subr.mxu1 %v105_v17  ;;  %544 = vmatpush3.msra.mxu0 %v57_v18  ;;  %v87_v27 = vld [vmem:[%s1230_s1 + $0x148] sm:$0xff]  ;;  %v86_v31 = vld [vmem:[%s1230_s1 + $0x140] sm:$0xff]  ;;  %v85_v35 = vld [vmem:[%s1230_s1 + $0x138] sm:$0xff] }
   0xd   :  { %588 = vmatpush3.msra.mxu1 %v89_v19  ;;  %545 = vmatprep.subr.mxu0 %v72_v20  ;;  %v68_v36 = vld [vmem:[%s1230_s1 + $0xb0] sm:$0xff]  ;;  %v67_v40 = vld [vmem:[%s1230_s1 + $0xa8] sm:$0xff]  ;;  %v66_v44 = vld [vmem:[%s1230_s1 + $0xa0] sm:$0xff] }
   0xe   :  { %589 = vmatprep.subr.mxu1 %v104_v21  ;;  %546 = vmatpush3.msra.mxu0 %v56_v22  ;;  %v100_v37 = vld [vmem:[%s1230_s1 + $0x1b0] sm:$0xff]  ;;  %v99_v41 = vld [vmem:[%s1230_s1 + $0x1a8] sm:$0xff]  ;;  %v98_v45 = vld [vmem:[%s1230_s1 + $0x1a0] sm:$0xff] }
   0xf   :  { %590 = vmatpush3.msra.mxu1 %v88_v23  ;;  %547 = vmatprep.subr.mxu0 %v71_v24  ;;  %v52_v38 = vld [vmem:[%s1230_s1 + $0x30] sm:$0xff]  ;;  %v51_v42 = vld [vmem:[%s1230_s1 + $0x28] sm:$0xff]  ;;  %v50_v46 = vld [vmem:[%s1230_s1 + $0x20] sm:$0xff] }
  0x10   :  { %591 = vmatprep.subr.mxu1 %v103_v25  ;;  %548 = vmatpush3.msra.mxu0 %v55_v26  ;;  %v84_v39 = vld [vmem:[%s1230_s1 + $0x130] sm:$0xff]  ;;  %v83_v43 = vld [vmem:[%s1230_s1 + $0x128] sm:$0xff]  ;;  %v82_v47 = vld [vmem:[%s1230_s1 + $0x120] sm:$0xff] }
  0x11   :  { %592 = vmatpush3.msra.mxu1 %v87_v27  ;;  %549 = vmatprep.subr.mxu0 %v70_v28  ;;  %v65_v48 = vld [vmem:[%s1230_s1 + $0x98] sm:$0xff]  ;;  %v64_v52 = vld [vmem:[%s1230_s1 + $0x90] sm:$0xff]  ;;  %v63_v56 = vld [vmem:[%s1230_s1 + $0x88] sm:$0xff] }
  0x12   :  { %593 = vmatprep.subr.mxu1 %v102_v29  ;;  %550 = vmatpush3.msra.mxu0 %v54_v30  ;;  %v97_v49 = vld [vmem:[%s1230_s1 + $0x198] sm:$0xff]  ;;  %v96_v53 = vld [vmem:[%s1230_s1 + $0x190] sm:$0xff]  ;;  %v95_v57 = vld [vmem:[%s1230_s1 + $0x188] sm:$0xff] }
  0x13   :  { %594 = vmatpush3.msra.mxu1 %v86_v31  ;;  %551 = vmatprep.subr.mxu0 %v69_v32  ;;  %v49_v50 = vld [vmem:[%s1230_s1 + $0x18] sm:$0xff]  ;;  %v48_v54 = vld [vmem:[%s1230_s1 + $0x10] sm:$0xff]  ;;  %v47_v58 = vld [vmem:[%s1230_s1 + $0x8] sm:$0xff] }
  0x14   :  { %595 = vmatprep.subr.mxu1 %v101_v33  ;;  %552 = vmatpush3.msra.mxu0 %v53_v34  ;;  %v81_v51 = vld [vmem:[%s1230_s1 + $0x118] sm:$0xff]  ;;  %v80_v55 = vld [vmem:[%s1230_s1 + $0x110] sm:$0xff]  ;;  %v79_v59 = vld [vmem:[%s1230_s1 + $0x108] sm:$0xff] }
  0x15   :  { %596 = vmatpush3.msra.mxu1 %v85_v35  ;;  %553 = vmatprep.subr.mxu0 %v68_v36  ;;  %v62_v60 = vld [vmem:[%s1230_s1 + $0x80] sm:$0xff]  ;;  %v15_v63 = vld [vmem:[%s1231_s0 + $0x8] sm:$0xff]  ;;  %v17_v2 = vld [vmem:[%s1231_s0 + $0x18] sm:$0xff] }
  0x16   :  { %597 = vmatprep.subr.mxu1 %v100_v37  ;;  %554 = vmatpush3.msra.mxu0 %v52_v38  ;;  %v94_v61 = vld [vmem:[%s1230_s1 + $0x180] sm:$0xff]  ;;  %v141_v3 = vld [vmem:[%s1230_s1 + $0x2f8] sm:$0xff]  ;;  %v16_v5 = vld [vmem:[%s1231_s0 + $0x10] sm:$0xff] }
  0x17   :  { %598 = vmatpush3.msra.mxu1 %v84_v39  ;;  %555 = vmatprep.subr.mxu0 %v67_v40  ;;  %v46_v62 = vld [vmem:[%s1230_s1] sm:$0xff]  ;;  %v173_v4 = vld [vmem:[%s1230_s1 + $0x3f8] sm:$0xff]  ;;  %v140_v8 = vld [vmem:[%s1230_s1 + $0x2f0] sm:$0xff] }
  0x18   :  { %599 = vmatprep.subr.mxu1 %v99_v41  ;;  %556 = vmatpush3.msra.mxu0 %v51_v42  ;;  %v78_v0 = vld [vmem:[%s1230_s1 + $0x100] sm:$0xff]  ;;  %v125_v6 = vld [vmem:[%s1230_s1 + $0x278] sm:$0xff]  ;;  %v172_v9 = vld [vmem:[%s1230_s1 + $0x3f0] sm:$0xff] }
  0x19   :  { %600 = vmatpush3.msra.mxu1 %v83_v43  ;;  %557 = vmatprep.subr.mxu0 %v66_v44  ;;  %v14_v1 = vld [vmem:[%s1231_s0] sm:$0xff]  ;;  %v157_v7 = vld [vmem:[%s1230_s1 + $0x378] sm:$0xff]  ;;  %v124_v10 = vld [vmem:[%s1230_s1 + $0x270] sm:$0xff] }
  0x1a   :  { %601 = vmatprep.subr.mxu1 %v98_v45  ;;  %558 = vmatpush3.msra.mxu0 %v50_v46  ;;  %v156_v11 = vld [vmem:[%s1230_s1 + $0x370] sm:$0xff]  ;;  %v139_v12 = vld [vmem:[%s1230_s1 + $0x2e8] sm:$0xff]  ;;  %v138_v16 = vld [vmem:[%s1230_s1 + $0x2e0] sm:$0xff] }
  0x1b   :  { %602 = vmatpush3.msra.mxu1 %v82_v47  ;;  %559 = vmatprep.subr.mxu0 %v65_v48  ;;  %v171_v13 = vld [vmem:[%s1230_s1 + $0x3e8] sm:$0xff]  ;;  %v170_v17 = vld [vmem:[%s1230_s1 + $0x3e0] sm:$0xff]  ;;  %v137_v20 = vld [vmem:[%s1230_s1 + $0x2d8] sm:$0xff] }
  0x1c   :  { %603 = vmatprep.subr.mxu1 %v97_v49  ;;  %560 = vmatpush3.msra.mxu0 %v49_v50  ;;  %v123_v14 = vld [vmem:[%s1230_s1 + $0x268] sm:$0xff]  ;;  %v122_v18 = vld [vmem:[%s1230_s1 + $0x260] sm:$0xff]  ;;  %v169_v21 = vld [vmem:[%s1230_s1 + $0x3d8] sm:$0xff] }
  0x1d   :  { %604 = vmatpush3.msra.mxu1 %v81_v51  ;;  %561 = vmatprep.subr.mxu0 %v64_v52  ;;  %v155_v15 = vld [vmem:[%s1230_s1 + $0x368] sm:$0xff]  ;;  %v154_v19 = vld [vmem:[%s1230_s1 + $0x360] sm:$0xff]  ;;  %v121_v22 = vld [vmem:[%s1230_s1 + $0x258] sm:$0xff] }
  0x1e   :  { %605 = vmatprep.subr.mxu1 %v96_v53  ;;  %562 = vmatpush3.msra.mxu0 %v48_v54  ;;  %v153_v23 = vld [vmem:[%s1230_s1 + $0x358] sm:$0xff]  ;;  %v136_v24 = vld [vmem:[%s1230_s1 + $0x2d0] sm:$0xff]  ;;  %v135_v28 = vld [vmem:[%s1230_s1 + $0x2c8] sm:$0xff] }
  0x1f   :  { %606 = vmatpush3.msra.mxu1 %v80_v55  ;;  %563 = vmatprep.subr.mxu0 %v63_v56  ;;  %v168_v25 = vld [vmem:[%s1230_s1 + $0x3d0] sm:$0xff]  ;;  %v167_v29 = vld [vmem:[%s1230_s1 + $0x3c8] sm:$0xff]  ;;  %v134_v32 = vld [vmem:[%s1230_s1 + $0x2c0] sm:$0xff] }
  0x20   :  { %607 = vmatprep.subr.mxu1 %v95_v57  ;;  %564 = vmatpush3.msra.mxu0 %v47_v58  ;;  %v120_v26 = vld [vmem:[%s1230_s1 + $0x250] sm:$0xff]  ;;  %v119_v30 = vld [vmem:[%s1230_s1 + $0x248] sm:$0xff]  ;;  %v166_v33 = vld [vmem:[%s1230_s1 + $0x3c0] sm:$0xff] }
  0x21   :  { %608 = vmatpush3.msra.mxu1 %v79_v59  ;;  %565 = vmatprep.subr.mxu0 %v62_v60  ;;  %v152_v27 = vld [vmem:[%s1230_s1 + $0x350] sm:$0xff]  ;;  %v151_v31 = vld [vmem:[%s1230_s1 + $0x348] sm:$0xff]  ;;  %v118_v34 = vld [vmem:[%s1230_s1 + $0x240] sm:$0xff] }
  0x22   :  { %609 = vmatprep.subr.mxu1 %v94_v61  ;;  %566 = vmatpush3.msra.mxu0 %v46_v62  ;;  %v150_v35 = vld [vmem:[%s1230_s1 + $0x340] sm:$0xff]  ;;  %v133_v36 = vld [vmem:[%s1230_s1 + $0x2b8] sm:$0xff]  ;;  %v23_v38 = vld [vmem:[%s1231_s0 + $0x48] sm:$0xff] }
  0x23   :  { %245 = vmatprep.mubr.f32.mxu0 %v15_v63  ;;  %610 = vmatpush3.msra.mxu1 %v78_v0  ;;  %v165_v37 = vld [vmem:[%s1230_s1 + $0x3b8] sm:$0xff]  ;;  %v22_v41 = vld [vmem:[%s1231_s0 + $0x40] sm:$0xff]  ;;  %v132_v42 = vld [vmem:[%s1230_s1 + $0x2b0] sm:$0xff] }
  0x24   :  { %246 = vmatmul.mubr.f32.vlgmr.msra.gmra.mxu0 %v14_v1  ;;  %330 = vmatprep.mubr.f32.mxu1 %v17_v2  ;;  %v117_v39 = vld [vmem:[%s1230_s1 + $0x238] sm:$0xff]  ;;  %v164_v43 = vld [vmem:[%s1230_s1 + $0x3b0] sm:$0xff]  ;;  %v131_v47 = vld [vmem:[%s1230_s1 + $0x2a8] sm:$0xff] }
  0x25   :  { %623 = vmatprep.subr.mxu0 %v141_v3  ;;  %667 = vmatprep.subr.mxu1 %v173_v4  ;;  %v149_v40 = vld [vmem:[%s1230_s1 + $0x338] sm:$0xff]  ;;  %v116_v45 = vld [vmem:[%s1230_s1 + $0x230] sm:$0xff]  ;;  %v163_v49 = vld [vmem:[%s1230_s1 + $0x3a8] sm:$0xff] }
  0x26   :  { %331 = vmatmul.mubr.f32.vlgmr.msra.gmra.mxu1 %v16_v5  ;;  %624 = vmatpush3.msra.mxu0 %v125_v6  ;;  %v25_v44 = vld [vmem:[%s1231_s0 + $0x58] sm:$0xff]  ;;  %v148_v46 = vld [vmem:[%s1230_s1 + $0x330] sm:$0xff]  ;;  %v31_v50 = vld [vmem:[%s1231_s0 + $0x88] sm:$0xff] }
  0x27   :  { %668 = vmatpush3.msra.mxu1 %v157_v7  ;;  %625 = vmatprep.subr.mxu0 %v140_v8  ;;  %v24_v48 = vld [vmem:[%s1231_s0 + $0x50] sm:$0xff]  ;;  %v115_v51 = vld [vmem:[%s1230_s1 + $0x228] sm:$0xff]  ;;  %v30_v53 = vld [vmem:[%s1231_s0 + $0x80] sm:$0xff] }
  0x28   :  { %669 = vmatprep.subr.mxu1 %v172_v9  ;;  %626 = vmatpush3.msra.mxu0 %v124_v10  ;;  %v147_v52 = vld [vmem:[%s1230_s1 + $0x328] sm:$0xff]  ;;  %v130_v54 = vld [vmem:[%s1230_s1 + $0x2a0] sm:$0xff]  ;;  %v33_v56 = vld [vmem:[%s1231_s0 + $0x98] sm:$0xff] }
  0x29   :  { %670 = vmatpush3.msra.mxu1 %v156_v11  ;;  %627 = vmatprep.subr.mxu0 %v139_v12  ;;  %v162_v55 = vld [vmem:[%s1230_s1 + $0x3a0] sm:$0xff]  ;;  %v129_v59 = vld [vmem:[%s1230_s1 + $0x298] sm:$0xff]  ;;  %v32_v60 = vld [vmem:[%s1231_s0 + $0x90] sm:$0xff] }
  0x2a   :  { %671 = vmatprep.subr.mxu1 %v171_v13  ;;  %628 = vmatpush3.msra.mxu0 %v123_v14  ;;  %v114_v57 = vld [vmem:[%s1230_s1 + $0x220] sm:$0xff]  ;;  %v161_v61 = vld [vmem:[%s1230_s1 + $0x398] sm:$0xff]  ;;  %v39_v62 = vld [vmem:[%s1231_s0 + $0xc8] sm:$0xff] }
  0x2b   :  { %672 = vmatpush3.msra.mxu1 %v155_v15  ;;  %629 = vmatprep.subr.mxu0 %v138_v16  ;;  %v146_v58 = vld [vmem:[%s1230_s1 + $0x320] sm:$0xff]  ;;  %v113_v63 = vld [vmem:[%s1230_s1 + $0x218] sm:$0xff]  ;;  %v128_v2 = vld [vmem:[%s1230_s1 + $0x290] sm:$0xff] }
  0x2c   :  { %673 = vmatprep.subr.mxu1 %v170_v17  ;;  %630 = vmatpush3.msra.mxu0 %v122_v18  ;;  %v145_v0 = vld [vmem:[%s1230_s1 + $0x318] sm:$0xff]  ;;  %v38_v1 = vld [vmem:[%s1231_s0 + $0xc0] sm:$0xff]  ;;  %v160_v3 = vld [vmem:[%s1230_s1 + $0x390] sm:$0xff] }
  0x2d   :  { %674 = vmatpush3.msra.mxu1 %v154_v19  ;;  %631 = vmatprep.subr.mxu0 %v137_v20  ;;  %v41_v4 = vld [vmem:[%s1231_s0 + $0xd8] sm:$0xff]  ;;  %v112_v5 = vld [vmem:[%s1230_s1 + $0x210] sm:$0xff]  ;;  %v127_v7 = vld [vmem:[%s1230_s1 + $0x288] sm:$0xff] }
  0x2e   :  { %675 = vmatprep.subr.mxu1 %v169_v21  ;;  %632 = vmatpush3.msra.mxu0 %v121_v22  ;;  %v144_v6 = vld [vmem:[%s1230_s1 + $0x310] sm:$0xff]  ;;  %v159_v9 = vld [vmem:[%s1230_s1 + $0x388] sm:$0xff]  ;;  %v126_v12 = vld [vmem:[%s1230_s1 + $0x280] sm:$0xff] }
  0x2f   :  { %676 = vmatpush3.msra.mxu1 %v153_v23  ;;  %633 = vmatprep.subr.mxu0 %v136_v24  ;;  %v40_v8 = vld [vmem:[%s1231_s0 + $0xd0] sm:$0xff]  ;;  %v111_v10 = vld [vmem:[%s1230_s1 + $0x208] sm:$0xff]  ;;  %v158_v13 = vld [vmem:[%s1230_s1 + $0x380] sm:$0xff] }
  0x30   :  { %677 = vmatprep.subr.mxu1 %v168_v25  ;;  %634 = vmatpush3.msra.mxu0 %v120_v26  ;;  %v143_v11 = vld [vmem:[%s1230_s1 + $0x308] sm:$0xff]  ;;  %v110_v14 = vld [vmem:[%s1230_s1 + $0x200] sm:$0xff]  ;;  %v21_v17 = vld [vmem:[%s1231_s0 + $0x38] sm:$0xff] }
  0x31   :  { %678 = vmatpush3.msra.mxu1 %v152_v27  ;;  %635 = vmatprep.subr.mxu0 %v135_v28  ;;  %v19_v15 = vld [vmem:[%s1231_s0 + $0x28] sm:$0xff]  ;;  %v142_v16 = vld [vmem:[%s1230_s1 + $0x300] sm:$0xff]  ;;  %v20_v19 = vld [vmem:[%s1231_s0 + $0x30] sm:$0xff] }
  0x32   :  { %679 = vmatprep.subr.mxu1 %v167_v29  ;;  %636 = vmatpush3.msra.mxu0 %v119_v30  ;;  %v18_v18 = vld [vmem:[%s1231_s0 + $0x20] sm:$0xff]  ;;  %v27_v20 = vld [vmem:[%s1231_s0 + $0x68] sm:$0xff]  ;;  %v29_v21 = vld [vmem:[%s1231_s0 + $0x78] sm:$0xff] }
  0x33   :  { %680 = vmatpush3.msra.mxu1 %v151_v31  ;;  %637 = vmatprep.subr.mxu0 %v134_v32  ;;  %v26_v22 = vld [vmem:[%s1231_s0 + $0x60] sm:$0xff]  ;;  %v28_v23 = vld [vmem:[%s1231_s0 + $0x70] sm:$0xff]  ;;  %v35_v24 = vld [vmem:[%s1231_s0 + $0xa8] sm:$0xff] }
  0x34   :  { %681 = vmatprep.subr.mxu1 %v166_v33  ;;  %638 = vmatpush3.msra.mxu0 %v118_v34  ;;  %v37_v25 = vld [vmem:[%s1231_s0 + $0xb8] sm:$0xff]  ;;  %v34_v26 = vld [vmem:[%s1231_s0 + $0xa0] sm:$0xff]  ;;  %v36_v27 = vld [vmem:[%s1231_s0 + $0xb0] sm:$0xff] }
  0x35   :  { %682 = vmatpush3.msra.mxu1 %v150_v35  ;;  %639 = vmatprep.subr.mxu0 %v133_v36  ;;  %v43_v28 = vld [vmem:[%s1231_s0 + $0xe8] sm:$0xff]  ;;  %v45_v29 = vld [vmem:[%s1231_s0 + $0xf8] sm:$0xff]  ;;  %v42_v30 = vld [vmem:[%s1231_s0 + $0xe0] sm:$0xff] }
  0x36   :  { %683 = vmatprep.subr.mxu1 %v165_v37  ;;  %250 = vmatprep.mubr.f32.mxu0 %v23_v38  ;;  %v44_v31 = vld [vmem:[%s1231_s0 + $0xf0] sm:$0xff] }
  0x37   :  { %640 = vmatpush3.msra.mxu0 %v117_v39  ;;  %684 = vmatpush3.msra.mxu1 %v149_v40 }
  0x38   :  { %251 = vmatmul.mubr.f32.gmra.mxu0 %v22_v41  ;;  %641 = vmatprep.subr.mxu0 %v132_v42 }
  0x39   :  { %685 = vmatprep.subr.mxu1 %v164_v43  ;;  %335 = vmatprep.mubr.f32.mxu1 %v25_v44 }
  0x3a   :  { %642 = vmatpush3.msra.mxu0 %v116_v45  ;;  %686 = vmatpush3.msra.mxu1 %v148_v46 }
  0x3b   :  { %643 = vmatprep.subr.mxu0 %v131_v47  ;;  %336 = vmatmul.mubr.f32.gmra.mxu1 %v24_v48  ;;  %v534_v47 = vld [vmem:[%s1232_s2] ss:$0 sm:$0xff] }
  0x3c   :  { %687 = vmatprep.subr.mxu1 %v163_v49  ;;  %255 = vmatprep.mubr.f32.mxu0 %v31_v50 }
  0x3d   :  { %644 = vmatpush3.msra.mxu0 %v115_v51  ;;  %688 = vmatpush3.msra.mxu1 %v147_v52 }
  0x3e   :  { %256 = vmatmul.mubr.f32.gmra.mxu0 %v30_v53  ;;  %645 = vmatprep.subr.mxu0 %v130_v54 }
  0x3f   :  { %689 = vmatprep.subr.mxu1 %v162_v55  ;;  %340 = vmatprep.mubr.f32.mxu1 %v33_v56 }
  0x40   :  { %646 = vmatpush3.msra.mxu0 %v114_v57  ;;  %690 = vmatpush3.msra.mxu1 %v146_v58 }
  0x41   :  { %647 = vmatprep.subr.mxu0 %v129_v59  ;;  %341 = vmatmul.mubr.f32.gmra.mxu1 %v32_v60 }
  0x42   :  { %691 = vmatprep.subr.mxu1 %v161_v61  ;;  %260 = vmatprep.mubr.f32.mxu0 %v39_v62 }
  0x43   :  { %648 = vmatpush3.msra.mxu0 %v113_v63  ;;  %692 = vmatpush3.msra.mxu1 %v145_v0 }
  0x44   :  { %261 = vmatmul.mubr.f32.gmra.mxu0 %v38_v1  ;;  %649 = vmatprep.subr.mxu0 %v128_v2 }
  0x45   :  { %693 = vmatprep.subr.mxu1 %v160_v3  ;;  %345 = vmatprep.mubr.f32.mxu1 %v41_v4 }
  0x46   :  { %650 = vmatpush3.msra.mxu0 %v112_v5  ;;  %694 = vmatpush3.msra.mxu1 %v144_v6 }
  0x47   :  { %651 = vmatprep.subr.mxu0 %v127_v7  ;;  %346 = vmatmul.mubr.f32.gmra.mxu1 %v40_v8 }
  0x48   :  { %695 = vmatprep.subr.mxu1 %v159_v9  ;;  %652 = vmatpush3.msra.mxu0 %v111_v10 }
  0x49   :  { %696 = vmatpush3.msra.mxu1 %v143_v11  ;;  %653 = vmatprep.subr.mxu0 %v126_v12 }
  0x4a   :  { %697 = vmatprep.subr.mxu1 %v158_v13  ;;  %654 = vmatpush3.msra.mxu0 %v110_v14 }
  0x4b   :  { %415 = vmatprep.mubr.f32.mxu0 %v19_v15  ;;  %698 = vmatpush3.msra.mxu1 %v142_v16 }
  0x4c   :  { %500 = vmatprep.mubr.f32.mxu1 %v21_v17  ;;  %416 = vmatmul.mubr.f32.vlgmr.msra.gmra.mxu0 %v18_v18 }
  0x4d   :  { %501 = vmatmul.mubr.f32.vlgmr.msra.gmra.mxu1 %v20_v19  ;;  %420 = vmatprep.mubr.f32.mxu0 %v27_v20 }
  0x4e   :  { %505 = vmatprep.mubr.f32.mxu1 %v29_v21 }
  0x50   :  { %421 = vmatmul.mubr.f32.gmra.mxu0 %v26_v22 }
  0x51   :  { %506 = vmatmul.mubr.f32.gmra.mxu1 %v28_v23  ;;  %425 = vmatprep.mubr.f32.mxu0 %v35_v24 }
  0x52   :  { %510 = vmatprep.mubr.f32.mxu1 %v37_v25 }
  0x54   :  { %426 = vmatmul.mubr.f32.gmra.mxu0 %v34_v26 }
  0x55   :  { %511 = vmatmul.mubr.f32.gmra.mxu1 %v36_v27  ;;  %430 = vmatprep.mubr.f32.mxu0 %v43_v28 }
  0x56   :  { %515 = vmatprep.mubr.f32.mxu1 %v45_v29 }
  0x58   :  { %431 = vmatmul.mubr.f32.gmra.mxu0 %v42_v30 }
  0x59   :  { %516 = vmatmul.mubr.f32.gmra.mxu1 %v44_v31 }
  0xe4   :  { %v567_v32 = vpop.f32.mrf.mxu0 }
  0xe6   :  { %v611_v33 = vpop.f32.mrf.mxu1  ;;  %v568_v34 = vpop.f32.mrf.mxu0 }
  0xe7   :  { %v569_v45 = vadd.f32 %v568_v34, %v567_v32 }
  0xe8   :  { %v612_v36 = vpop.f32.mrf.mxu1 }
  0xe9   :  { %v248_v50 = vadd.f32 %v569_v45, %v534_v47  ;;  %v613_v51 = vadd.f32 %v612_v36, %v611_v33 }
  0xeb   :  { %v333_v58 = vadd.f32 %v613_v51, %v248_v50 }
  0xf8   :  { %v570_v35 = vpop.f32.mrf.mxu0 }
  0xfa   :  { %v571_v37 = vpop.f32.mrf.mxu0 }
  0xfb   :  { %v614_v38 = vpop.f32.mrf.mxu1  ;;  %v572_v52 = vadd.f32 %v571_v37, %v570_v35 }
  0xfd   :  { %v615_v39 = vpop.f32.mrf.mxu1  ;;  %v253_v59 = vadd.f32 %v572_v52, %v534_v47 }
  0xfe   :  { %v573_v40 = vpop.f32.mrf.mxu0  ;;  %v616_v60 = vadd.f32 %v615_v39, %v614_v38 }
 0x100   :  { %v574_v42 = vpop.f32.mrf.mxu0  ;;  %v338_v6 = vadd.f32 %v616_v60, %v253_v59 }
 0x101   :  { %v617_v41 = vpop.f32.mrf.mxu1  ;;  %v575_v55 = vadd.f32 %v574_v42, %v573_v40 }
 0x103   :  { %v618_v43 = vpop.f32.mrf.mxu1  ;;  %v258_v2 = vadd.f32 %v575_v55, %v534_v47 }
 0x104   :  { %v576_v44 = vpop.f32.mrf.mxu0  ;;  %v619_v3 = vadd.f32 %v618_v43, %v617_v41 }
 0x106   :  { %v577_v49 = vpop.f32.mrf.mxu0  ;;  %v343_v15 = vadd.f32 %v619_v3, %v258_v2 }
 0x107   :  { %v620_v46 = vpop.f32.mrf.mxu1  ;;  %v578_v7 = vadd.f32 %v577_v49, %v576_v44 }
 0x109   :  { %v621_v48 = vpop.f32.mrf.mxu1  ;;  %v263_v18 = vadd.f32 %v578_v7, %v534_v47 }
 0x10a   :  { %v622_v19 = vadd.f32 %v621_v48, %v620_v46 }
 0x10c   :  { %v655_v53 = vpop.f32.mrf.mxu0  ;;  %v348_v29 = vadd.f32 %v622_v19, %v263_v18 }
 0x10d   :  { %v699_v54 = vpop.f32.mrf.mxu1 }
 0x10e   :  { %v656_v56 = vpop.f32.mrf.mxu0 }
 0x10f   :  { %v700_v57 = vpop.f32.mrf.mxu1  ;;  %v657_v61 = vadd.f32 %v656_v56, %v655_v53 }
 0x110   :  { %v658_v62 = vpop.f32.mrf.mxu0  ;;  %v701_v1 = vadd.f32 %v700_v57, %v699_v54 }
 0x111   :  { %v702_v63 = vpop.f32.mrf.mxu1  ;;  %v418_v0 = vadd.f32 %v657_v61, %v333_v58 }
 0x112   :  { %v659_v4 = vpop.f32.mrf.mxu0 }
 0x113   :  { %v703_v5 = vpop.f32.mrf.mxu1  ;;  %v503_v8 = vadd.f32 %v701_v1, %v418_v0  ;;  %v660_v9 = vadd.f32 %v659_v4, %v658_v62 }
 0x114   :  { %v661_v10 = vpop.f32.mrf.mxu0  ;;  %v704_v14 = vadd.f32 %v703_v5, %v702_v63 }
 0x115   :  { %v705_v11 = vpop.f32.mrf.mxu1  ;;  %v521_v12 = vmax.f32 %v503_v8, 0.0  ;;  %v423_v13 = vadd.f32 %v660_v9, %v338_v6 }
 0x116   :  { %v662_v16 = vpop.f32.mrf.mxu0 }
 0x117   :  { %v706_v17 = vpop.f32.mrf.mxu1  ;;  %526 = vst.msk [vmem:[%s1233_s3] sm:$0xff] %vm525_vm0, %v521_v12  ;;  %v508_v20 = vadd.f32 %v704_v14, %v423_v13  ;;  %v663_v21 = vadd.f32 %v662_v16, %v661_v10 }
 0x118   :  { %v664_v22 = vpop.f32.mrf.mxu0  ;;  %v707_v26 = vadd.f32 %v706_v17, %v705_v11 }
 0x119   :  { %v708_v23 = vpop.f32.mrf.mxu1  ;;  %v522_v24 = vmax.f32 %v508_v20, 0.0  ;;  %v428_v25 = vadd.f32 %v663_v21, %v343_v15 }
 0x11a   :  { %v665_v27 = vpop.f32.mrf.mxu0 }
 0x11b   :  { %v709_v28 = vpop.f32.mrf.mxu1  ;;  %527 = vst.msk [vmem:[%s1233_s3 + $0x8] sm:$0xff] %vm525_vm0, %v522_v24  ;;  %v513_v30 = vadd.f32 %v707_v26, %v428_v25  ;;  %v666_v31 = vadd.f32 %v665_v27, %v664_v22 }
 0x11c   :  { %v710_v34 = vadd.f32 %v709_v28, %v708_v23 }
 0x11d   :  { %v523_v32 = vmax.f32 %v513_v30, 0.0  ;;  %v433_v33 = vadd.f32 %v666_v31, %v348_v29 }
 0x11f   :  { %528 = vst.msk [vmem:[%s1233_s3 + $0x10] sm:$0xff] %vm525_vm0, %v523_v32  ;;  %v518_v35 = vadd.f32 %v710_v34, %v433_v33 }
 0x121   :  { %v524_v36 = vmax.f32 %v518_v35, 0.0 }
 0x123   :  { %529 = vst.msk [vmem:[%s1233_s3 + $0x18] sm:$0xff] %vm525_vm0, %v524_v36 }

</bundles_post_ra>
